<compile_context>
chip_gen: v7x
topology: tpu7x:2x2x1
jax: 0.10.0
libtpu: 0.0.40
codegen_flags: <defaults>
</compile_context>

<pallas_src>
import math

import jax
import jax.numpy as jnp
import numpy as np
from jax.experimental import pallas as pl
from jax.experimental.pallas import tpu as pltpu

EPS = 1e-5  # torch.nn.InstanceNorm2d default eps


# ----------------------------------------------------------------------------
# In-kernel helpers (traced inside the Pallas kernel body)
# ----------------------------------------------------------------------------
def _reflect_pad1_inner(a):
    """In-kernel ReflectionPad2d(1): (C, H, W) -> (C, H+2, W+2)."""
    H, W = a.shape[1], a.shape[2]
    a = jnp.concatenate([a[:, 1:2, :], a, a[:, H - 2:H - 1, :]], axis=1)
    a = jnp.concatenate([a[:, :, 1:2], a, a[:, :, W - 2:W - 1]], axis=2)
    return a


def _taps_from_padded(ap, H, W):
    """(C, H+2, W+2) -> stacked im2col taps (9*C, H*W); K order = (dh*3+dw)*C + cin."""
    slabs = [ap[:, dh:dh + H, dw:dw + W] for dh in range(3) for dw in range(3)]
    return jnp.concatenate(slabs, axis=0).reshape(-1, H * W)


def _instance_norm(y):
    """InstanceNorm2d(affine=False) over spatial axis of (C, H*W); one-pass moments in f32."""
    mean = jnp.mean(y, axis=1, keepdims=True)
    var = jnp.maximum(jnp.mean(y * y, axis=1, keepdims=True) - mean * mean, 0.0)
    return (y - mean) * jax.lax.rsqrt(var + EPS)


# ----------------------------------------------------------------------------
# Fused Pallas kernel: reflect-pad -> conv -> IN -> ReLU -> reflect-pad -> conv -> IN -> +x
# ----------------------------------------------------------------------------
def _make_resblock_kernel(H, W, compute_dtype):
    def kernel(x_ref, w1_ref, w2_ref, o_ref):
        # x_ref : (C, H, W)    one sample (block squeezed over N)
        # w*_ref: (C, 9*C)     conv weights pre-flattened to matmul form (compute_dtype)
        # o_ref : (C, H, W)
        C = x_ref.shape[0]
        HW = H * W
        x = x_ref[...].astype(jnp.float32)                                   # (C, H, W)

        # ---- stage 1: reflect-pad -> conv3x3 (single K=9C matmul) -> IN -> ReLU
        t1 = _taps_from_padded(_reflect_pad1_inner(x), H, W).astype(compute_dtype)
        y1 = jnp.dot(w1_ref[...], t1, preferred_element_type=jnp.float32)    # (C, HW) f32
        h = jnp.maximum(_instance_norm(y1), 0.0).reshape(C, H, W)

        # ---- stage 2: reflect-pad -> conv3x3 -> IN -> residual (x already VMEM-resident)
        t2 = _taps_from_padded(_reflect_pad1_inner(h), H, W).astype(compute_dtype)
        y2 = jnp.dot(w2_ref[...], t2, preferred_element_type=jnp.float32)    # (C, HW) f32
        out = _instance_norm(y2) + x.reshape(C, HW)

        o_ref[...] = out.reshape(C, H, W).astype(o_ref.dtype)

    return kernel


# ----------------------------------------------------------------------------
# Wrapper / glue
# ----------------------------------------------------------------------------
def _weight_to_matrix(w):
    """(Cout, Cin, 3, 3) -> (Cout, 9*Cin) with K order = (dh*3+dw)*Cin + cin."""
    c_out, c_in = w.shape[0], w.shape[1]
    return jnp.transpose(w, (0, 2, 3, 1)).reshape(c_out, 9 * c_in)


def resnet_block_forward(x, params, *, compute_dtype=jnp.bfloat16):
    """x: (N, C, H, W) float32 (NCHW, matching PyTorch). params = (w1, b1, w2, b2)."""
    # b1/b2 are intentionally unused: a per-channel bias added immediately before
    # InstanceNorm2d(affine=False) cancels exactly in the mean subtraction.
    w1, _b1, w2, _b2 = params
    N, C, H, W = x.shape

    w1m = _weight_to_matrix(w1).astype(compute_dtype)   # (C, 9C)
    w2m = _weight_to_matrix(w2).astype(compute_dtype)   # (C, 9C)

    kernel = _make_resblock_kernel(H, W, compute_dtype)
    return pl.pallas_call(
        kernel,
        out_shape=jax.ShapeDtypeStruct((N, C, H, W), x.dtype),
        grid=(N,),
        in_specs=[
            pl.BlockSpec((None, C, H, W), lambda n: (n, 0, 0, 0)),
            pl.BlockSpec((C, 9 * C), lambda n: (0, 0)),
            pl.BlockSpec((C, 9 * C), lambda n: (0, 0)),
        ],
        out_specs=pl.BlockSpec((None, C, H, W), lambda n: (n, 0, 0, 0)),
        compiler_params=pltpu.CompilerParams(dimension_semantics=("parallel",)),
    )(x, w1m, w2m)


# ----------------------------------------------------------------------------
# Pure-JAX reference (mirrors the PyTorch module) for correctness checking
# ----------------------------------------------------------------------------
def _reflect_pad1(x):
    return jnp.pad(x, ((0, 0), (0, 0), (1, 1), (1, 1)), mode="reflect")


def resnet_block_reference(x, params, conv_dtype=None):
    """Pure-JAX mirror of the PyTorch module; optionally cast conv operands to conv_dtype."""
    w1, b1, w2, b2 = params

    def conv(xp, w, b):
        if conv_dtype is not None:
            xp = xp.astype(conv_dtype)
            w = w.astype(conv_dtype)
        y = jax.lax.conv_general_dilated(
            xp, w, window_strides=(1, 1), padding="VALID",
            dimension_numbers=("NCHW", "OIHW", "NCHW"),
            preferred_element_type=jnp.float32,
        )
        return y + b.reshape(1, -1, 1, 1)

    def inorm(y):
        m = y.mean(axis=(2, 3), keepdims=True)
        v = ((y - m) ** 2).mean(axis=(2, 3), keepdims=True)
        return (y - m) * jax.lax.rsqrt(v + EPS)

    h = jnp.maximum(inorm(conv(_reflect_pad1(x), w1, b1)), 0.0)
    return x + inorm(conv(_reflect_pad1(h), w2, b2))


# ----------------------------------------------------------------------------
# Main
# ----------------------------------------------------------------------------
if __name__ == "__main__":
    N, C, H, W = 2, 4, 16, 16

    key = jax.random.PRNGKey(0)
    kx, kw1, kb1, kw2, kb2 = jax.random.split(key, 5)

    x = jax.random.normal(kx, (N, C, H, W), dtype=jnp.float32)

    # Deterministic Conv2d-style init (uniform, bound = 1/sqrt(fan_in)).
    bound = 1.0 / math.sqrt(C * 3 * 3)
    w1 = jax.random.uniform(kw1, (C, C, 3, 3), jnp.float32, -bound, bound)
    b1 = jax.random.uniform(kb1, (C,), jnp.float32, -bound, bound)
    w2 = jax.random.uniform(kw2, (C, C, 3, 3), jnp.float32, -bound, bound)
    b2 = jax.random.uniform(kb2, (C,), jnp.float32, -bound, bound)
    params = (w1, b1, w2, b2)

    out = jax.block_until_ready(resnet_block_forward(x, params))
    assert out.shape == (N, C, H, W)

    # Tight check: reference computed with the same bf16 conv operands (isolates
    # kernel-structure correctness from intentional bf16 quantization).
    ref_bf16 = jax.block_until_ready(
        resnet_block_reference(x, params, conv_dtype=jnp.bfloat16))
    np.testing.assert_allclose(np.asarray(out), np.asarray(ref_bf16),
                               rtol=1e-2, atol=1e-2)

    # Loose check against the full-f32 PyTorch-equivalent math (tolerance accounts
    # for the intentional bf16 cast of the matmul operands inside the kernel).
    ref_f32 = jax.block_until_ready(resnet_block_reference(x, params))
    np.testing.assert_allclose(np.asarray(out), np.asarray(ref_f32),
                               rtol=5e-2, atol=5e-2)

    print("KERNEL_OK")
</pallas_src>

<mosaic_0001>
module attributes {stable_mosaic.version = 11 : i64} {
  func.func @kernel(%arg0: i32, %arg1: memref<1x4x16x16xf32, #tpu.memory_space<vmem>>, %arg2: memref<4x36xbf16, #tpu.memory_space<vmem>>, %arg3: memref<4x36xbf16, #tpu.memory_space<vmem>>, %arg4: memref<1x4x16x16xf32, #tpu.memory_space<vmem>>) attributes {dimension_semantics = [#tpu.dimension_semantics<parallel>], iteration_bounds = array<i64: 2>, scalar_prefetch = 0 : i64, scratch_operands = 0 : i64, tpu.core_type = #tpu.core_type<tc>, window_params = [{transform_indices = @transform_0, window_bounds = array<i64: 1, 4, 16, 16>}, {pipeline_mode = #tpu.pipeline_mode<synchronous>, transform_indices = @transform_1, window_bounds = array<i64: 4, 36>}, {pipeline_mode = #tpu.pipeline_mode<synchronous>, transform_indices = @transform_2, window_bounds = array<i64: 4, 36>}, {transform_indices = @transform_3, window_bounds = array<i64: 1, 4, 16, 16>}]} {
    %c0 = arith.constant 0 : index
    %c0_0 = arith.constant 0 : index
    %c0_1 = arith.constant 0 : index
    %c0_2 = arith.constant 0 : index
    %0 = vector.load %arg1[%c0, %c0_0, %c0_1, %c0_2] : memref<1x4x16x16xf32, #tpu.memory_space<vmem>>, vector<1x4x16x16xf32>
    %1 = vector.shape_cast %0 : vector<1x4x16x16xf32> to vector<4x16x16xf32>
    %2 = vector.extract_strided_slice %1 {offsets = [0, 1, 0], sizes = [4, 1, 16], strides = [1, 1, 1]} : vector<4x16x16xf32> to vector<4x1x16xf32>
    %3 = vector.extract_strided_slice %1 {offsets = [0, 14, 0], sizes = [4, 1, 16], strides = [1, 1, 1]} : vector<4x16x16xf32> to vector<4x1x16xf32>
    %4 = tpu.concatenate %2, %1, %3 in 1 : vector<4x1x16xf32>, vector<4x16x16xf32>, vector<4x1x16xf32> -> vector<4x18x16xf32>
    %5 = vector.extract_strided_slice %4 {offsets = [0, 0, 1], sizes = [4, 18, 1], strides = [1, 1, 1]} : vector<4x18x16xf32> to vector<4x18x1xf32>
    %6 = vector.extract_strided_slice %4 {offsets = [0, 0, 14], sizes = [4, 18, 1], strides = [1, 1, 1]} : vector<4x18x16xf32> to vector<4x18x1xf32>
    %7 = tpu.concatenate %5, %4, %6 in 2 : vector<4x18x1xf32>, vector<4x18x16xf32>, vector<4x18x1xf32> -> vector<4x18x18xf32>
    %8 = vector.extract_strided_slice %7 {offsets = [0, 0, 0], sizes = [4, 16, 16], strides = [1, 1, 1]} : vector<4x18x18xf32> to vector<4x16x16xf32>
    %9 = vector.extract_strided_slice %7 {offsets = [0, 0, 1], sizes = [4, 16, 16], strides = [1, 1, 1]} : vector<4x18x18xf32> to vector<4x16x16xf32>
    %10 = vector.extract_strided_slice %7 {offsets = [0, 0, 2], sizes = [4, 16, 16], strides = [1, 1, 1]} : vector<4x18x18xf32> to vector<4x16x16xf32>
    %11 = vector.extract_strided_slice %7 {offsets = [0, 1, 0], sizes = [4, 16, 16], strides = [1, 1, 1]} : vector<4x18x18xf32> to vector<4x16x16xf32>
    %12 = vector.extract_strided_slice %7 {offsets = [0, 1, 1], sizes = [4, 16, 16], strides = [1, 1, 1]} : vector<4x18x18xf32> to vector<4x16x16xf32>
    %13 = vector.extract_strided_slice %7 {offsets = [0, 1, 2], sizes = [4, 16, 16], strides = [1, 1, 1]} : vector<4x18x18xf32> to vector<4x16x16xf32>
    %14 = vector.extract_strided_slice %7 {offsets = [0, 2, 0], sizes = [4, 16, 16], strides = [1, 1, 1]} : vector<4x18x18xf32> to vector<4x16x16xf32>
    %15 = vector.extract_strided_slice %7 {offsets = [0, 2, 1], sizes = [4, 16, 16], strides = [1, 1, 1]} : vector<4x18x18xf32> to vector<4x16x16xf32>
    %16 = vector.extract_strided_slice %7 {offsets = [0, 2, 2], sizes = [4, 16, 16], strides = [1, 1, 1]} : vector<4x18x18xf32> to vector<4x16x16xf32>
    %17 = tpu.concatenate %8, %9, %10, %11, %12, %13, %14, %15, %16 in 0 : vector<4x16x16xf32>, vector<4x16x16xf32>, vector<4x16x16xf32>, vector<4x16x16xf32>, vector<4x16x16xf32>, vector<4x16x16xf32>, vector<4x16x16xf32>, vector<4x16x16xf32>, vector<4x16x16xf32> -> vector<36x16x16xf32>
    %18 = vector.shape_cast %17 : vector<36x16x16xf32> to vector<36x256xf32>
    %19 = arith.truncf %18 : vector<36x256xf32> to vector<36x256xbf16>
    %c0_3 = arith.constant 0 : index
    %c0_4 = arith.constant 0 : index
    %20 = vector.load %arg2[%c0_3, %c0_4] : memref<4x36xbf16, #tpu.memory_space<vmem>>, vector<4x36xbf16>
    %cst = arith.constant dense<0.000000e+00> : vector<4x256xf32>
    %21 = tpu.matmul %20, %19, %cst {dimension_numbers = #tpu.dot_dimension_numbers<[1], [0], [0], [1], [0, 0, 1, 1], [], []>} : vector<4x36xbf16>, vector<36x256xbf16>, vector<4x256xf32> -> vector<4x256xf32>
    %cst_5 = arith.constant dense<0.000000e+00> : vector<4xf32>
    %22 = vector.multi_reduction <add>, %21, %cst_5 [1] : vector<4x256xf32> to vector<4xf32>
    %23 = vector.shape_cast %22 : vector<4xf32> to vector<4x1xf32>
    %cst_6 = arith.constant 2.560000e+02 : f32
    %24 = vector.broadcast %cst_6 : f32 to vector<4x1xf32>
    %25 = arith.divf %23, %24 : vector<4x1xf32>
    %26 = arith.mulf %21, %21 : vector<4x256xf32>
    %cst_7 = arith.constant dense<0.000000e+00> : vector<4xf32>
    %27 = vector.multi_reduction <add>, %26, %cst_7 [1] : vector<4x256xf32> to vector<4xf32>
    %28 = vector.shape_cast %27 : vector<4xf32> to vector<4x1xf32>
    %cst_8 = arith.constant 2.560000e+02 : f32
    %29 = vector.broadcast %cst_8 : f32 to vector<4x1xf32>
    %30 = arith.divf %28, %29 : vector<4x1xf32>
    %31 = arith.mulf %25, %25 : vector<4x1xf32>
    %32 = arith.subf %30, %31 : vector<4x1xf32>
    %cst_9 = arith.constant 0.000000e+00 : f32
    %33 = vector.broadcast %cst_9 : f32 to vector<4x1xf32>
    %34 = arith.maximumf %32, %33 : vector<4x1xf32>
    %35 = vector.broadcast %25 : vector<4x1xf32> to vector<4x256xf32>
    %36 = arith.subf %21, %35 : vector<4x256xf32>
    %cst_10 = arith.constant 9.99999974E-6 : f32
    %37 = vector.broadcast %cst_10 : f32 to vector<4x1xf32>
    %38 = arith.addf %34, %37 : vector<4x1xf32>
    %39 = math.rsqrt %38 : vector<4x1xf32>
    %40 = vector.broadcast %39 : vector<4x1xf32> to vector<4x256xf32>
    %41 = arith.mulf %36, %40 : vector<4x256xf32>
    %cst_11 = arith.constant 0.000000e+00 : f32
    %42 = vector.broadcast %cst_11 : f32 to vector<4x256xf32>
    %43 = arith.maximumf %41, %42 : vector<4x256xf32>
    %44 = vector.shape_cast %43 : vector<4x256xf32> to vector<4x16x16xf32>
    %45 = vector.extract_strided_slice %44 {offsets = [0, 1, 0], sizes = [4, 1, 16], strides = [1, 1, 1]} : vector<4x16x16xf32> to vector<4x1x16xf32>
    %46 = vector.extract_strided_slice %44 {offsets = [0, 14, 0], sizes = [4, 1, 16], strides = [1, 1, 1]} : vector<4x16x16xf32> to vector<4x1x16xf32>
    %47 = tpu.concatenate %45, %44, %46 in 1 : vector<4x1x16xf32>, vector<4x16x16xf32>, vector<4x1x16xf32> -> vector<4x18x16xf32>
    %48 = vector.extract_strided_slice %47 {offsets = [0, 0, 1], sizes = [4, 18, 1], strides = [1, 1, 1]} : vector<4x18x16xf32> to vector<4x18x1xf32>
    %49 = vector.extract_strided_slice %47 {offsets = [0, 0, 14], sizes = [4, 18, 1], strides = [1, 1, 1]} : vector<4x18x16xf32> to vector<4x18x1xf32>
    %50 = tpu.concatenate %48, %47, %49 in 2 : vector<4x18x1xf32>, vector<4x18x16xf32>, vector<4x18x1xf32> -> vector<4x18x18xf32>
    %51 = vector.extract_strided_slice %50 {offsets = [0, 0, 0], sizes = [4, 16, 16], strides = [1, 1, 1]} : vector<4x18x18xf32> to vector<4x16x16xf32>
    %52 = vector.extract_strided_slice %50 {offsets = [0, 0, 1], sizes = [4, 16, 16], strides = [1, 1, 1]} : vector<4x18x18xf32> to vector<4x16x16xf32>
    %53 = vector.extract_strided_slice %50 {offsets = [0, 0, 2], sizes = [4, 16, 16], strides = [1, 1, 1]} : vector<4x18x18xf32> to vector<4x16x16xf32>
    %54 = vector.extract_strided_slice %50 {offsets = [0, 1, 0], sizes = [4, 16, 16], strides = [1, 1, 1]} : vector<4x18x18xf32> to vector<4x16x16xf32>
    %55 = vector.extract_strided_slice %50 {offsets = [0, 1, 1], sizes = [4, 16, 16], strides = [1, 1, 1]} : vector<4x18x18xf32> to vector<4x16x16xf32>
    %56 = vector.extract_strided_slice %50 {offsets = [0, 1, 2], sizes = [4, 16, 16], strides = [1, 1, 1]} : vector<4x18x18xf32> to vector<4x16x16xf32>
    %57 = vector.extract_strided_slice %50 {offsets = [0, 2, 0], sizes = [4, 16, 16], strides = [1, 1, 1]} : vector<4x18x18xf32> to vector<4x16x16xf32>
    %58 = vector.extract_strided_slice %50 {offsets = [0, 2, 1], sizes = [4, 16, 16], strides = [1, 1, 1]} : vector<4x18x18xf32> to vector<4x16x16xf32>
    %59 = vector.extract_strided_slice %50 {offsets = [0, 2, 2], sizes = [4, 16, 16], strides = [1, 1, 1]} : vector<4x18x18xf32> to vector<4x16x16xf32>
    %60 = tpu.concatenate %51, %52, %53, %54, %55, %56, %57, %58, %59 in 0 : vector<4x16x16xf32>, vector<4x16x16xf32>, vector<4x16x16xf32>, vector<4x16x16xf32>, vector<4x16x16xf32>, vector<4x16x16xf32>, vector<4x16x16xf32>, vector<4x16x16xf32>, vector<4x16x16xf32> -> vector<36x16x16xf32>
    %61 = vector.shape_cast %60 : vector<36x16x16xf32> to vector<36x256xf32>
    %62 = arith.truncf %61 : vector<36x256xf32> to vector<36x256xbf16>
    %c0_12 = arith.constant 0 : index
    %c0_13 = arith.constant 0 : index
    %63 = vector.load %arg3[%c0_12, %c0_13] : memref<4x36xbf16, #tpu.memory_space<vmem>>, vector<4x36xbf16>
    %cst_14 = arith.constant dense<0.000000e+00> : vector<4x256xf32>
    %64 = tpu.matmul %63, %62, %cst_14 {dimension_numbers = #tpu.dot_dimension_numbers<[1], [0], [0], [1], [0, 0, 1, 1], [], []>} : vector<4x36xbf16>, vector<36x256xbf16>, vector<4x256xf32> -> vector<4x256xf32>
    %cst_15 = arith.constant dense<0.000000e+00> : vector<4xf32>
    %65 = vector.multi_reduction <add>, %64, %cst_15 [1] : vector<4x256xf32> to vector<4xf32>
    %66 = vector.shape_cast %65 : vector<4xf32> to vector<4x1xf32>
    %cst_16 = arith.constant 2.560000e+02 : f32
    %67 = vector.broadcast %cst_16 : f32 to vector<4x1xf32>
    %68 = arith.divf %66, %67 : vector<4x1xf32>
    %69 = arith.mulf %64, %64 : vector<4x256xf32>
    %cst_17 = arith.constant dense<0.000000e+00> : vector<4xf32>
    %70 = vector.multi_reduction <add>, %69, %cst_17 [1] : vector<4x256xf32> to vector<4xf32>
    %71 = vector.shape_cast %70 : vector<4xf32> to vector<4x1xf32>
    %cst_18 = arith.constant 2.560000e+02 : f32
    %72 = vector.broadcast %cst_18 : f32 to vector<4x1xf32>
    %73 = arith.divf %71, %72 : vector<4x1xf32>
    %74 = arith.mulf %68, %68 : vector<4x1xf32>
    %75 = arith.subf %73, %74 : vector<4x1xf32>
    %cst_19 = arith.constant 0.000000e+00 : f32
    %76 = vector.broadcast %cst_19 : f32 to vector<4x1xf32>
    %77 = arith.maximumf %75, %76 : vector<4x1xf32>
    %78 = vector.broadcast %68 : vector<4x1xf32> to vector<4x256xf32>
    %79 = arith.subf %64, %78 : vector<4x256xf32>
    %cst_20 = arith.constant 9.99999974E-6 : f32
    %80 = vector.broadcast %cst_20 : f32 to vector<4x1xf32>
    %81 = arith.addf %77, %80 : vector<4x1xf32>
    %82 = math.rsqrt %81 : vector<4x1xf32>
    %83 = vector.broadcast %82 : vector<4x1xf32> to vector<4x256xf32>
    %84 = arith.mulf %79, %83 : vector<4x256xf32>
    %85 = vector.shape_cast %1 : vector<4x16x16xf32> to vector<4x256xf32>
    %86 = arith.addf %84, %85 : vector<4x256xf32>
    %87 = vector.shape_cast %86 : vector<4x256xf32> to vector<4x16x16xf32>
    %c0_21 = arith.constant 0 : index
    %c0_22 = arith.constant 0 : index
    %c0_23 = arith.constant 0 : index
    %c0_24 = arith.constant 0 : index
    %88 = vector.load %arg4[%c0_21, %c0_22, %c0_23, %c0_24] : memref<1x4x16x16xf32, #tpu.memory_space<vmem>>, vector<1x4x16x16xf32>
    %89 = vector.shape_cast %88 : vector<1x4x16x16xf32> to vector<4x16x16xf32>
    %90 = vector.shape_cast %87 : vector<4x16x16xf32> to vector<1x4x16x16xf32>
    tpu.vector_store %arg4[%c0_21, %c0_22, %c0_23, %c0_24], %90 {strides = array<i32>} : memref<1x4x16x16xf32, #tpu.memory_space<vmem>>, vector<1x4x16x16xf32>,
    return
  }
  func.func @transform_0(%arg0: i32) -> (i32, i32, i32, i32) {
    %c0_i32 = arith.constant 0 : i32
    %c0_i32_0 = arith.constant 0 : i32
    %c0_i32_1 = arith.constant 0 : i32
    %c0_i32_2 = arith.constant 0 : i32
    return %arg0, %c0_i32, %c0_i32_0, %c0_i32_1 : i32, i32, i32, i32
  }
  func.func @transform_1(%arg0: i32) -> (i32, i32) {
    %c0_i32 = arith.constant 0 : i32
    %c0_i32_0 = arith.constant 0 : i32
    %c0_i32_1 = arith.constant 0 : i32
    return %c0_i32, %c0_i32_0 : i32, i32
  }
  func.func @transform_2(%arg0: i32) -> (i32, i32) {
    %c0_i32 = arith.constant 0 : i32
    %c0_i32_0 = arith.constant 0 : i32
    %c0_i32_1 = arith.constant 0 : i32
    return %c0_i32, %c0_i32_0 : i32, i32
  }
  func.func @transform_3(%arg0: i32) -> (i32, i32, i32, i32) {
    %c0_i32 = arith.constant 0 : i32
    %c0_i32_0 = arith.constant 0 : i32
    %c0_i32_1 = arith.constant 0 : i32
    %c0_i32_2 = arith.constant 0 : i32
    return %arg0, %c0_i32, %c0_i32_0, %c0_i32_1 : i32, i32, i32, i32
  }
}

</mosaic_0001>

<bundles_post_ra>
// kernel: tpu_custom_call.1
= control target key start
LH: loop header
LB: loop body
LE: loop exit
PB: predicated region body
PF: predicated region fallthrough
CT: control target
= control target key end

     0   :  { %8 = vsyncpa [#allocation3], 0  ;;  %s8036_s0 = inlined_call_operand.hbm [shape: f32[2,4,16,16], index: 0, kind: input, shape index: {}]   ;;  %s8037_s1 = inlined_call_operand.vmem [shape: bf16[4,36], index: 1, kind: input, shape index: {}]   ;;  %s8038_s2 = inlined_call_operand.vmem [shape: bf16[4,36], index: 2, kind: input, shape index: {}]   ;;  %s8039_s3 = inlined_call_operand.hbm [shape: f32[2,4,16,16], index: 3, kind: output, shape index: {}]  }
   0x1   :  { %10 = vsyncpa [#allocation3 + $0x1], 0 }
   0x2   :  { %11 = vsyncpa [#allocation4], 0 }
   0x3   :  { %13 = vsyncpa [#allocation4 + $0x1], 0  ;;  %s5581_s12 = smov 0   ;;  %s5583_s13 = smov 0  }
   0x4   :  { %s5585_s14 = smov 0   ;;  %s5587_s15 = smov 0  }
   0x5 LB: > { %s5602_s16 = sadd.s32 4294967295, %s5538_s15   ;;  %s4995_s17 = sadd.s32 4294967294, %s5538_s15   ;;  %s5538_s15 = sphi %s5587_s15, %s8147_s15   ;;  %s5534_s14 = sphi %s5585_s14, %s8146_s14   ;;  %s5530_s13 = sphi %s5583_s13, %s8145_s13   ;;  %s5526_s12 = sphi %s5581_s12, %s8144_s12  }
   0x6   : > { %s5606_s18 = sadd.s32 1, %s5538_s15   ;;  %s26_s19 = sadd.s32 1, %s5534_s14 }
   0x7   : > { %s23_s20 = ssub.s32 %s5538_s15, %s5606_s18  ;;  %p33_p0 = scmp.ne.s32.totalorder %s5534_s14, %s5530_s13 }
   0x8   : > { %p24_p1 = scmp.eq.s32.totalorder %s23_s20, 0  ;;  %p34_p2 = scmp.eq.s32.totalorder %s5538_s15, 0 }
   0x9   : > { %p39_p3 = scmp.ne.s32.totalorder %s5530_s13, %s5526_s12  ;;  %p40_p4 = scmp.eq.s32.totalorder %s5602_s16, 0 }
   0xa   : > { %s5618_s21 = scalar_select %p24_p1, %s5534_s14, %s26_s19  }
   0xb   : > { %p5620_p5 = por %p34_p2, %p33_p0  ;;  %p5624_p6 = por %p40_p4, %p39_p3 }
   0xc   : > { %p105_p7 = scmp.eq.s32.totalorder %s5602_s16, 1  ;;  %p111_p8 = scmp.eq.s32.totalorder %s4995_s17, 1 }
   0xd   : > { %p5027_p10 = scmp.lt.s32.totalorder %s5538_s15, 2  ;;  %s137_s26 = sand.u32 1, %s5534_s14  }
   0xe   : > { %p5631_p11 = por %p105_p7, %p33_p0  ;;  %p5635_p12 = por %p111_p8, %p39_p3 }
   0xf   : > { %s5013_s27 = sshll.u32 %s5538_s15, 10  ;;  %s4998_s28 = sshll.u32 %s137_s26, 6 }
  0x10   : > { %s8065_s24 = scalar_select %p5631_p11, 1, 0 }
  0x11   : > { %s8066_s25 = scalar_select %p5635_p12, 1, 0 }
  0x12   : > { %s5644_s4 = scalar_lea.hbm %s8036_s0, %s5013_s27  ;;  %s141_s5 = scalar_lea.vmem [#allocation2], %s4998_s28 }
  0x13   : > { %s148_s6 = sshll.u32 %s141_s5, 4  ;;  %p5648_p13 = pnand %p5027_p10, %p5620_p5  ;;  %s5652_s6 = int_to_ptr.vmem [resolvable:$true] %s148_s6 }
  0x14   : > { %s5654_s8 = scalar_lea.sflag [#allocation3], %s137_s26  ;;  %s5442_s9 = scalar_lea.hbm %s5644_s4, 1024 }
  0x15   : > { %p5443_p0 = scmp.ne.s32.totalorder %s5644_s4, %s5442_s9  ;;  %p5444_p1 = pneg %p5648_p13 }
  0x16   : > { %s5447_s17 = scalar_lea.hbm %s8036_s0, 2048  ;;  %p5448_p4 = scmp.lt.u32.totalorder %s5644_s4, %s8036_s0 }
  0x17   : > { %p5445_p2 = pnand %p5444_p1, %p5443_p0  ;;  %p5449_p5 = scmp.lt.u32.totalorder %s5447_s17, %s5442_s9 }
  0x18   : > { %p5451_p8 = scmp.lt.u32.totalorder %s5442_s9, %s5644_s4 }
  0x19   : > { %p5446_p3 = pneg %p5445_p2  ;;  %p5450_p7 = por %p5449_p5, %p5448_p4 }
  0x1b   : > { %p5452_p10 = por %p5451_p8, %p5450_p7 }
  0x1d   : > { %p5453_p9 = pnand %p5452_p10, %p5446_p3 }
  0x1f   : > { %5456 = shalt.err (!%p5453_p9)
}
  0x20   : > { %s5457_s22 = scalar_lea.vmem %s5652_s6, 1024  ;;  %s5540_s26 = smov [#allocation2]  }
  0x21   : > { %p5458_p0 = scmp.ne.s32.totalorder %s5652_s6, %s5457_s22  ;;  %s5462_s27 = sshll.u32 %s5540_s26, 4  ;;  %s5463_s27 = int_to_ptr.vmem [resolvable:$false] %s5462_s27 }
  0x22   : > { %s5464_s28 = scalar_lea.vmem %s5463_s27, 2048  ;;  %p5465_p11 = scmp.lt.s32.totalorder %s5652_s6, %s5463_s27 }
  0x23   : > { %p5460_p2 = pnand %p5458_p0, %p5444_p1  ;;  %p5466_p4 = scmp.lt.s32.totalorder %s5464_s28, %s5457_s22 }
  0x25   : > { %p5461_p12 = pneg %p5460_p2  ;;  %p5467_p5 = por %p5466_p4, %p5465_p11 }
  0x27   : > { %p5468_p7 = pnand %p5467_p5, %p5461_p12 }
  0x29   : > { %5471 = shalt.err (!%p5468_p7)
}
  0x2a   : > { %s5541_s29 = smov 128   ;;  %s5542_s30 = smov 8  }
  0x2b   : > { %5022 = dma.hbm_to_vmem [thread:$0]  (!%p5648_p13), %s5644_s4, 1024, %s5652_s6, %s5654_s8, %s5541_s29, %s5541_s29, %s5542_s30  }
  0x2c   : > { %p5001_p9 = scmp.ge.s32.totalorder %s5538_s15, 1  ;;  %p156_p1 = scmp.lt.s32.totalorder %s5538_s15, 3 }
  0x2e   : > { %p157_p3 = pnand %p5001_p9, %p156_p1 }
  0x30   : > { %160 = sbr.rel (%p157_p3) target bundleno = 2263 (0x8d7), region = 32 }
  0x37   : > { %s5685_s5 = sand.u32 1, %s5530_s13  }
  0x38   : > { %s5002_s9 = sshll.u32 %s5685_s5, 6  ;;  %s163_s10 = scalar_lea.sflag [#allocation3], %s5685_s5 }
  0x39   : > { %s5691_s11 = scalar_lea.vmem [#allocation2], %s5002_s9 }
  0x3a   : > { %5517 = dma.done.wait (%p5624_p6), %s163_s10, 1024  }
  0x3b   : > { %5519 = vsyncadd (%p5624_p6), %s163_s10, 4294966272  ;;  %v194_v0 = vld [vmem:[%s5691_s11 + $0x20] sm:$0xff]  ;;  %v195_v1 = vld [vmem:[%s5691_s11 + $0x28] sm:$0xff]  ;;  %vm214_vm0 = vcmask 1040384   ;;  %s5543_s23 = smov 127   ;;  %s5544_s4 = smov 1   ;;  %v612_v61 = vlaneseq }
  0x3c   : > { %v190_v2 = vld [vmem:[%s5691_s11] sm:$0xff]  ;;  %v221_v3 = vrot.slane %v194_v0, 7  ;;  %v222_v4 = vrot.slane %v195_v1, 7  ;;  %v191_v5 = vld [vmem:[%s5691_s11 + $0x8] sm:$0xff]  ;;  %v196_v7 = vld [vmem:[%s5691_s11 + $0x30] sm:$0xff]  ;;  %v237_v27 = vrot.slane %v195_v1, 5 }
  0x3d   : > { %v215_v6 = vrot.slane %v190_v2, 7  ;;  %v197_v8 = vld [vmem:[%s5691_s11 + $0x38] sm:$0xff]  ;;  %v216_v9 = vrot.slane %v191_v5, 7  ;;  %v224_v10 = vrot.slane %v196_v7, 7  ;;  %v192_v12 = vld [vmem:[%s5691_s11 + $0x10] sm:$0xff]  ;;  %v235_v20 = vrot.slane %v191_v5, 5 }
  0x3e   : > { %v225_v11 = vrot.slane %v197_v8, 7  ;;  %v193_v13 = vld [vmem:[%s5691_s11 + $0x18] sm:$0xff]  ;;  %v223_v14 = vsel %vm214_vm0, %v221_v3, %v222_v4  ;;  %v218_v15 = vrot.slane %v192_v12, 7  ;;  %v202_v21 = vrot.slane %v190_v2, 1  ;;  %s5545_s6 = smov 3   ;;  %s5547_s7 = smov 126  }
  0x3f   : > { %v219_v16 = vrot.slane %v193_v13, 7  ;;  %273 = vrot.lane.b32.xlu1 %v223_v14, %s5543_s23  ;;  %v217_v17 = vsel %vm214_vm0, %v215_v6, %v216_v9  ;;  %v247_v22 = vsel %vm214_vm0, %v216_v9, %v235_v20  ;;  %v236_v23 = vrot.slane %v193_v13, 5  ;;  %s5549_s8 = smov 16   ;;  %s5550_s17 = smov 32  }
  0x40   : > { %261 = vrot.lane.b32.xlu0 %v217_v17, %s5543_s23  ;;  %v226_v18 = vsel %vm214_vm0, %v224_v10, %v225_v11  ;;  %v243_v24 = vsel %vm214_vm0, %v202_v21, %v215_v6  ;;  %v203_v25 = vrot.slane %v192_v12, 1  ;;  %v204_v29 = vrot.slane %v194_v0, 1  ;;  %s5551_s19 = smov 48   ;;  %s5552_s20 = smov 64  }
  0x41   : > { %v220_v19 = vsel %vm214_vm0, %v218_v15, %v219_v16  ;;  %v248_v26 = vsel %vm214_vm0, %v219_v16, %v236_v23  ;;  %v249_v30 = vsel %vm214_vm0, %v222_v4, %v237_v27  ;;  %v238_v31 = vrot.slane %v197_v8, 5  ;;  %s5553_s22 = smov 80   ;;  %s5554_s26 = smov 96  }
  0x42   : > { %v244_v28 = vsel %vm214_vm0, %v203_v25, %v218_v15  ;;  %v245_v32 = vsel %vm214_vm0, %v204_v29, %v221_v3  ;;  %v205_v33 = vrot.slane %v196_v7, 1  ;;  %v5546_v59 = vmov 1983009808   ;;  %s5555_s27 = smov 112   ;;  %p8141_p11 = scmp.ne.s32.totalorder %s8065_s24, 0 }
  0x43   : > { %279 = vrot.lane.b32.xlu1 %v226_v18, %s5543_s23  ;;  %v250_v34 = vsel %vm214_vm0, %v225_v11, %v238_v31  ;;  %v610_v60 = vunpack.c.l.s4 %v5546_v59  ;;  %vm367_vm1 = vcmask 7168   ;;  %vm380_vm2 = vcmask 138240  }
  0x44   : > { %267 = vrot.lane.b32.xlu0 %v220_v19, %s5543_s23  ;;  %v246_v35 = vsel %vm214_vm0, %v205_v33, %v224_v10  ;;  %v5754_v2 = vshrl.u32 %v612_v61, 7  ;;  %vm453_vm3 = vcmask 1046528   ;;  %vm530_vm4 = vcmask 1045504  }
  0x45   : > { %v611_v1 = vunpack.c.0.s8 %v610_v60  ;;  %vm2111_vm5 = vcmask 130048   ;;  %vm2117_vm6 = vcmask 261120   ;;  %vm2123_vm7 = vcmask 392192  }
  0x46   : > { %vm2129_vm8 = vcmask 523264   ;;  %vm2135_vm9 = vcmask 654336   ;;  %vm2141_vm10 = vcmask 785408   ;;  %vm2147_vm11 = vcmask 916480  }
  0x47   : > { %303 = vrot.lane.b32.xlu1 %v220_v19, %s5544_s4  ;;  %v5769_v9 = vsub.s32 %v611_v1, %v5754_v2  ;;  %vm2199_vm12 = vcmask 1041408   ;;  %vm2195_vm13 = vcmask 293888   ;;  %vm2247_vm14 = vcmask 1043456  }
  0x48   : > { %297 = vrot.lane.b32.xlu0 %v217_v17, %s5544_s4 }
  0x4b   : > { %315 = vrot.lane.b32.xlu1 %v226_v18, %s5544_s4 }
  0x4c   : > { %309 = vrot.lane.b32.xlu0 %v223_v14, %s5544_s4 }
  0x4f   : > { %263 = vrot.lane.b32.xlu1 %v247_v22, %s5543_s23 }
  0x50   : > { %259 = vrot.lane.b32.xlu0 %v243_v24, %s5543_s23 }
  0x53   : > { %269 = vrot.lane.b32.xlu1 %v248_v26, %s5543_s23 }
  0x54   : > { %265 = vrot.lane.b32.xlu0 %v244_v28, %s5543_s23 }
  0x57   : > { %275 = vrot.lane.b32.xlu1 %v249_v30, %s5543_s23 }
  0x58   : > { %271 = vrot.lane.b32.xlu0 %v245_v32, %s5543_s23 }
  0x5b   : > { %281 = vrot.lane.b32.xlu1 %v250_v34, %s5543_s23 }
  0x5c   : > { %277 = vrot.lane.b32.xlu0 %v246_v35, %s5543_s23 }
  0x5f   : > { %299 = vrot.lane.b32.xlu1 %v247_v22, %s5544_s4 }
  0x60   : > { %295 = vrot.lane.b32.xlu0 %v243_v24, %s5544_s4 }
  0x63   : > { %305 = vrot.lane.b32.xlu1 %v248_v26, %s5544_s4 }
  0x64   : > { %301 = vrot.lane.b32.xlu0 %v244_v28, %s5544_s4 }
  0x67   : > { %311 = vrot.lane.b32.xlu1 %v249_v30, %s5544_s4 }
  0x68   : > { %307 = vrot.lane.b32.xlu0 %v245_v32, %s5544_s4 }
  0x6b   : > { %317 = vrot.lane.b32.xlu1 %v250_v34, %s5544_s4 }
  0x6c   : > { %313 = vrot.lane.b32.xlu0 %v246_v35, %s5544_s4 }
  0x6f   : > { %339 = vrot.lane.b32.xlu1 %v220_v19, %s5545_s6 }
  0x70   : > { %333 = vrot.lane.b32.xlu0 %v217_v17, %s5545_s6 }
  0x73   : > { %351 = vrot.lane.b32.xlu1 %v226_v18, %s5545_s6 }
  0x74   : > { %345 = vrot.lane.b32.xlu0 %v223_v14, %s5545_s6 }
  0x77   : > { %335 = vrot.lane.b32.xlu1 %v247_v22, %s5545_s6 }
  0x78   : > { %331 = vrot.lane.b32.xlu0 %v243_v24, %s5545_s6 }
  0x7b   : > { %341 = vrot.lane.b32.xlu1 %v248_v26, %s5545_s6 }
  0x7c   : > { %337 = vrot.lane.b32.xlu0 %v244_v28, %s5545_s6 }
  0x7f   : > { %347 = vrot.lane.b32.xlu1 %v249_v30, %s5545_s6 }
  0x80   : > { %343 = vrot.lane.b32.xlu0 %v245_v32, %s5545_s6 }
  0x83   : > { %353 = vrot.lane.b32.xlu1 %v250_v34, %s5545_s6 }
  0x84   : > { %349 = vrot.lane.b32.xlu0 %v246_v35, %s5545_s6 }
  0xb1   : > { %v274_v36 = vpop.permute.xlu1 %273 }
  0xb2   : > { %v262_v37 = vpop.permute.xlu0 %261 }
  0xb5   : > { %v280_v38 = vpop.permute.xlu1 %279 }
  0xb6   : > { %v268_v39 = vpop.permute.xlu0 %267 }
  0xb9   : > { %v304_v40 = vpop.permute.xlu1 %303 }
  0xba   : > { %v298_v41 = vpop.permute.xlu0 %297  ;;  %v372_v63 = vsel %vm367_vm1, %v268_v39, %v304_v40 }
  0xbb   : > { %v369_v3 = vsel %vm367_vm1, %v262_v37, %v298_v41 }
  0xbd   : > { %v316_v42 = vpop.permute.xlu1 %315 }
  0xbe   : > { %v310_v43 = vpop.permute.xlu0 %309  ;;  %v378_v7 = vsel %vm367_vm1, %v280_v38, %v316_v42 }
  0xbf   : > { %v375_v10 = vsel %vm367_vm1, %v274_v36, %v310_v43 }
  0xc1   : > { %v264_v44 = vpop.permute.xlu1 %263 }
  0xc2   : > { %v260_v45 = vpop.permute.xlu0 %259 }
  0xc5   : > { %v270_v46 = vpop.permute.xlu1 %269 }
  0xc6   : > { %v266_v47 = vpop.permute.xlu0 %265 }
  0xc9   : > { %v276_v48 = vpop.permute.xlu1 %275 }
  0xca   : > { %v272_v49 = vpop.permute.xlu0 %271 }
  0xcd   : > { %v282_v50 = vpop.permute.xlu1 %281 }
  0xce   : > { %v278_v51 = vpop.permute.xlu0 %277 }
  0xd1   : > { %v300_v52 = vpop.permute.xlu1 %299 }
  0xd2   : > { %v296_v53 = vpop.permute.xlu0 %295  ;;  %v370_v18 = vsel %vm367_vm1, %v264_v44, %v300_v52 }
  0xd3   : > { %v368_v19 = vsel %vm367_vm1, %v260_v45, %v296_v53 }
  0xd5   : > { %v306_v54 = vpop.permute.xlu1 %305 }
  0xd6   : > { %v302_v55 = vpop.permute.xlu0 %301  ;;  %v373_v23 = vsel %vm367_vm1, %v270_v46, %v306_v54 }
  0xd7   : > { %v371_v24 = vsel %vm367_vm1, %v266_v47, %v302_v55 }
  0xd9   : > { %v312_v56 = vpop.permute.xlu1 %311 }
  0xda   : > { %v308_v57 = vpop.permute.xlu0 %307  ;;  %v376_v28 = vsel %vm367_vm1, %v276_v48, %v312_v56 }
  0xdb   : > { %v374_v29 = vsel %vm367_vm1, %v272_v49, %v308_v57 }
  0xdd   : > { %v318_v58 = vpop.permute.xlu1 %317 }
  0xde   : > { %v314_v62 = vpop.permute.xlu0 %313  ;;  %v379_v32 = vsel %vm367_vm1, %v282_v50, %v318_v58 }
  0xdf   : > { %v377_v33 = vsel %vm367_vm1, %v278_v51, %v314_v62 }
  0xe1   : > { %v340_v0 = vpop.permute.xlu1 %339 }
  0xe2   : > { %v5758_v4 = vsel %vm380_vm2, %v372_v63, %v340_v0  ;;  %v334_v5 = vpop.permute.xlu0 %333 }
  0xe3   : > { %v5761_v6 = vsel %vm380_vm2, %v369_v3, %v334_v5  ;;  %407 = vrot.lane.b32.xlu1 %v5758_v4, %s5543_s23  ;;  %v460_v37 = vrot.slane %v5758_v4, 1  ;;  %v537_v38 = vrot.slane %v5758_v4, 2 }
  0xe4   : > { %403 = vrot.lane.b32.xlu0 %v5761_v6, %s5543_s23  ;;  %v455_v47 = vrot.slane %v5761_v6, 1  ;;  %v532_v48 = vrot.slane %v5761_v6, 2 }
  0xe5   : > { %v352_v8 = vpop.permute.xlu1 %351 }
  0xe6   : > { %v5773_v11 = vsel %vm380_vm2, %v378_v7, %v352_v8  ;;  %v346_v12 = vpop.permute.xlu0 %345 }
  0xe7   : > { %v1235_v13 = vcombine.low %v5758_v4, %v5773_v11  ;;  %v1236_v14 = vcombine.high %v5758_v4, %v5773_v11  ;;  %v5780_v15 = vsel %vm380_vm2, %v375_v10, %v346_v12  ;;  %415 = vrot.lane.b32.xlu1 %v5773_v11, %s5543_s23  ;;  %v470_v53 = vrot.slane %v5773_v11, 1 }
  0xe8   : > { %v1219_v16 = vcombine.low %v5761_v6, %v5780_v15  ;;  %v1220_v17 = vcombine.high %v5761_v6, %v5780_v15  ;;  %411 = vrot.lane.b32.xlu0 %v5780_v15, %s5543_s23  ;;  %v465_v52 = vrot.slane %v5780_v15, 1  ;;  %v542_v55 = vrot.slane %v5780_v15, 2 }
  0xe9   : > { %v336_v20 = vpop.permute.xlu1 %335  ;;  %v5793_v21 = vrot.slane %v1235_v13, %v5769_v9  ;;  %v5796_v22 = vrot.slane %v1236_v14, %v5769_v9  ;;  %v547_v56 = vrot.slane %v5773_v11, 2 }
  0xea   : > { %v332_v25 = vpop.permute.xlu0 %331  ;;  %v5801_v26 = vrot.slane %v1219_v16, %v5769_v9  ;;  %v5804_v27 = vrot.slane %v1220_v17, %v5769_v9  ;;  %v383_v30 = vsel %vm380_vm2, %v370_v18, %v336_v20 }
  0xeb   : > { %v5810_v31 = vsel %vm380_vm2, %v368_v19, %v332_v25  ;;  %431 = vrot.lane.b32.xlu1 %v5758_v4, %s5547_s7  ;;  %v457_v41 = vrot.slane %v383_v30, 1  ;;  %v534_v42 = vrot.slane %v383_v30, 2 }
  0xec   : > { %427 = vrot.lane.b32.xlu0 %v5761_v6, %s5547_s7  ;;  %v1283_v34 = vcombine.low %v5801_v26, %v5793_v21  ;;  %v1284_v35 = vcombine.high %v5801_v26, %v5793_v21  ;;  %v1299_v39 = vcombine.low %v5804_v27, %v5796_v22  ;;  %v1300_v40 = vcombine.high %v5804_v27, %v5796_v22 }
  0xed   : > { %v342_v36 = vpop.permute.xlu1 %341  ;;  %v454_v45 = vrot.slane %v5810_v31, 1  ;;  %v531_v49 = vrot.slane %v5810_v31, 2  ;;  %v5848_v61 = vsel %vm453_vm3, %v455_v47, %v457_v41  ;;  %v5851_v62 = vsel %vm530_vm4, %v532_v48, %v534_v42 }
  0xee   : > { %v386_v43 = vsel %vm380_vm2, %v373_v23, %v342_v36  ;;  %v338_v44 = vpop.permute.xlu0 %337 }
  0xef   : > { %v5831_v46 = vsel %vm380_vm2, %v371_v24, %v338_v44  ;;  %439 = vrot.lane.b32.xlu1 %v5773_v11, %s5547_s7  ;;  %v462_v50 = vrot.slane %v386_v43, 1  ;;  %v539_v51 = vrot.slane %v386_v43, 2  ;;  %v5854_v63 = vsel %vm453_vm3, %v454_v45, %v455_v47 }
  0xf0   : > { %435 = vrot.lane.b32.xlu0 %v5780_v15, %s5547_s7  ;;  %v459_v57 = vrot.slane %v5831_v46, 1  ;;  %v536_v58 = vrot.slane %v5831_v46, 2  ;;  %v5862_v4 = vsel %vm530_vm4, %v531_v49, %v532_v48 }
  0xf1   : > { %v348_v54 = vpop.permute.xlu1 %347  ;;  %v5871_v7 = vsel %vm453_vm3, %v460_v37, %v462_v50  ;;  %v5874_v8 = vsel %vm530_vm4, %v537_v38, %v539_v51 }
  0xf2   : > { %v389_v59 = vsel %vm380_vm2, %v376_v28, %v348_v54  ;;  %v344_v60 = vpop.permute.xlu0 %343  ;;  %v5885_v14 = vsel %vm453_vm3, %v459_v57, %v460_v37  ;;  %v5888_v16 = vsel %vm530_vm4, %v536_v58, %v537_v38 }
  0xf3   : > { %v467_v0 = vrot.slane %v389_v59, 1  ;;  %v544_v1 = vrot.slane %v389_v59, 2  ;;  %v5857_v3 = vsel %vm380_vm2, %v374_v29, %v344_v60  ;;  %405 = vrot.lane.b32.xlu1 %v5831_v46, %s5543_s23 }
  0xf4   : > { %v607_v5 = vcombine.low %v5810_v31, %v5857_v3  ;;  %v608_v6 = vcombine.high %v5810_v31, %v5857_v3  ;;  %401 = vrot.lane.b32.xlu0 %v5810_v31, %s5543_s23  ;;  %v464_v23 = vrot.slane %v5857_v3, 1  ;;  %v541_v42 = vrot.slane %v5857_v3, 2 }
  0xf5   : > { %v354_v10 = vpop.permute.xlu1 %353  ;;  %v5877_v12 = vsel %vm453_vm3, %v465_v52, %v467_v0  ;;  %v5882_v13 = vsel %vm530_vm4, %v542_v55, %v544_v1 }
  0xf6   : > { %v392_v17 = vsel %vm380_vm2, %v379_v32, %v354_v10  ;;  %v350_v18 = vpop.permute.xlu0 %349  ;;  %v1387_v19 = vcombine.low %v5848_v61, %v5877_v12  ;;  %v1388_v20 = vcombine.high %v5848_v61, %v5877_v12  ;;  %v1627_v29 = vcombine.low %v5851_v62, %v5882_v13 }
  0xf7   : > { %v472_v24 = vrot.slane %v392_v17, 1  ;;  %v549_v25 = vrot.slane %v392_v17, 2  ;;  %v5897_v28 = vsel %vm380_vm2, %v377_v33, %v350_v18  ;;  %v1628_v36 = vcombine.high %v5851_v62, %v5882_v13 }
  0xf8   : > { %v623_v30 = vcombine.low %v5831_v46, %v5897_v28  ;;  %v624_v32 = vcombine.high %v5831_v46, %v5897_v28  ;;  %409 = vrot.lane.b32.xlu0 %v5857_v3, %s5543_s23  ;;  %413 = vrot.lane.b32.xlu1 %v5897_v28, %s5543_s23  ;;  %v469_v33 = vrot.slane %v5897_v28, 1  ;;  %v5913_v37 = vrot.slane %v1387_v19, %v5769_v9 }
  0xf9   : > { %v5916_v38 = vrot.slane %v1388_v20, %v5769_v9  ;;  %v5919_v41 = vsel %vm453_vm3, %v470_v53, %v472_v24  ;;  %v5929_v45 = vsel %vm530_vm4, %v547_v56, %v549_v25  ;;  %v5932_v47 = vsel %vm453_vm3, %v464_v23, %v465_v52 }
  0xfa   : > { %v1403_v43 = vcombine.low %v5871_v7, %v5919_v41  ;;  %v1404_v44 = vcombine.high %v5871_v7, %v5919_v41  ;;  %v1643_v48 = vcombine.low %v5874_v8, %v5929_v45  ;;  %v1644_v49 = vcombine.high %v5874_v8, %v5929_v45 }
  0xfb   : > { %v775_v50 = vcombine.low %v5854_v63, %v5932_v47  ;;  %v776_v51 = vcombine.high %v5854_v63, %v5932_v47  ;;  %v5947_v52 = vrot.slane %v1627_v29, %v5769_v9  ;;  %v5950_v54 = vrot.slane %v1628_v36, %v5769_v9 }
  0xfc   : > { %425 = vrot.lane.b32.xlu0 %v5810_v31, %s5547_s7  ;;  %429 = vrot.lane.b32.xlu1 %v5831_v46, %s5547_s7  ;;  %v5953_v57 = vsel %vm453_vm3, %v469_v33, %v470_v53  ;;  %v546_v58 = vrot.slane %v5897_v28, 2  ;;  %v5957_v59 = vrot.slane %v1403_v43, %v5769_v9  ;;  %v5960_v60 = vrot.slane %v1404_v44, %v5769_v9 }
  0xfd   : > { %v5963_v0 = vrot.slane %v1643_v48, %v5769_v9  ;;  %v5966_v1 = vrot.slane %v1644_v49, %v5769_v9  ;;  %v791_v10 = vcombine.low %v5885_v14, %v5953_v57  ;;  %v792_v53 = vcombine.high %v5885_v14, %v5953_v57 }
  0xfe   : > { %v5975_v17 = vsel %vm530_vm4, %v541_v42, %v542_v55  ;;  %v5980_v18 = vsel %vm530_vm4, %v546_v58, %v547_v56  ;;  %v5995_v11 = vrot.slane %v776_v51, %v5769_v9  ;;  %v1451_v29 = vcombine.low %v5913_v37, %v5957_v59 }
  0xff   : > { %v1015_v15 = vcombine.low %v5862_v4, %v5975_v17  ;;  %v5998_v55 = vrot.slane %v792_v53, %v5769_v9  ;;  %v1016_v56 = vcombine.high %v5862_v4, %v5975_v17  ;;  %v1031_v24 = vcombine.low %v5888_v16, %v5980_v18 }
 0x100   : > { %433 = vrot.lane.b32.xlu0 %v5857_v3, %s5547_s7  ;;  %437 = vrot.lane.b32.xlu1 %v5897_v28, %s5547_s7  ;;  %v1032_v25 = vcombine.high %v5888_v16, %v5980_v18  ;;  %v6009_v36 = vrot.slane %v791_v10, %v5769_v9  ;;  %v1452_v42 = vcombine.high %v5913_v37, %v5957_v59 }
 0x101   : > { %v856_v33 = vcombine.high %v5995_v11, %v5998_v55  ;;  %v1467_v43 = vcombine.low %v5916_v38, %v5960_v60  ;;  %v6018_v44 = vrot.slane %v1015_v15, %v5769_v9  ;;  %v6021_v48 = vrot.slane %v1016_v56, %v5769_v9 }
 0x102   : > { %v6024_v49 = vrot.slane %v1031_v24, %v5769_v9  ;;  %v6027_v51 = vrot.slane %v1032_v25, %v5769_v9  ;;  %v6034_v58 = vrot.slane %v775_v50, %v5769_v9  ;;  %v6040_v10 = vrot.slane %v607_v5, %v5769_v9 }
 0x103   : > { %8068 = vst [vmem:[#allocation8_spill] sm:$0xff] %v6018_v44  ;;  %v6043_v53 = vrot.slane %v623_v30, %v5769_v9  ;;  %v6065_v56 = vrot.slane %v608_v6, %v5769_v9  ;;  %v6071_v50 = vrot.slane %v624_v32, %v5769_v9  ;;  %v855_v19 = vcombine.low %v5995_v11, %v5998_v55 }
 0x104   : > { %8069 = vst [vmem:[#allocation9_spill] sm:$0xff] %v6024_v49  ;;  %484 = vrot.lane.b32.xlu0 %v5848_v61, %s5543_s23  ;;  %488 = vrot.lane.b32.xlu1 %v5871_v7, %s5543_s23  ;;  %v839_v5 = vcombine.low %v6034_v58, %v6009_v36  ;;  %v840_v23 = vcombine.high %v6034_v58, %v6009_v36 }
 0x105   : > { %v671_v25 = vcombine.low %v6040_v10, %v6043_v53  ;;  %v672_v30 = vcombine.high %v6040_v10, %v6043_v53  ;;  %v1468_v24 = vcombine.high %v5916_v38, %v5960_v60  ;;  %v687_v31 = vcombine.low %v6065_v56, %v6071_v50 }
 0x108   : > { %492 = vrot.lane.b32.xlu0 %v5877_v12, %s5543_s23  ;;  %496 = vrot.lane.b32.xlu1 %v5919_v41, %s5543_s23 }
 0x10c   : > { %508 = vrot.lane.b32.xlu0 %v5848_v61, %s5547_s7  ;;  %512 = vrot.lane.b32.xlu1 %v5871_v7, %s5547_s7 }
 0x110   : > { %516 = vrot.lane.b32.xlu0 %v5877_v12, %s5547_s7  ;;  %520 = vrot.lane.b32.xlu1 %v5919_v41, %s5547_s7 }
 0x114   : > { %561 = vrot.lane.b32.xlu0 %v5851_v62, %s5543_s23  ;;  %565 = vrot.lane.b32.xlu1 %v5874_v8, %s5543_s23 }
 0x118   : > { %569 = vrot.lane.b32.xlu0 %v5882_v13, %s5543_s23  ;;  %573 = vrot.lane.b32.xlu1 %v5929_v45, %s5543_s23 }
 0x11c   : > { %482 = vrot.lane.b32.xlu0 %v5854_v63, %s5543_s23  ;;  %486 = vrot.lane.b32.xlu1 %v5885_v14, %s5543_s23 }
 0x120   : > { %490 = vrot.lane.b32.xlu0 %v5932_v47, %s5543_s23  ;;  %494 = vrot.lane.b32.xlu1 %v5953_v57, %s5543_s23 }
 0x124   : > { %506 = vrot.lane.b32.xlu0 %v5854_v63, %s5547_s7  ;;  %510 = vrot.lane.b32.xlu1 %v5885_v14, %s5547_s7 }
 0x128   : > { %514 = vrot.lane.b32.xlu0 %v5932_v47, %s5547_s7  ;;  %518 = vrot.lane.b32.xlu1 %v5953_v57, %s5547_s7 }
 0x12c   : > { %559 = vrot.lane.b32.xlu0 %v5862_v4, %s5543_s23  ;;  %563 = vrot.lane.b32.xlu1 %v5888_v16, %s5543_s23 }
 0x130   : > { %567 = vrot.lane.b32.xlu0 %v5975_v17, %s5543_s23  ;;  %571 = vrot.lane.b32.xlu1 %v5980_v18, %s5543_s23 }
 0x134   : > { %583 = vrot.lane.b32.xlu0 %v5862_v4, %s5547_s7  ;;  %585 = vrot.lane.b32.xlu1 %v5851_v62, %s5547_s7  ;;  %v5548_v62 = vmov 1934713408  }
 0x135   : > { %v674_v63 = vunpack.c.l.s4 %v5548_v62 }
 0x137   : > { %v675_v7 = vunpack.c.0.s8 %v674_v63 }
 0x138   : > { %587 = vrot.lane.b32.xlu0 %v5888_v16, %s5547_s7  ;;  %589 = vrot.lane.b32.xlu1 %v5874_v8, %s5547_s7 }
 0x139   : > { %v6146_v47 = vsub.s32 %v675_v7, %v5754_v2 }
 0x13b   : > { %v1314_v21 = vrot.slane %v1300_v40, %v6146_v47  ;;  %v1482_v22 = vrot.slane %v1468_v24, %v6146_v47  ;;  %v870_v58 = vrot.slane %v856_v33, %v6146_v47 }
 0x13c   : > { %591 = vrot.lane.b32.xlu0 %v5975_v17, %s5547_s7  ;;  %593 = vrot.lane.b32.xlu1 %v5882_v13, %s5547_s7 }
 0x140   : > { %595 = vrot.lane.b32.xlu0 %v5980_v18, %s5547_s7  ;;  %597 = vrot.lane.b32.xlu1 %v5929_v45, %s5547_s7 }
 0x155   : > { %v408_v61 = vpop.permute.xlu1 %407 }
 0x156   : > { %v404_v4 = vpop.permute.xlu0 %403 }
 0x159   : > { %v416_v6 = vpop.permute.xlu1 %415 }
 0x15a   : > { %v1267_v12 = vcombine.low %v408_v61, %v416_v6  ;;  %v1268_v8 = vcombine.high %v408_v61, %v416_v6  ;;  %v412_v14 = vpop.permute.xlu0 %411  ;;  %v6154_v61 = vrot.slane %v1283_v34, %v6146_v47 }
 0x15b   : > { %v1251_v16 = vcombine.low %v404_v4, %v412_v14  ;;  %v1252_v28 = vcombine.high %v404_v4, %v412_v14 }
 0x15c   : > { %v1275_v32 = vrot.slane %v1267_v12, %v5769_v9  ;;  %v1282_v45 = vrot.slane %v1268_v8, %v5769_v9  ;;  %8070 = vst [vmem:[#allocation10_spill] sm:$0xff] %v6154_v61 }
 0x15d   : > { %v1259_v13 = vrot.slane %v1251_v16, %v5769_v9  ;;  %v432_v41 = vpop.permute.xlu1 %431  ;;  %v1266_v57 = vrot.slane %v1252_v28, %v5769_v9 }
 0x15e   : > { %v428_v17 = vpop.permute.xlu0 %427 }
 0x15f   : > { %v1315_v18 = vcombine.low %v1259_v13, %v1275_v32  ;;  %v1316_v62 = vcombine.high %v1259_v13, %v1275_v32  ;;  %v1331_v6 = vcombine.low %v1266_v57, %v1282_v45  ;;  %v1332_v28 = vcombine.high %v1266_v57, %v1282_v45 }
 0x160   : > { %v6174_v45 = vrot.slane %v1451_v29, %v6146_v47  ;;  %v1307_v57 = vrot.slane %v1299_v39, %v6146_v47  ;;  %v1466_v29 = vrot.slane %v1452_v42, %v6146_v47  ;;  %v1475_v39 = vrot.slane %v1467_v43, %v6146_v47 }
 0x161   : > { %v440_v63 = vpop.permute.xlu1 %439  ;;  %v6157_v4 = vrot.slane %v1315_v18, %v6146_v47 }
 0x162   : > { %v1371_v2 = vcombine.low %v432_v41, %v440_v63  ;;  %v1372_v7 = vcombine.high %v432_v41, %v440_v63  ;;  %v436_v12 = vpop.permute.xlu0 %435  ;;  %v1298_v41 = vrot.slane %v1284_v35, %v6146_v47  ;;  %8072 = vst [vmem:[#allocation12_spill] sm:$0xff] %v6174_v45 }
 0x163   : > { %8071 = vst [vmem:[#allocation11_spill] sm:$0xff] %v6157_v4  ;;  %v1355_v8 = vcombine.low %v428_v17, %v436_v12  ;;  %v1356_v14 = vcombine.high %v428_v17, %v436_v12  ;;  %v1330_v17 = vrot.slane %v1316_v62, %v6146_v47  ;;  %v1348_v27 = vcombine.high %v6154_v61, %v6157_v4 }
 0x164   : > { %v1379_v32 = vrot.slane %v1371_v2, %v5769_v9  ;;  %v1386_v13 = vrot.slane %v1372_v7, %v5769_v9  ;;  %v1339_v2 = vrot.slane %v1331_v6, %v6146_v47  ;;  %v1346_v6 = vrot.slane %v1332_v28, %v6146_v47 }
 0x165   : > { %v1363_v34 = vrot.slane %v1355_v8, %v5769_v9  ;;  %v1370_v20 = vrot.slane %v1356_v14, %v5769_v9  ;;  %v406_v18 = vpop.permute.xlu1 %405  ;;  %v1349_v37 = vcombine.low %v1298_v41, %v1330_v17  ;;  %v1350_v12 = vcombine.high %v1298_v41, %v1330_v17 }
 0x166   : > { %v402_v63 = vpop.permute.xlu0 %401  ;;  %v1351_v43 = vcombine.low %v1307_v57, %v1339_v2  ;;  %v1352_v17 = vcombine.high %v1307_v57, %v1339_v2  ;;  %v6219_v2 = vrot.slane %v671_v25, %v6146_v47 }
 0x167   : > { %v1419_v26 = vcombine.low %v1363_v34, %v1379_v32  ;;  %v1420_v35 = vcombine.high %v1363_v34, %v1379_v32  ;;  %v1435_v62 = vcombine.low %v1370_v20, %v1386_v13  ;;  %v1436_v7 = vcombine.high %v1370_v20, %v1386_v13 }
 0x168   : > { %v1354_v13 = vcombine.high %v1314_v21, %v1346_v6  ;;  %8074 = vst [vmem:[#allocation14_spill] sm:$0xff] %v6219_v2 }
 0x169   : > { %v6201_v40 = vrot.slane %v1419_v26, %v6146_v47  ;;  %v1434_v59 = vrot.slane %v1420_v35, %v6146_v47  ;;  %v1443_v8 = vrot.slane %v1435_v62, %v6146_v47  ;;  %v1450_v14 = vrot.slane %v1436_v7, %v6146_v47 }
 0x16a   : > { %v414_v20 = vpop.permute.xlu1 %413  ;;  %v410_v42 = vpop.permute.xlu0 %409  ;;  %v1353_v62 = vcombine.low %v1314_v21, %v1346_v6 }
 0x16b   : > { %8073 = vst [vmem:[#allocation13_spill] sm:$0xff] %v6201_v40  ;;  %v655_v28 = vcombine.low %v406_v18, %v414_v20  ;;  %v656_v38 = vcombine.high %v406_v18, %v414_v20  ;;  %v639_v60 = vcombine.low %v402_v63, %v410_v42  ;;  %v640_v24 = vcombine.high %v402_v63, %v410_v42 }
 0x16c   : > { %v1484_v32 = vcombine.high %v6201_v40, %v6174_v45  ;;  %v1485_v34 = vcombine.low %v1434_v59, %v1466_v29  ;;  %v1486_v26 = vcombine.high %v1434_v59, %v1466_v29  ;;  %v1487_v63 = vcombine.low %v1443_v8, %v1475_v39 }
 0x16d   : > { %v663_v35 = vrot.slane %v655_v28, %v5769_v9  ;;  %v647_v41 = vrot.slane %v639_v60, %v5769_v9  ;;  %v670_v42 = vrot.slane %v656_v38, %v5769_v9  ;;  %v654_v3 = vrot.slane %v640_v24, %v5769_v9 }
 0x16e   : > { %v430_v16 = vpop.permute.xlu1 %429  ;;  %v426_v7 = vpop.permute.xlu0 %425  ;;  %v5080_v15 = vpack.i.bf16 %v1484_v32, %v1348_v27  ;;  %v5090_v18 = vpack.i.bf16 %v1485_v34, %v1349_v37  ;;  %v5100_v20 = vpack.i.bf16 %v1486_v26, %v1350_v12  ;;  %v5110_v29 = vpack.i.bf16 %v1487_v63, %v1351_v43 }
 0x16f   : > { %v703_v46 = vcombine.low %v647_v41, %v663_v35  ;;  %v1488_v59 = vcombine.high %v1443_v8, %v1475_v39  ;;  %v1489_v28 = vcombine.low %v1450_v14, %v1482_v22  ;;  %v1490_v57 = vcombine.high %v1450_v14, %v1482_v22 }
 0x170   : > { %5081 = vrot.lane.b32.xlu0 %v5080_v15, %s5549_s8  ;;  %v704_v37 = vcombine.high %v647_v41, %v663_v35  ;;  %v719_v14 = vcombine.low %v654_v3, %v670_v42 }
 0x171   : > { %v6222_v27 = vrot.slane %v703_v46, %v6146_v47  ;;  %v6224_v21 = vpack.i.bf16 %v1488_v59, %v1352_v17  ;;  %v6226_v6 = vpack.i.bf16 %v1489_v28, %v1353_v62  ;;  %v6228_v15 = vpack.i.bf16 %v1490_v57, %v1354_v13 }
 0x172   : > { %v438_v12 = vpop.permute.xlu1 %437  ;;  %v434_v38 = vpop.permute.xlu0 %433  ;;  %v720_v13 = vcombine.high %v654_v3, %v670_v42  ;;  %v718_v26 = vrot.slane %v704_v37, %v6146_v47  ;;  %v686_v3 = vrot.slane %v672_v30, %v6146_v47  ;;  %v727_v42 = vrot.slane %v719_v14, %v6146_v47 }
 0x173   : > { %8075 = vst [vmem:[#allocation15_spill] sm:$0xff] %v6222_v27  ;;  %v759_v39 = vcombine.low %v430_v16, %v438_v12  ;;  %v760_v22 = vcombine.high %v430_v16, %v438_v12  ;;  %v743_v43 = vcombine.low %v426_v7, %v434_v38  ;;  %v744_v8 = vcombine.high %v426_v7, %v434_v38 }
 0x174   : > { %5091 = vrot.lane.b32.xlu0 %v5090_v18, %s5550_s17  ;;  %v6247_v7 = vrot.slane %v839_v5, %v6146_v47  ;;  %v854_v18 = vrot.slane %v840_v23, %v6146_v47  ;;  %v863_v5 = vrot.slane %v855_v19, %v6146_v47  ;;  %v734_v10 = vrot.slane %v720_v13, %v6146_v47 }
 0x175   : > { %v767_v46 = vrot.slane %v759_v39, %v5769_v9  ;;  %v774_v60 = vrot.slane %v760_v22, %v5769_v9  ;;  %v751_v24 = vrot.slane %v743_v43, %v5769_v9  ;;  %v758_v32 = vrot.slane %v744_v8, %v5769_v9 }
 0x176   : > { %v6237_v34 = vpop.permute.xlu1 %488  ;;  %v6239_v16 = vpop.permute.xlu0 %484  ;;  %8076 = vst [vmem:[#allocation16_spill] sm:$0xff] %v6247_v7  ;;  %v695_v23 = vrot.slane %v687_v31, %v6146_v47  ;;  %v736_v59 = vcombine.high %v6219_v2, %v6222_v27  ;;  %v737_v28 = vcombine.low %v686_v3, %v718_v26  ;;  %v738_v57 = vcombine.high %v686_v3, %v718_v26 }
 0x177   : > { %v807_v35 = vcombine.low %v751_v24, %v767_v46  ;;  %v808_v41 = vcombine.high %v751_v24, %v767_v46  ;;  %v823_v17 = vcombine.low %v758_v32, %v774_v60  ;;  %v824_v62 = vcombine.high %v758_v32, %v774_v60 }
 0x178   : > { %5101 = vrot.lane.b32.xlu0 %v5100_v20, %s5551_s19  ;;  %v739_v33 = vcombine.low %v695_v23, %v727_v42  ;;  %v8078_v39 = vcombine.high %v6065_v56, %v6071_v50  ;;  %v740_v24 = vcombine.high %v695_v23, %v727_v42 }
 0x179   : > { %v6258_v63 = vrot.slane %v807_v35, %v6146_v47  ;;  %v822_v20 = vrot.slane %v808_v41, %v6146_v47  ;;  %v831_v36 = vrot.slane %v823_v17, %v6146_v47  ;;  %v838_v19 = vrot.slane %v824_v62, %v6146_v47 }
 0x17a   : > { %v6267_v53 = vpop.permute.xlu1 %496  ;;  %v6269_v30 = vpop.permute.xlu0 %492 }
 0x17b   : > { %8077 = vst [vmem:[#allocation17_spill] sm:$0xff] %v6258_v63  ;;  %v872_v31 = vcombine.high %v6258_v63, %v6247_v7  ;;  %v873_v12 = vcombine.low %v822_v20, %v854_v18  ;;  %v874_v38 = vcombine.high %v822_v20, %v854_v18  ;;  %v1507_v11 = vcombine.low %v6237_v34, %v6267_v53 }
 0x17c   : > { %5111 = vrot.lane.b32.xlu0 %v5110_v29, %s5552_s20  ;;  %v1491_v55 = vcombine.low %v6239_v16, %v6269_v30  ;;  %v702_v29 = vrot.slane %v8078_v39, %v6146_v47  ;;  %v875_v60 = vcombine.low %v831_v36, %v863_v5  ;;  %v876_v35 = vcombine.high %v831_v36, %v863_v5 }
 0x17d   : > { %v5085_v8 = vpack.i.bf16 %v872_v31, %v736_v59  ;;  %v5095_v14 = vpack.i.bf16 %v873_v12, %v737_v28  ;;  %v5105_v46 = vpack.i.bf16 %v874_v38, %v738_v57  ;;  %v877_v41 = vcombine.low %v838_v19, %v870_v58 }
 0x17e   : > { %v6296_v22 = vpop.permute.xlu1 %512  ;;  %v6298_v43 = vpop.permute.xlu0 %508  ;;  %v741_v32 = vcombine.low %v702_v29, %v734_v10  ;;  %v742_v13 = vcombine.high %v702_v29, %v734_v10  ;;  %v5115_v26 = vpack.i.bf16 %v875_v60, %v739_v33  ;;  %v878_v17 = vcombine.high %v838_v19, %v870_v58 }
 0x17f   : > { %5086 = vrot.lane.b32.xlu1 %v5085_v8, %s5549_s8  ;;  %v6302_v56 = vrot.slane %v1507_v11, %v5769_v9  ;;  %v6305_v50 = vrot.slane %v1491_v55, %v5769_v9  ;;  %v5125_v18 = vpack.i.bf16 %v876_v35, %v740_v24  ;;  %v1508_v2 = vcombine.high %v6237_v34, %v6267_v53 }
 0x180   : > { %v5135_v20 = vpack.i.bf16 %v877_v41, %v741_v32  ;;  %v5145_v42 = vpack.i.bf16 %v878_v17, %v742_v13  ;;  %v8079_v13 = vcombine.low %v5947_v52, %v5963_v0 }
 0x181   : > { %v1555_v58 = vcombine.low %v6305_v50, %v6302_v56 }
 0x182   : > { %v6307_v62 = vpop.permute.xlu1 %520  ;;  %v6309_v3 = vpop.permute.xlu0 %516 }
 0x183   : > { %v1539_v10 = vcombine.low %v6296_v22, %v6307_v62  ;;  %v1523_v5 = vcombine.low %v6298_v43, %v6309_v3  ;;  %5096 = vrot.lane.b32.xlu1 %v5095_v14, %s5550_s17  ;;  %v6339_v38 = vrot.slane %v1555_v58, %v6146_v47  ;;  %v1524_v4 = vcombine.high %v6298_v43, %v6309_v3 }
 0x185   : > { %v6317_v23 = vrot.slane %v1539_v10, %v5769_v9  ;;  %v6320_v36 = vrot.slane %v1523_v5, %v5769_v9  ;;  %v6465_v3 = vrot.slane %v1524_v4, %v5769_v9 }
 0x186   : > { %v6324_v19 = vpop.permute.xlu1 %565  ;;  %v6326_v59 = vpop.permute.xlu0 %561 }
 0x187   : > { %v1587_v28 = vcombine.low %v6320_v36, %v6317_v23  ;;  %5106 = vrot.lane.b32.xlu1 %v5105_v46, %s5551_s19 }
 0x189   : > { %v6332_v57 = vrot.slane %v1587_v28, %v6146_v47 }
 0x18a   : > { %v6334_v31 = vpop.permute.xlu1 %573  ;;  %v6336_v12 = vpop.permute.xlu0 %569 }
 0x18b   : > { %v1675_v11 = vcombine.low %v6324_v19, %v6334_v31  ;;  %v1659_v55 = vcombine.low %v6326_v59, %v6336_v12  ;;  %5116 = vrot.lane.b32.xlu1 %v5115_v26, %s5552_s20  ;;  %v6373_v26 = vrot.slane %v8079_v13, %v6146_v47  ;;  %v1676_v61 = vcombine.high %v6324_v19, %v6334_v31 }
 0x18c   : > { %v1660_v34 = vcombine.high %v6326_v59, %v6336_v12 }
 0x18d   : > { %v6349_v39 = vrot.slane %v1675_v11, %v5769_v9  ;;  %v6352_v29 = vrot.slane %v1659_v55, %v5769_v9  ;;  %v6468_v19 = vrot.slane %v1676_v61, %v5769_v9 }
 0x18e   : > { %v6354_v8 = vpop.permute.xlu1 %486  ;;  %v6356_v14 = vpop.permute.xlu0 %482  ;;  %v6471_v59 = vrot.slane %v1660_v34, %v5769_v9 }
 0x18f   : > { %v1723_v46 = vcombine.low %v6352_v29, %v6349_v39  ;;  %5121 = vrot.lane.b32.xlu1 %v6224_v21, %s5553_s22 }
 0x190   : > { %v1739_v4 = vcombine.low %v6471_v59, %v6468_v19 }
 0x191   : > { %v6363_v60 = vrot.slane %v1723_v46, %v6146_v47 }
 0x192   : > { %v6365_v24 = vpop.permute.xlu1 %494  ;;  %v6367_v32 = vpop.permute.xlu0 %490 }
 0x193   : > { %5126 = vrot.lane.b32.xlu1 %v5125_v18, %s5553_s22  ;;  %v895_v21 = vcombine.low %v6354_v8, %v6365_v24  ;;  %v879_v41 = vcombine.low %v6356_v14, %v6367_v32 }
 0x195   : > { %v6389_v5 = vrot.slane %v895_v21, %v5769_v9  ;;  %v6392_v18 = vrot.slane %v879_v41, %v5769_v9 }
 0x196   : > { %v6382_v17 = vpop.permute.xlu1 %510  ;;  %v6384_v10 = vpop.permute.xlu0 %506 }
 0x197   : > { %5131 = vrot.lane.b32.xlu1 %v6226_v6, %s5554_s26  ;;  %8080 = vst [vmem:[#allocation18_spill] sm:$0xff] %v6389_v5  ;;  %8081 = vst [vmem:[#allocation19_spill] sm:$0xff] %v6392_v18  ;;  %v943_v6 = vcombine.low %v6392_v18, %v6389_v5 }
 0x19a   : > { %v6394_v58 = vpop.permute.xlu1 %518  ;;  %v6396_v28 = vpop.permute.xlu0 %514 }
 0x19b   : > { %v927_v11 = vcombine.low %v6382_v17, %v6394_v58  ;;  %v911_v55 = vcombine.low %v6384_v10, %v6396_v28  ;;  %5136 = vrot.lane.b32.xlu1 %v5135_v20, %s5554_s26  ;;  %v6416_v20 = vrot.slane %v943_v6, %v6146_v47  ;;  %v928_v61 = vcombine.high %v6382_v17, %v6394_v58 }
 0x19c   : > { %v912_v34 = vcombine.high %v6384_v10, %v6396_v28 }
 0x19d   : > { %v6406_v46 = vrot.slane %v927_v11, %v5769_v9  ;;  %v6409_v13 = vrot.slane %v911_v55, %v5769_v9  ;;  %8083 = vst [vmem:[#allocation21_spill] sm:$0xff] %v6416_v20  ;;  %v1492_v55 = vcombine.high %v6239_v16, %v6269_v30  ;;  %v6510_v58 = vrot.slane %v928_v61, %v5769_v9 }
 0x19e   : > { %v564_v21 = vpop.permute.xlu1 %563  ;;  %v560_v41 = vpop.permute.xlu0 %559  ;;  %v6513_v28 = vrot.slane %v912_v34, %v5769_v9  ;;  %v8058_v61 = vmov 0.0  }
 0x19f   : > { %8082 = vst [vmem:[#allocation20_spill] sm:$0xff] %v6409_v13  ;;  %v975_v33 = vcombine.low %v6409_v13, %v6406_v46  ;;  %5141 = vrot.lane.b32.xlu1 %v6228_v15, %s5555_s27  ;;  %v880_v13 = vcombine.high %v6356_v14, %v6367_v32 }
 0x1a1   : > { %v6419_v35 = vrot.slane %v975_v33, %v6146_v47 }
 0x1a2   : > { %v572_v11 = vpop.permute.xlu1 %571  ;;  %v568_v37 = vpop.permute.xlu0 %567 }
 0x1a3   : > { %8084 = vst [vmem:[#allocation22_spill] sm:$0xff] %v6419_v35  ;;  %v1063_v25 = vcombine.low %v564_v21, %v572_v11  ;;  %v1047_v7 = vcombine.low %v560_v41, %v568_v37  ;;  %5146 = vrot.lane.b32.xlu1 %v5145_v42, %s5555_s27  ;;  %v1540_v42 = vcombine.high %v6296_v22, %v6307_v62 }
 0x1a4   : > { %v6456_v62 = vrot.slane %v1508_v2, %v5769_v9  ;;  %v1048_v22 = vcombine.high %v560_v41, %v568_v37  ;;  %v896_v35 = vcombine.high %v6354_v8, %v6365_v24 }
 0x1a5   : > { %v6425_v63 = vrot.slane %v1063_v25, %v5769_v9  ;;  %v6428_v15 = vrot.slane %v1047_v7, %v5769_v9  ;;  %v8085_v25 = vcombine.low %v6018_v44, %v6024_v49  ;;  %v6462_v43 = vrot.slane %v1540_v42, %v5769_v9 }
 0x1a6   : > { %v586_v6 = vpop.permute.xlu1 %585  ;;  %v584_v27 = vpop.permute.xlu0 %583  ;;  %v6500_v8 = vrot.slane %v1048_v22, %v5769_v9 }
 0x1a7   : > { %v1111_v33 = vcombine.low %v6428_v15, %v6425_v63  ;;  %v6442_v7 = vrot.slane %v8085_v25, %v6146_v47  ;;  %v6459_v25 = vrot.slane %v1492_v55, %v5769_v9  ;;  %v1603_v42 = vcombine.low %v6465_v3, %v6462_v43 }
 0x1a9   : > { %v6451_v16 = vrot.slane %v1111_v33, %v6146_v47  ;;  %v1571_v2 = vcombine.low %v6459_v25, %v6456_v62  ;;  %v1064_v33 = vcombine.high %v564_v21, %v572_v11 }
 0x1aa   : > { %v590_v53 = vpop.permute.xlu1 %589  ;;  %v588_v30 = vpop.permute.xlu0 %587 }
 0x1ab   : > { %v6488_v17 = vrot.slane %v1064_v33, %v5769_v9 }
 0x1ae   : > { %v594_v31 = vpop.permute.xlu1 %593  ;;  %v592_v12 = vpop.permute.xlu0 %591 }
 0x1af   : > { %v1763_v55 = vcombine.low %v586_v6, %v594_v31  ;;  %v1764_v45 = vcombine.high %v586_v6, %v594_v31  ;;  %v1151_v40 = vcombine.low %v584_v27, %v592_v12  ;;  %v1152_v49 = vcombine.high %v584_v27, %v592_v12 }
 0x1b0   : > { %v6530_v31 = vrot.slane %v880_v13, %v5769_v9  ;;  %v1127_v12 = vcombine.low %v6500_v8, %v6488_v17  ;;  %v8086_v13 = vcombine.low %v5950_v54, %v5966_v1 }
 0x1b1   : > { %v1771_v37 = vrot.slane %v1763_v55, %v5769_v9  ;;  %v6503_v14 = vrot.slane %v1764_v45, %v5769_v9  ;;  %v1159_v24 = vrot.slane %v1151_v40, %v5769_v9  ;;  %v6507_v32 = vrot.slane %v1152_v49, %v5769_v9 }
 0x1b2   : > { %v598_v44 = vpop.permute.xlu1 %597  ;;  %v596_v18 = vpop.permute.xlu0 %595  ;;  %v6520_v40 = vrot.slane %v1739_v4, %v6146_v47  ;;  %v6523_v49 = vrot.slane %v896_v35, %v5769_v9  ;;  %v6539_v4 = vrot.slane %v1603_v42, %v6146_v47  ;;  %v991_v35 = vcombine.low %v6513_v28, %v6510_v58 }
 0x1b3   : > { %v1779_v21 = vcombine.low %v590_v53, %v598_v44  ;;  %v1780_v11 = vcombine.high %v590_v53, %v598_v44  ;;  %v1167_v5 = vcombine.low %v588_v30, %v596_v18  ;;  %v1168_v20 = vcombine.high %v588_v30, %v596_v18 }
 0x1b5   : > { %v1787_v10 = vrot.slane %v1779_v21, %v5769_v9  ;;  %v6493_v27 = vrot.slane %v1780_v11, %v5769_v9  ;;  %v1175_v44 = vrot.slane %v1167_v5, %v5769_v9  ;;  %v6497_v18 = vrot.slane %v1168_v20, %v5769_v9 }
 0x1b6   : > { %v6549_v21 = vrot.slane %v8086_v13, %v6146_v47  ;;  %v1740_v13 = vcombine.high %v6471_v59, %v6468_v19  ;;  %v1112_v59 = vcombine.high %v6428_v15, %v6425_v63  ;;  %v1128_v15 = vcombine.high %v6500_v8, %v6488_v17  ;;  %v8094_v17 = vld [vmem:[#allocation19_spill] sm:$0xff] }
 0x1b7   : > { %v1795_v5 = vcombine.low %v1771_v37, %v1787_v10  ;;  %v1796_v41 = vcombine.high %v1771_v37, %v1787_v10  ;;  %v1811_v20 = vcombine.low %v6503_v14, %v6493_v27  ;;  %v1183_v6 = vcombine.low %v1159_v24, %v1175_v44 }
 0x1b8   : > { %v1184_v53 = vcombine.high %v1159_v24, %v1175_v44  ;;  %v1199_v45 = vcombine.low %v6507_v32, %v6497_v18  ;;  %v6560_v44 = vrot.slane %v1571_v2, %v6146_v47  ;;  %v959_v24 = vcombine.low %v6530_v31, %v6523_v49 }
 0x1b9   : > { %v6526_v30 = vrot.slane %v1795_v5, %v6146_v47  ;;  %v1810_v22 = vrot.slane %v1796_v41, %v6146_v47  ;;  %v6535_v33 = vrot.slane %v1183_v6, %v6146_v47  ;;  %v6557_v10 = vrot.slane %v1811_v20, %v6146_v47 }
 0x1ba   : > { %v1198_v55 = vrot.slane %v1184_v53, %v6146_v47  ;;  %v6554_v42 = vrot.slane %v1199_v45, %v6146_v47  ;;  %v6565_v5 = vrot.slane %v1127_v12, %v6146_v47  ;;  %v1760_v6 = vcombine.high %v6549_v21, %v6520_v40 }
 0x1bb   : > { %v1827_v34 = vcombine.high %v6526_v30, %v8058_v61  ;;  %v1215_v37 = vcombine.high %v6535_v33, %v8058_v61  ;;  %v1724_v53 = vcombine.high %v6352_v29, %v6349_v39  ;;  %v8087_v2 = vcombine.low %v6021_v48, %v6027_v51 }
 0x1bc   : > { %v5150_v11 = vpack.i.bf16 %v1810_v22, %v1198_v55  ;;  %v6579_v45 = vrot.slane %v991_v35, %v6146_v47  ;;  %v5155_v12 = vpack.i.bf16 %v6557_v10, %v6554_v42  ;;  %v1756_v39 = vcombine.high %v6373_v26, %v6363_v60 }
 0x1bd   : > { %v5195_v41 = vpack.i.bf16 %v1827_v34, %v1215_v37  ;;  %v6576_v20 = vrot.slane %v8087_v2, %v6146_v47  ;;  %v1624_v34 = vcombine.high %v6560_v44, %v6539_v4  ;;  %v1588_v29 = vcombine.high %v6320_v36, %v6317_v23 }
 0x1be   : > { %5151 = vrot.lane.b32.xlu0 %v5150_v11, %s5550_s17  ;;  %v8088_v35 = vcombine.high %v5947_v52, %v5963_v0  ;;  %v6599_v37 = vrot.slane %v959_v24, %v6146_v47  ;;  %v1620_v2 = vcombine.high %v6339_v38, %v6332_v57  ;;  %v1556_v36 = vcombine.high %v6305_v50, %v6302_v56 }
 0x1bf   : > { %5196 = vrot.lane.b32.xlu1 %v5195_v41, %s5549_s8  ;;  %v5205_v41 = vpack.i.bf16 %v1760_v6, %v1624_v34  ;;  %v1148_v23 = vcombine.high %v6576_v20, %v6565_v5  ;;  %v1572_v52 = vcombine.high %v6459_v25, %v6456_v62  ;;  %v1604_v0 = vcombine.high %v6465_v3, %v6462_v43  ;;  %v8089_v25 = vld [vmem:[#allocation20_spill] sm:$0xff]  ;;  %v8090_v3 = vld [vmem:[#allocation22_spill] sm:$0xff] }
 0x1c0   : > { %v6596_v11 = vrot.slane %v8088_v35, %v6146_v47  ;;  %v1738_v19 = vrot.slane %v1724_v53, %v6146_v47  ;;  %v5160_v24 = vpack.i.bf16 %v1756_v39, %v1620_v2  ;;  %v1012_v6 = vcombine.high %v6599_v37, %v6579_v45  ;;  %v8091_v53 = vld [vmem:[#allocation21_spill] sm:$0xff]  ;;  %v8093_v2 = vld [vmem:[#allocation18_spill] sm:$0xff] }
 0x1c1   : > { %v1144_v56 = vcombine.high %v6442_v7, %v6451_v16  ;;  %v1602_v50 = vrot.slane %v1588_v29, %v6146_v47  ;;  %v6622_v62 = vrot.slane %v1740_v13, %v6146_v47  ;;  %v976_v43 = vcombine.high %v8089_v25, %v6406_v46 }
 0x1c2   : > { %5156 = vrot.lane.b32.xlu0 %v5155_v12, %s5552_s20  ;;  %v1008_v63 = vcombine.high %v8091_v53, %v8090_v3  ;;  %v1828_v12 = vcombine.high %v1810_v22, %v8058_v61  ;;  %v1216_v34 = vcombine.high %v1198_v55, %v8058_v61  ;;  %v5210_v39 = vpack.i.bf16 %v1148_v23, %v1012_v6 }
 0x1c3   : > { %5206 = vrot.lane.b32.xlu1 %v5205_v41, %s5553_s22  ;;  %v1570_v29 = vrot.slane %v1556_v36, %v6146_v47  ;;  %v1618_v13 = vrot.slane %v1604_v0, %v6146_v47  ;;  %v1757_v35 = vcombine.low %v6596_v11, %v1738_v19  ;;  %v8092_v46 = vcombine.high %v5950_v54, %v5966_v1  ;;  %v8095_v54 = vld [vmem:[#allocation8_spill] sm:$0xff]  ;;  %v8096_v1 = vld [vmem:[#allocation9_spill] sm:$0xff] }
 0x1c4   : > { %v944_v8 = vcombine.high %v8094_v17, %v8093_v2  ;;  %v992_v22 = vcombine.high %v6513_v28, %v6510_v58  ;;  %v1126_v55 = vrot.slane %v1112_v59, %v6146_v47  ;;  %v5165_v23 = vpack.i.bf16 %v1144_v56, %v1008_v63 }
 0x1c5   : > { %v1722_v41 = vrot.slane %v8092_v46, %v6146_v47  ;;  %v1586_v36 = vrot.slane %v1572_v52, %v6146_v47  ;;  %v960_v0 = vcombine.high %v6530_v31, %v6523_v49  ;;  %v8097_v6 = vcombine.high %v8095_v54, %v8096_v1 }
 0x1c6   : > { %5161 = vrot.lane.b32.xlu0 %v5160_v24, %s5549_s8  ;;  %v990_v46 = vrot.slane %v976_v43, %v6146_v47  ;;  %v1142_v58 = vrot.slane %v1128_v15, %v6146_v47  ;;  %v5220_v28 = vpack.i.bf16 %v1828_v12, %v1216_v34  ;;  %v1621_v59 = vcombine.low %v1570_v29, %v1602_v50 }
 0x1c7   : > { %5211 = vrot.lane.b32.xlu1 %v5210_v39, %s5553_s22  ;;  %v1762_v24 = vcombine.high %v1722_v41, %v6622_v62  ;;  %v1094_v25 = vrot.slane %v8097_v6, %v6146_v47  ;;  %v1626_v56 = vcombine.high %v1586_v36, %v1618_v13  ;;  %v8098_v49 = vcombine.high %v6021_v48, %v6027_v51 }
 0x1c8   : > { %v958_v52 = vrot.slane %v944_v8, %v6146_v47  ;;  %v1006_v63 = vrot.slane %v992_v22, %v6146_v47  ;;  %v5170_v39 = vpack.i.bf16 %v1757_v35, %v1621_v59  ;;  %v974_v15 = vrot.slane %v960_v0, %v6146_v47 }
 0x1c9   : > { %v1110_v31 = vrot.slane %v8098_v49, %v6146_v47  ;;  %v1145_v43 = vcombine.low %v1094_v25, %v1126_v55  ;;  %v5230_v2 = vpack.i.bf16 %v1762_v24, %v1626_v56  ;;  %v1812_v12 = vcombine.high %v6503_v14, %v6493_v27 }
 0x1ca   : > { %5166 = vrot.lane.b32.xlu0 %v5165_v23, %s5549_s8  ;;  %v1200_v34 = vcombine.high %v6507_v32, %v6497_v18  ;;  %v1009_v48 = vcombine.low %v958_v52, %v990_v46  ;;  %v1014_v8 = vcombine.high %v974_v15, %v1006_v63  ;;  %v1758_v35 = vcombine.high %v6596_v11, %v1738_v19 }
 0x1cb   : > { %5221 = vrot.lane.b32.xlu1 %v5220_v28, %s5551_s19  ;;  %v1150_v51 = vcombine.high %v1110_v31, %v1142_v58  ;;  %v1622_v23 = vcombine.high %v1570_v29, %v1602_v50  ;;  %v1826_v27 = vrot.slane %v1812_v12, %v6146_v47  ;;  %v1146_v14 = vcombine.high %v1094_v25, %v1126_v55 }
 0x1cc   : > { %v5175_v17 = vpack.i.bf16 %v1145_v43, %v1009_v48  ;;  %v1214_v0 = vrot.slane %v1200_v34, %v6146_v47  ;;  %v1010_v24 = vcombine.high %v958_v52, %v990_v46  ;;  %v1759_v11 = vcombine.low %v6549_v21, %v6520_v40 }
 0x1cd   : > { %v5235_v22 = vpack.i.bf16 %v1150_v51, %v1014_v8  ;;  %v5180_v18 = vpack.i.bf16 %v1758_v35, %v1622_v23  ;;  %v1623_v19 = vcombine.low %v6560_v44, %v6539_v4  ;;  %v1147_v29 = vcombine.low %v6576_v20, %v6565_v5  ;;  %v8099_v51 = vld [vmem:[#allocation13_spill] sm:$0xff]  ;;  %v8103_v23 = vld [vmem:[#allocation11_spill] sm:$0xff] }
 0x1ce   : > { %5171 = vrot.lane.b32.xlu0 %v5170_v39, %s5550_s17  ;;  %v5240_v32 = vpack.i.bf16 %v1826_v27, %v1214_v0  ;;  %v5185_v54 = vpack.i.bf16 %v1146_v14, %v1010_v24  ;;  %v1011_v55 = vcombine.low %v6599_v37, %v6579_v45  ;;  %v1761_v6 = vcombine.low %v1722_v41, %v6622_v62 }
 0x1cf   : > { %5231 = vrot.lane.b32.xlu1 %v5230_v2, %s5555_s27  ;;  %v5190_v50 = vpack.i.bf16 %v1759_v11, %v1623_v19  ;;  %v1625_v40 = vcombine.low %v1586_v36, %v1618_v13  ;;  %v1149_v25 = vcombine.low %v1110_v31, %v1142_v58  ;;  %v1013_v4 = vcombine.low %v974_v15, %v1006_v63 }
 0x1d0   : > { %v5200_v1 = vpack.i.bf16 %v1147_v29, %v1011_v55  ;;  %v1829_v44 = vcombine.high %v6557_v10, %v8058_v61  ;;  %v1217_v5 = vcombine.high %v6554_v42, %v8058_v61  ;;  %v1218_v37 = vcombine.high %v1214_v0, %v8058_v61 }
 0x1d1   : > { %v5215_v21 = vpack.i.bf16 %v1761_v6, %v1625_v40  ;;  %v5225_v20 = vpack.i.bf16 %v1149_v25, %v1013_v4  ;;  %v1830_v62 = vcombine.high %v1826_v27, %v8058_v61  ;;  %v5557_v13 = vmov 0   ;;  %v8106_v25 = vld [vmem:[#allocation15_spill] sm:$0xff] }
 0x1d2   : > { %5176 = vrot.lane.b32.xlu0 %v5175_v17, %s5550_s17  ;;  %v5245_v45 = vpack.i.bf16 %v1829_v44, %v1217_v5  ;;  %2238 = vmatprep.mubr.bf16.mxu0 %v5557_v13  ;;  %v8100_v17 = vld [vmem:[#allocation12_spill] sm:$0xff]  ;;  %v8108_v5 = vld [vmem:[#allocation17_spill] sm:$0xff] }
 0x1d3   : > { %5236 = vrot.lane.b32.xlu1 %v5235_v22, %s5555_s27  ;;  %4480 = vmatprep.mubr.bf16.mxu1 %v5557_v13  ;;  %v5250_v41 = vpack.i.bf16 %v1830_v62, %v1218_v37  ;;  %v8101_v8 = vcombine.low %v8099_v51, %v8100_v17  ;;  %v8102_v22 = vld [vmem:[#allocation10_spill] sm:$0xff] }
 0x1d4   : > { %v8104_v0 = vcombine.low %v8102_v22, %v8103_v23 }
 0x1d6   : > { %5181 = vrot.lane.b32.xlu0 %v5180_v18, %s5551_s19 }
 0x1d7   : > { %5241 = vrot.lane.b32.xlu1 %v5240_v32, %s5554_s26 }
 0x1da   : > { %5186 = vrot.lane.b32.xlu0 %v5185_v54, %s5551_s19 }
 0x1de   : > { %5191 = vrot.lane.b32.xlu0 %v5190_v50, %s5552_s20 }
 0x1e2   : > { %5201 = vrot.lane.b32.xlu0 %v5200_v1, %s5552_s20  ;;  %v5082_v10 = vpop.permute.xlu0 %5081 }
 0x1e3   : > { %v5084_v31 = vunpack.i.h.bf16 %v5082_v10  ;;  %v5083_v52 = vunpack.i.l.bf16 %v5082_v10 }
 0x1e5   : > { %v2154_v35 = vsel %vm2111_vm5, %v8101_v8, %v5084_v31  ;;  %v2153_v27 = vsel %vm2111_vm5, %v8104_v0, %v5083_v52 }
 0x1e6   : > { %5216 = vrot.lane.b32.xlu0 %v5215_v21, %s5554_s26  ;;  %v5092_v58 = vpop.permute.xlu0 %5091  ;;  %v8105_v21 = vld [vmem:[#allocation14_spill] sm:$0xff] }
 0x1e7   : > { %v5094_v39 = vunpack.i.h.bf16 %v5092_v58  ;;  %v5093_v43 = vunpack.i.l.bf16 %v5092_v58  ;;  %v8107_v4 = vcombine.low %v8105_v21, %v8106_v25 }
 0x1e9   : > { %v2158_v32 = vsel %vm2117_vm6, %v2153_v27, %v5093_v43  ;;  %v2159_v24 = vsel %vm2117_vm6, %v2154_v35, %v5094_v39 }
 0x1ea   : > { %5226 = vrot.lane.b32.xlu0 %v5225_v20, %s5554_s26  ;;  %v5102_v59 = vpop.permute.xlu0 %5101  ;;  %v8109_v20 = vld [vmem:[#allocation16_spill] sm:$0xff] }
 0x1eb   : > { %v5104_v15 = vunpack.i.h.bf16 %v5102_v59  ;;  %v5103_v2 = vunpack.i.l.bf16 %v5102_v59 }
 0x1ed   : > { %v2163_v19 = vsel %vm2123_vm7, %v2158_v32, %v5103_v2  ;;  %v2164_v50 = vsel %vm2123_vm7, %v2159_v24, %v5104_v15 }
 0x1ee   : > { %5246 = vrot.lane.b32.xlu0 %v5245_v45, %s5553_s22  ;;  %v5112_v63 = vpop.permute.xlu0 %5111  ;;  %v8110_v45 = vcombine.low %v8108_v5, %v8109_v20 }
 0x1ef   : > { %v5114_v34 = vunpack.i.h.bf16 %v5112_v63  ;;  %v5113_v48 = vunpack.i.l.bf16 %v5112_v63 }
 0x1f1   : > { %v5087_v36 = vpop.permute.xlu1 %5086  ;;  %v2168_v6 = vsel %vm2129_vm8, %v2163_v19, %v5113_v48  ;;  %v2169_v40 = vsel %vm2129_vm8, %v2164_v50, %v5114_v34 }
 0x1f2   : > { %5251 = vrot.lane.b32.xlu0 %v5250_v41, %s5555_s27  ;;  %v5089_v18 = vunpack.i.h.bf16 %v5087_v36  ;;  %v5088_v14 = vunpack.i.l.bf16 %v5087_v36 }
 0x1f4   : > { %v2112_v44 = vsel %vm2111_vm5, %v8107_v4, %v5088_v14  ;;  %v2113_v37 = vsel %vm2111_vm5, %v8110_v45, %v5089_v18 }
 0x1f5   : > { %v5097_v46 = vpop.permute.xlu1 %5096 }
 0x1f6   : > { %v5099_v54 = vunpack.i.h.bf16 %v5097_v46  ;;  %v5098_v11 = vunpack.i.l.bf16 %v5097_v46 }
 0x1f8   : > { %v2118_v41 = vsel %vm2117_vm6, %v2112_v44, %v5098_v11  ;;  %v2119_v36 = vsel %vm2117_vm6, %v2113_v37, %v5099_v54 }
 0x1f9   : > { %v5107_v42 = vpop.permute.xlu1 %5106 }
 0x1fa   : > { %v5109_v10 = vunpack.i.h.bf16 %v5107_v42  ;;  %v5108_v46 = vunpack.i.l.bf16 %v5107_v42 }
 0x1fc   : > { %v2124_v48 = vsel %vm2123_vm7, %v2118_v41, %v5108_v46 }
 0x1fd   : > { %v6700_v28 = vpop.permute.xlu1 %5116 }
 0x1fe   : > { %v5119_v58 = vunpack.i.h.bf16 %v6700_v28  ;;  %v5118_v59 = vunpack.i.l.bf16 %v6700_v28  ;;  %v2125_v28 = vsel %vm2123_vm7, %v2119_v36, %v5109_v10 }
 0x200   : > { %v2130_v8 = vsel %vm2129_vm8, %v2124_v48, %v5118_v59 }
 0x201   : > { %v5122_v56 = vpop.permute.xlu1 %5121 }
 0x202   : > { %v5124_v29 = vunpack.i.h.bf16 %v5122_v56  ;;  %v5123_v55 = vunpack.i.l.bf16 %v5122_v56 }
 0x204   : > { %v2173_v31 = vsel %vm2135_vm9, %v2168_v6, %v5123_v55  ;;  %v2174_v52 = vsel %vm2135_vm9, %v2169_v40, %v5124_v29 }
 0x205   : > { %v6702_v49 = vpop.permute.xlu1 %5126 }
 0x206   : > { %v5129_v63 = vunpack.i.h.bf16 %v6702_v49  ;;  %v5128_v39 = vunpack.i.l.bf16 %v6702_v49  ;;  %v2131_v49 = vsel %vm2129_vm8, %v2125_v28, %v5119_v58 }
 0x208   : > { %v2136_v27 = vsel %vm2135_vm9, %v2130_v8, %v5128_v39  ;;  %v2137_v18 = vsel %vm2135_vm9, %v2131_v49, %v5129_v63 }
 0x209   : > { %v5132_v12 = vpop.permute.xlu1 %5131 }
 0x20a   : > { %v5134_v62 = vunpack.i.h.bf16 %v5132_v12  ;;  %v5133_v13 = vunpack.i.l.bf16 %v5132_v12 }
 0x20c   : > { %v2178_v34 = vsel %vm2141_vm10, %v2173_v31, %v5133_v13  ;;  %v2179_v42 = vsel %vm2141_vm10, %v2174_v52, %v5134_v62 }
 0x20d   : > { %v5137_v1 = vpop.permute.xlu1 %5136 }
 0x20e   : > { %v5139_v2 = vunpack.i.h.bf16 %v5137_v1  ;;  %v5138_v12 = vunpack.i.l.bf16 %v5137_v1 }
 0x210   : > { %v2142_v14 = vsel %vm2141_vm10, %v2136_v27, %v5138_v12  ;;  %v2143_v32 = vsel %vm2141_vm10, %v2137_v18, %v5139_v2  ;;  %v8111_v12 = vcombine.low %v6373_v26, %v6363_v60 }
 0x211   : > { %v5142_v56 = vpop.permute.xlu1 %5141 }
 0x212   : > { %v5144_v43 = vunpack.i.h.bf16 %v5142_v56  ;;  %v5143_v15 = vunpack.i.l.bf16 %v5142_v56 }
 0x214   : > { %v2183_v51 = vsel %vm2147_vm11, %v2178_v34, %v5143_v15  ;;  %v2184_v17 = vsel %vm2147_vm11, %v2179_v42, %v5144_v43  ;;  %v8112_v42 = vcombine.low %v6339_v38, %v6332_v57 }
 0x215   : > { %v5147_v35 = vpop.permute.xlu1 %5146  ;;  %v2189_v22 = vpack.c.bf16 %v2184_v17, %v2183_v51  ;;  %v8114_v51 = vcombine.low %v8091_v53, %v8090_v3 }
 0x216   : > { %v5149_v23 = vunpack.i.h.bf16 %v5147_v35  ;;  %v5148_v0 = vunpack.i.l.bf16 %v5147_v35 }
 0x217   : > { %2206 = vmatprep.subr.bf16.mxu0 %v2189_v22 }
 0x218   : > { %v2148_v24 = vsel %vm2147_vm11, %v2142_v14, %v5148_v0  ;;  %v2149_v54 = vsel %vm2147_vm11, %v2143_v32, %v5149_v23 }
 0x219   : > { %v2188_v11 = vpack.c.bf16 %v2149_v54, %v2148_v24 }
 0x21b   : > { %2207 = vmatpush1.bf16.msra.mxu0 %v2188_v11 }
 0x230   : > { %v6748_v19 = vpop.permute.xlu0 %5151 }
 0x231   : > { %v5197_v1 = vpop.permute.xlu1 %5196  ;;  %v5153_v45 = vunpack.i.l.bf16 %v6748_v19  ;;  %v5154_v58 = vunpack.i.h.bf16 %v6748_v19 }
 0x232   : > { %v5198_v44 = vunpack.i.l.bf16 %v5197_v1  ;;  %v5199_v20 = vunpack.i.h.bf16 %v5197_v1 }
 0x234   : > { %v6750_v50 = vpop.permute.xlu0 %5156  ;;  %v2116_v37 = vsel %vm2111_vm5, %v6535_v33, %v5198_v44  ;;  %v2157_v31 = vsel %vm2111_vm5, %v6526_v30, %v5199_v20  ;;  %v8113_v30 = vcombine.low %v6442_v7, %v6451_v16 }
 0x235   : > { %v5207_v40 = vpop.permute.xlu1 %5206  ;;  %v2122_v52 = vsel %vm2117_vm6, %v2116_v37, %v5153_v45 }
 0x236   : > { %v5209_v43 = vunpack.i.h.bf16 %v5207_v40  ;;  %v5208_v33 = vunpack.i.l.bf16 %v5207_v40 }
 0x238   : > { %v5162_v29 = vpop.permute.xlu0 %5161 }
 0x239   : > { %v6752_v4 = vpop.permute.xlu1 %5211  ;;  %v5164_v13 = vunpack.i.h.bf16 %v5162_v29  ;;  %v5163_v41 = vunpack.i.l.bf16 %v5162_v29 }
 0x23a   : > { %v5214_v45 = vunpack.i.h.bf16 %v6752_v4  ;;  %v5213_v37 = vunpack.i.l.bf16 %v6752_v4 }
 0x23b   : > { %v2156_v34 = vsel %vm2111_vm5, %v8111_v12, %v5164_v13  ;;  %v2155_v48 = vsel %vm2111_vm5, %v8112_v42, %v5163_v41 }
 0x23c   : > { %v5167_v55 = vpop.permute.xlu0 %5166 }
 0x23d   : > { %v6757_v62 = vpop.permute.xlu1 %5221  ;;  %v5169_v36 = vunpack.i.h.bf16 %v5167_v55  ;;  %v5168_v10 = vunpack.i.l.bf16 %v5167_v55 }
 0x23e   : > { %v5224_v27 = vunpack.i.h.bf16 %v6757_v62  ;;  %v5223_v18 = vunpack.i.l.bf16 %v6757_v62 }
 0x23f   : > { %v2115_v28 = vsel %vm2111_vm5, %v8113_v30, %v5169_v36  ;;  %v2114_v17 = vsel %vm2111_vm5, %v8114_v51, %v5168_v10  ;;  %v2162_v36 = vsel %vm2117_vm6, %v2157_v31, %v5154_v58  ;;  %v5159_v58 = vunpack.i.h.bf16 %v6750_v50 }
 0x240   : > { %v5172_v6 = vpop.permute.xlu0 %5171  ;;  %v2167_v4 = vsel %vm2123_vm7, %v2162_v36, %v5224_v27  ;;  %v5158_v31 = vunpack.i.l.bf16 %v6750_v50 }
 0x241   : > { %v5174_v59 = vunpack.i.h.bf16 %v5172_v6  ;;  %v5173_v56 = vunpack.i.l.bf16 %v5172_v6  ;;  %v5232_v49 = vpop.permute.xlu1 %5231 }
 0x242   : > { %v5234_v14 = vunpack.i.h.bf16 %v5232_v49  ;;  %v5233_v32 = vunpack.i.l.bf16 %v5232_v49 }
 0x243   : > { %v2160_v60 = vsel %vm2117_vm6, %v2155_v48, %v5173_v56  ;;  %v2161_v26 = vsel %vm2117_vm6, %v2156_v34, %v5174_v59 }
 0x244   : > { %v5177_v21 = vpop.permute.xlu0 %5176 }
 0x245   : > { %v5179_v35 = vunpack.i.h.bf16 %v5177_v21  ;;  %v5178_v57 = vunpack.i.l.bf16 %v5177_v21  ;;  %v5237_v21 = vpop.permute.xlu1 %5236 }
 0x246   : > { %v5239_v56 = vunpack.i.h.bf16 %v5237_v21 }
 0x247   : > { %v2120_v54 = vsel %vm2117_vm6, %v2114_v17, %v5178_v57  ;;  %v2121_v11 = vsel %vm2117_vm6, %v2115_v28, %v5179_v35  ;;  %v2172_v17 = vsel %vm2129_vm8, %v2167_v4, %v5159_v58 }
 0x248   : > { %v5182_v25 = vpop.permute.xlu0 %5181 }
 0x249   : > { %v5184_v63 = vunpack.i.h.bf16 %v5182_v25  ;;  %v5183_v39 = vunpack.i.l.bf16 %v5182_v25  ;;  %v5242_v48 = vpop.permute.xlu1 %5241 }
 0x24a   : > { %v5243_v50 = vunpack.i.l.bf16 %v5242_v48 }
 0x24b   : > { %v2165_v38 = vsel %vm2123_vm7, %v2160_v60, %v5183_v39  ;;  %v2166_v22 = vsel %vm2123_vm7, %v2161_v26, %v5184_v63  ;;  %v5238_v63 = vunpack.i.l.bf16 %v5237_v21  ;;  %v5244_v26 = vunpack.i.h.bf16 %v5242_v48 }
 0x24c   : > { %v5187_v5 = vpop.permute.xlu0 %5186 }
 0x24d   : > { %v5189_v7 = vunpack.i.h.bf16 %v5187_v5  ;;  %v5188_v16 = vunpack.i.l.bf16 %v5187_v5 }
 0x24f   : > { %v2126_v55 = vsel %vm2123_vm7, %v2120_v54, %v5188_v16  ;;  %v2127_v1 = vsel %vm2123_vm7, %v2121_v11, %v5189_v7 }
 0x250   : > { %v5192_v46 = vpop.permute.xlu0 %5191 }
 0x251   : > { %v5194_v15 = vunpack.i.h.bf16 %v5192_v46  ;;  %v5193_v2 = vunpack.i.l.bf16 %v5192_v46 }
 0x253   : > { %v2170_v23 = vsel %vm2129_vm8, %v2165_v38, %v5193_v2  ;;  %v2171_v3 = vsel %vm2129_vm8, %v2166_v22, %v5194_v15 }
 0x254   : > { %v5202_v8 = vpop.permute.xlu0 %5201  ;;  %v2175_v6 = vsel %vm2135_vm9, %v2170_v23, %v5208_v33  ;;  %v2176_v40 = vsel %vm2135_vm9, %v2171_v3, %v5209_v43  ;;  %v2128_v33 = vsel %vm2123_vm7, %v2122_v52, %v5223_v18 }
 0x255   : > { %v5204_v53 = vunpack.i.h.bf16 %v5202_v8  ;;  %v5203_v0 = vunpack.i.l.bf16 %v5202_v8  ;;  %v2134_v51 = vsel %vm2129_vm8, %v2128_v33, %v5158_v31 }
 0x257   : > { %v2132_v25 = vsel %vm2129_vm8, %v2126_v55, %v5203_v0  ;;  %v2133_v44 = vsel %vm2129_vm8, %v2127_v1, %v5204_v53  ;;  %v2194_v0 = vld [vmem:[%s8037_s1] sm:$0x3] }
 0x258   : > { %v5217_v24 = vpop.permute.xlu0 %5216  ;;  %v2138_v39 = vsel %vm2135_vm9, %v2132_v25, %v5213_v37  ;;  %v2139_v43 = vsel %vm2135_vm9, %v2133_v44, %v5214_v45 }
 0x259   : > { %v5219_v19 = vunpack.i.h.bf16 %v5217_v24  ;;  %v5218_v29 = vunpack.i.l.bf16 %v5217_v24 }
 0x25b   : > { %v2180_v5 = vsel %vm2141_vm10, %v2175_v6, %v5218_v29  ;;  %v2181_v20 = vsel %vm2141_vm10, %v2176_v40, %v5219_v19 }
 0x25c   : > { %v5227_v62 = vpop.permute.xlu0 %5226  ;;  %v2185_v13 = vsel %vm2147_vm11, %v2180_v5, %v5233_v32  ;;  %v2186_v41 = vsel %vm2147_vm11, %v2181_v20, %v5234_v14 }
 0x25d   : > { %v5229_v10 = vunpack.i.h.bf16 %v5227_v62  ;;  %v5228_v46 = vunpack.i.l.bf16 %v5227_v62  ;;  %v2191_v59 = vpack.c.bf16 %v2186_v41, %v2185_v13 }
 0x25f   : > { %2208 = vmatprep.subr.bf16.mxu0 %v2191_v59  ;;  %v2144_v15 = vsel %vm2141_vm10, %v2138_v39, %v5228_v46  ;;  %v2145_v2 = vsel %vm2141_vm10, %v2139_v43, %v5229_v10 }
 0x260   : > { %v5247_v12 = vpop.permute.xlu0 %5246  ;;  %v2150_v34 = vsel %vm2147_vm11, %v2144_v15, %v5238_v63  ;;  %v2151_v42 = vsel %vm2147_vm11, %v2145_v2, %v5239_v56 }
 0x261   : > { %v5249_v30 = vunpack.i.h.bf16 %v5247_v12  ;;  %v5248_v28 = vunpack.i.l.bf16 %v5247_v12  ;;  %v2190_v52 = vpack.c.bf16 %v2151_v42, %v2150_v34 }
 0x263   : > { %v2140_v8 = vsel %vm2135_vm9, %v2134_v51, %v5248_v28  ;;  %v2177_v60 = vsel %vm2135_vm9, %v2172_v17, %v5249_v30  ;;  %2209 = vmatpush1.bf16.msra.mxu0 %v2190_v52 }
 0x264   : > { %v5252_v49 = vpop.permute.xlu0 %5251  ;;  %v2182_v38 = vsel %vm2141_vm10, %v2177_v60, %v5244_v26  ;;  %v2146_v22 = vsel %vm2141_vm10, %v2140_v8, %v5243_v50 }
 0x265   : > { %v5254_v35 = vunpack.i.h.bf16 %v5252_v49  ;;  %v5253_v57 = vunpack.i.l.bf16 %v5252_v49 }
 0x267   : > { %v2187_v7 = vsel %vm2147_vm11, %v2182_v38, %v5254_v35  ;;  %v2152_v16 = vsel %vm2147_vm11, %v2146_v22, %v5253_v57 }
 0x268   : > { %v2193_v23 = vpack.c.bf16 %v2187_v7, %v2187_v7  ;;  %v2192_v3 = vpack.c.bf16 %v2152_v16, %v2152_v16 }
 0x26a   : > { %5004 = vmatprep.subr.msk.bf16.mxu0 %vm2199_vm12, %v2193_v23  ;;  %v2201_v53 = vsel %vm2199_vm12, %v2192_v3, 0 }
 0x26b   : > { %2211 = vmatpush1.bf16.msra.mxu0 %v2201_v53 }
 0x26e   : > { %5005 = vmatmul.mubr.msk.bf16.vlgmr.msra.gmra.mrb[0].mxu0 %vm2195_vm13, %v2194_v0 }
 0x341   : > { %v2240_v27 = vpop.f32.mrb[0].mxu0 }
 0x342   : > { %v2248_v18 = vsel %vm2247_vm14, %v2240_v27, 0.0  ;;  %v2255_v14 = vmul.f32 %v2240_v27, %v2240_v27  ;;  %v2242_v32 = vpop.f32.mrb[1].mxu0 }
 0x343   : > { %v2249_v24 = vsel %vm2247_vm14, %v2242_v32, 0.0  ;;  %v2256_v54 = vmul.f32 %v2242_v32, %v2242_v32  ;;  %v2244_v11 = vpop.f32.mrb[2].mxu0 }
 0x344   : > { %v2245_v19 = vpop.f32.mrb[3].mxu0  ;;  %v2250_v29 = vadd.f32 %v2249_v24, %v2248_v18  ;;  %v2257_v55 = vsel %vm2247_vm14, %v2255_v14, 0.0 }
 0x345   : > { %v2258_v1 = vsel %vm2247_vm14, %v2256_v54, 0.0 }
 0x346   : > { %2251 = vadd.xlane.f32.xlu1 %v2250_v29  ;;  %v2259_v6 = vadd.f32 %v2258_v1, %v2257_v55 }
 0x348   : > { %2260 = vadd.xlane.f32.xlu0 %v2259_v6 }
 0x3d3   : > { %v2252_v40 = vpop.xlane.xlu1 %2251 }
 0x3d4   : > { %v2254_v21 = vmul.f32 0.00390625, %v2252_v40 }
 0x3d5   : > { %v2261_v25 = vpop.xlane.xlu0 %2260 }
 0x3d6   : > { %v2262_v44 = vmul.f32 0.00390625, %v2261_v25  ;;  %v2263_v5 = vmul.f32 %v2254_v21, %v2254_v21  ;;  %v2266_v62 = vsub.f32 %v2240_v27, %v2254_v21  ;;  %v2267_v10 = vsub.f32 %v2242_v32, %v2254_v21 }
 0x3d8   : > { %v2264_v20 = vsub.f32 %v2262_v44, %v2263_v5 }
 0x3da   : > { %v2265_v45 = vmax.f32 %v2264_v20, 0.0 }
 0x3dc   : > { %v2268_v37 = vadd.f32 1e-05, %v2265_v45 }
 0x3de   : > { %5430 = vrsqrt.f32 %v2268_v37 }
 0x3e8   : > { %v5431_v13 = vpop.eup %5430 }
 0x3e9   : > { %v2270_v41 = vmul.f32 %v5431_v13, %v2266_v62  ;;  %v2271_v46 = vmul.f32 %v5431_v13, %v2267_v10 }
 0x3eb   : > { %v2272_v36 = vmax.f32 %v2270_v41, 0.0  ;;  %v2273_v59 = vmax.f32 %v2271_v46, 0.0 }
 0x3ed   : > { %2278 = vrot.lane.b32.xlu1 %v2272_v36, %s5554_s26  ;;  %2275 = vrot.lane.b32.xlu0 %v2272_v36, %s5555_s27 }
 0x3f1   : > { %2281 = vrot.lane.b32.xlu1 %v2272_v36, %s5553_s22  ;;  %2284 = vrot.lane.b32.xlu0 %v2272_v36, %s5552_s20 }
 0x3f5   : > { %2287 = vrot.lane.b32.xlu1 %v2272_v36, %s5551_s19  ;;  %2290 = vrot.lane.b32.xlu0 %v2272_v36, %s5550_s17 }
 0x3f9   : > { %2293 = vrot.lane.b32.xlu1 %v2272_v36, %s5549_s8  ;;  %2297 = vrot.lane.b32.xlu0 %v2273_v59, %s5555_s27 }
 0x3fd   : > { %2300 = vrot.lane.b32.xlu1 %v2273_v59, %s5554_s26  ;;  %2303 = vrot.lane.b32.xlu0 %v2273_v59, %s5553_s22 }
 0x401   : > { %2306 = vrot.lane.b32.xlu1 %v2273_v59, %s5552_s20  ;;  %2309 = vrot.lane.b32.xlu0 %v2273_v59, %s5551_s19 }
 0x405   : > { %2312 = vrot.lane.b32.xlu1 %v2273_v59, %s5550_s17  ;;  %2315 = vrot.lane.b32.xlu0 %v2273_v59, %s5549_s8 }
 0x45f   : > { %v2279_v56 = vpop.permute.xlu1 %2278  ;;  %v2276_v63 = vpop.permute.xlu0 %2275 }
 0x460   : > { %v2318_v48 = vcombine.low %v2272_v36, %v2279_v56 }
 0x462   : > { %v2325_v26 = vrot.slane %v2318_v48, %v5769_v9 }
 0x463   : > { %v2282_v39 = vpop.permute.xlu1 %2281  ;;  %v2285_v43 = vpop.permute.xlu0 %2284 }
 0x464   : > { %v2326_v31 = vcombine.low %v2276_v63, %v2282_v39 }
 0x466   : > { %v2333_v51 = vrot.slane %v2326_v31, %v5769_v9 }
 0x467   : > { %v2288_v33 = vpop.permute.xlu1 %2287  ;;  %v2291_v4 = vpop.permute.xlu0 %2290 }
 0x468   : > { %v2334_v12 = vcombine.low %v2285_v43, %v2291_v4  ;;  %v2350_v57 = vcombine.low %v2325_v26, %v2333_v51  ;;  %v2351_v14 = vcombine.high %v2325_v26, %v2333_v51 }
 0x46a   : > { %v2341_v17 = vrot.slane %v2334_v12, %v5769_v9  ;;  %v2358_v32 = vrot.slane %v2350_v57, %v6146_v47  ;;  %v2365_v21 = vrot.slane %v2351_v14, %v6146_v47 }
 0x46b   : > { %v2294_v15 = vpop.permute.xlu1 %2293  ;;  %v2298_v2 = vpop.permute.xlu0 %2297 }
 0x46c   : > { %v2342_v58 = vcombine.low %v2288_v33, %v2294_v15 }
 0x46e   : > { %v2349_v30 = vrot.slane %v2342_v58, %v5769_v9 }
 0x46f   : > { %v2301_v34 = vpop.permute.xlu1 %2300  ;;  %v2304_v42 = vpop.permute.xlu0 %2303 }
 0x470   : > { %v2386_v28 = vcombine.low %v2273_v59, %v2301_v34  ;;  %v2394_v52 = vcombine.low %v2298_v2, %v2304_v42  ;;  %v2366_v50 = vcombine.low %v2341_v17, %v2349_v30  ;;  %v2367_v23 = vcombine.high %v2341_v17, %v2349_v30 }
 0x472   : > { %v2393_v49 = vrot.slane %v2386_v28, %v5769_v9  ;;  %v2401_v35 = vrot.slane %v2394_v52, %v5769_v9  ;;  %v2374_v3 = vrot.slane %v2366_v50, %v6146_v47  ;;  %v2381_v11 = vrot.slane %v2367_v23, %v6146_v47 }
 0x473   : > { %v2307_v8 = vpop.permute.xlu1 %2306  ;;  %v2310_v60 = vpop.permute.xlu0 %2309 }
 0x474   : > { %v2418_v53 = vcombine.low %v2393_v49, %v2401_v35  ;;  %v2419_v0 = vcombine.high %v2393_v49, %v2401_v35  ;;  %v2382_v19 = vcombine.low %v2358_v32, %v2374_v3  ;;  %v2383_v29 = vcombine.high %v2358_v32, %v2374_v3 }
 0x475   : > { %v2384_v45 = vcombine.low %v2365_v21, %v2381_v11  ;;  %v2385_v37 = vcombine.high %v2365_v21, %v2381_v11 }
 0x476   : > { %v2426_v55 = vrot.slane %v2418_v53, %v6146_v47  ;;  %v2433_v1 = vrot.slane %v2419_v0, %v6146_v47  ;;  %v2473_v62 = vrot.slane %v2383_v29, 7  ;;  %v2470_v41 = vrot.slane %v2382_v19, 7 }
 0x477   : > { %v2313_v38 = vpop.permute.xlu1 %2312  ;;  %v2316_v22 = vpop.permute.xlu0 %2315  ;;  %v2479_v63 = vrot.slane %v2385_v37, 7  ;;  %v2476_v39 = vrot.slane %v2384_v45, 7  ;;  %v2458_v15 = vrot.slane %v2382_v19, 1  ;;  %v2459_v12 = vrot.slane %v2383_v29, 1 }
 0x478   : > { %v2402_v7 = vcombine.low %v2307_v8, %v2313_v38  ;;  %v2410_v16 = vcombine.low %v2310_v60, %v2316_v22  ;;  %v2460_v30 = vrot.slane %v2384_v45, 1  ;;  %v2461_v17 = vrot.slane %v2385_v37, 1 }
 0x479   : > { %v2498_v58 = vsel %vm214_vm0, %v2458_v15, %v2470_v41  ;;  %v2499_v42 = vsel %vm214_vm0, %v2459_v12, %v2473_v62 }
 0x47a   : > { %v2409_v27 = vrot.slane %v2402_v7, %v5769_v9  ;;  %v2417_v18 = vrot.slane %v2410_v16, %v5769_v9  ;;  %v2500_v52 = vsel %vm214_vm0, %v2460_v30, %v2476_v39  ;;  %v2501_v60 = vsel %vm214_vm0, %v2461_v17, %v2479_v63 }
 0x47c   : > { %v2434_v24 = vcombine.low %v2409_v27, %v2417_v18  ;;  %v2435_v54 = vcombine.high %v2409_v27, %v2417_v18 }
 0x47e   : > { %v2442_v6 = vrot.slane %v2434_v24, %v6146_v47  ;;  %v2449_v40 = vrot.slane %v2435_v54, %v6146_v47 }
 0x480   : > { %v2450_v25 = vcombine.low %v2426_v55, %v2442_v6  ;;  %v2451_v44 = vcombine.high %v2426_v55, %v2442_v6  ;;  %v2452_v5 = vcombine.low %v2433_v1, %v2449_v40  ;;  %v2453_v20 = vcombine.high %v2433_v1, %v2449_v40 }
 0x482   : > { %v2474_v13 = vrot.slane %v2451_v44, 7  ;;  %v2471_v36 = vrot.slane %v2450_v25, 7  ;;  %v2480_v59 = vrot.slane %v2453_v20, 7  ;;  %v2477_v56 = vrot.slane %v2452_v5, 7 }
 0x483   : > { %v2490_v4 = vrot.slane %v2450_v25, 5  ;;  %v2491_v31 = vrot.slane %v2451_v44, 5  ;;  %v2492_v48 = vrot.slane %v2452_v5, 5  ;;  %v2493_v51 = vrot.slane %v2453_v20, 5 }
 0x484   : > { %v2475_v10 = vsel %vm214_vm0, %v2473_v62, %v2474_v13  ;;  %v2472_v46 = vsel %vm214_vm0, %v2470_v41, %v2471_v36  ;;  %v2481_v43 = vsel %vm214_vm0, %v2479_v63, %v2480_v59  ;;  %v2478_v33 = vsel %vm214_vm0, %v2476_v39, %v2477_v56 }
 0x485   : > { %2522 = vrot.lane.b32.xlu0 %v2475_v10, %s5543_s23  ;;  %2516 = vrot.lane.b32.xlu1 %v2472_v46, %s5543_s23  ;;  %v2502_v2 = vsel %vm214_vm0, %v2471_v36, %v2490_v4  ;;  %v2503_v34 = vsel %vm214_vm0, %v2474_v13, %v2491_v31  ;;  %v2504_v28 = vsel %vm214_vm0, %v2477_v56, %v2492_v48 }
 0x486   : > { %v2505_v8 = vsel %vm214_vm0, %v2480_v59, %v2493_v51 }
 0x489   : > { %2534 = vrot.lane.b32.xlu0 %v2481_v43, %s5543_s23  ;;  %2528 = vrot.lane.b32.xlu1 %v2478_v33, %s5543_s23 }
 0x48d   : > { %2558 = vrot.lane.b32.xlu0 %v2475_v10, %s5544_s4  ;;  %2552 = vrot.lane.b32.xlu1 %v2472_v46, %s5544_s4 }
 0x491   : > { %2570 = vrot.lane.b32.xlu0 %v2481_v43, %s5544_s4  ;;  %2564 = vrot.lane.b32.xlu1 %v2478_v33, %s5544_s4 }
 0x495   : > { %2518 = vrot.lane.b32.xlu0 %v2502_v2, %s5543_s23  ;;  %2514 = vrot.lane.b32.xlu1 %v2498_v58, %s5543_s23 }
 0x499   : > { %2524 = vrot.lane.b32.xlu0 %v2503_v34, %s5543_s23  ;;  %2520 = vrot.lane.b32.xlu1 %v2499_v42, %s5543_s23 }
 0x49d   : > { %2530 = vrot.lane.b32.xlu0 %v2504_v28, %s5543_s23  ;;  %2526 = vrot.lane.b32.xlu1 %v2500_v52, %s5543_s23 }
 0x4a1   : > { %2536 = vrot.lane.b32.xlu0 %v2505_v8, %s5543_s23  ;;  %2532 = vrot.lane.b32.xlu1 %v2501_v60, %s5543_s23 }
 0x4a5   : > { %2554 = vrot.lane.b32.xlu0 %v2502_v2, %s5544_s4  ;;  %2550 = vrot.lane.b32.xlu1 %v2498_v58, %s5544_s4 }
 0x4a9   : > { %2560 = vrot.lane.b32.xlu0 %v2503_v34, %s5544_s4  ;;  %2556 = vrot.lane.b32.xlu1 %v2499_v42, %s5544_s4 }
 0x4ad   : > { %2566 = vrot.lane.b32.xlu0 %v2504_v28, %s5544_s4  ;;  %2562 = vrot.lane.b32.xlu1 %v2500_v52, %s5544_s4 }
 0x4b1   : > { %2572 = vrot.lane.b32.xlu0 %v2505_v8, %s5544_s4  ;;  %2568 = vrot.lane.b32.xlu1 %v2501_v60, %s5544_s4 }
 0x4b5   : > { %2594 = vrot.lane.b32.xlu0 %v2475_v10, %s5545_s6  ;;  %2588 = vrot.lane.b32.xlu1 %v2472_v46, %s5545_s6 }
 0x4b9   : > { %2606 = vrot.lane.b32.xlu0 %v2481_v43, %s5545_s6  ;;  %2600 = vrot.lane.b32.xlu1 %v2478_v33, %s5545_s6 }
 0x4bd   : > { %2590 = vrot.lane.b32.xlu0 %v2502_v2, %s5545_s6  ;;  %2586 = vrot.lane.b32.xlu1 %v2498_v58, %s5545_s6 }
 0x4c1   : > { %2596 = vrot.lane.b32.xlu0 %v2503_v34, %s5545_s6  ;;  %2592 = vrot.lane.b32.xlu1 %v2499_v42, %s5545_s6 }
 0x4c5   : > { %2602 = vrot.lane.b32.xlu0 %v2504_v28, %s5545_s6  ;;  %2598 = vrot.lane.b32.xlu1 %v2500_v52, %s5545_s6 }
 0x4c9   : > { %2608 = vrot.lane.b32.xlu0 %v2505_v8, %s5545_s6  ;;  %2604 = vrot.lane.b32.xlu1 %v2501_v60, %s5545_s6 }
 0x4f7   : > { %v2523_v26 = vpop.permute.xlu0 %2522  ;;  %v2517_v50 = vpop.permute.xlu1 %2516 }
 0x4fb   : > { %v2535_v49 = vpop.permute.xlu0 %2534  ;;  %v2529_v35 = vpop.permute.xlu1 %2528 }
 0x4ff   : > { %v2559_v57 = vpop.permute.xlu0 %2558  ;;  %v2553_v38 = vpop.permute.xlu1 %2552 }
 0x500   : > { %v2626_v6 = vsel %vm367_vm1, %v2523_v26, %v2559_v57  ;;  %v2623_v40 = vsel %vm367_vm1, %v2517_v50, %v2553_v38 }
 0x503   : > { %v2571_v22 = vpop.permute.xlu0 %2570  ;;  %v2565_v7 = vpop.permute.xlu1 %2564 }
 0x504   : > { %v2632_v20 = vsel %vm367_vm1, %v2535_v49, %v2571_v22  ;;  %v2629_v45 = vsel %vm367_vm1, %v2529_v35, %v2565_v7 }
 0x507   : > { %v2519_v16 = vpop.permute.xlu0 %2518  ;;  %v2515_v23 = vpop.permute.xlu1 %2514 }
 0x50b   : > { %v2525_v3 = vpop.permute.xlu0 %2524  ;;  %v2521_v53 = vpop.permute.xlu1 %2520 }
 0x50f   : > { %v2531_v0 = vpop.permute.xlu0 %2530  ;;  %v2527_v27 = vpop.permute.xlu1 %2526 }
 0x513   : > { %v2537_v18 = vpop.permute.xlu0 %2536  ;;  %v2533_v14 = vpop.permute.xlu1 %2532 }
 0x517   : > { %v2555_v32 = vpop.permute.xlu0 %2554  ;;  %v2551_v24 = vpop.permute.xlu1 %2550 }
 0x518   : > { %v2624_v15 = vsel %vm367_vm1, %v2519_v16, %v2555_v32  ;;  %v2622_v2 = vsel %vm367_vm1, %v2515_v23, %v2551_v24 }
 0x51b   : > { %v2561_v54 = vpop.permute.xlu0 %2560  ;;  %v2557_v11 = vpop.permute.xlu1 %2556 }
 0x51c   : > { %v2627_v58 = vsel %vm367_vm1, %v2525_v3, %v2561_v54  ;;  %v2625_v31 = vsel %vm367_vm1, %v2521_v53, %v2557_v11 }
 0x51f   : > { %v2567_v19 = vpop.permute.xlu0 %2566  ;;  %v2563_v29 = vpop.permute.xlu1 %2562 }
 0x520   : > { %v2630_v12 = vsel %vm367_vm1, %v2531_v0, %v2567_v19  ;;  %v2628_v34 = vsel %vm367_vm1, %v2527_v27, %v2563_v29 }
 0x523   : > { %v2573_v55 = vpop.permute.xlu0 %2572  ;;  %v2569_v1 = vpop.permute.xlu1 %2568 }
 0x524   : > { %v2633_v51 = vsel %vm367_vm1, %v2537_v18, %v2573_v55  ;;  %v2631_v17 = vsel %vm367_vm1, %v2533_v14, %v2569_v1 }
 0x527   : > { %v2595_v21 = vpop.permute.xlu0 %2594  ;;  %v2589_v25 = vpop.permute.xlu1 %2588 }
 0x528   : > { %v6911_v44 = vsel %vm380_vm2, %v2626_v6, %v2595_v21  ;;  %v6914_v5 = vsel %vm380_vm2, %v2623_v40, %v2589_v25 }
 0x529   : > { %2660 = vrot.lane.b32.xlu0 %v6911_v44, %s5543_s23  ;;  %2656 = vrot.lane.b32.xlu1 %v6914_v5, %s5543_s23  ;;  %v2707_v50 = vrot.slane %v6914_v5, 1  ;;  %v2712_v22 = vrot.slane %v6911_v44, 1  ;;  %v2783_v16 = vrot.slane %v6914_v5, 2  ;;  %v2788_v23 = vrot.slane %v6911_v44, 2 }
 0x52b   : > { %v2607_v37 = vpop.permute.xlu0 %2606  ;;  %v2601_v62 = vpop.permute.xlu1 %2600 }
 0x52c   : > { %v6923_v13 = vsel %vm380_vm2, %v2632_v20, %v2607_v37  ;;  %v6926_v41 = vsel %vm380_vm2, %v2629_v45, %v2601_v62 }
 0x52d   : > { %v3486_v36 = vcombine.low %v6911_v44, %v6923_v13  ;;  %v3487_v10 = vcombine.high %v6911_v44, %v6923_v13  ;;  %v3470_v46 = vcombine.low %v6914_v5, %v6926_v41  ;;  %v3471_v59 = vcombine.high %v6914_v5, %v6926_v41  ;;  %2668 = vrot.lane.b32.xlu0 %v6923_v13, %s5543_s23 }
 0x52e   : > { %2664 = vrot.lane.b32.xlu1 %v6926_v41, %s5543_s23  ;;  %v2717_v7 = vrot.slane %v6926_v41, 1  ;;  %v2722_v0 = vrot.slane %v6923_v13, 1  ;;  %v2793_v32 = vrot.slane %v6926_v41, 2  ;;  %v2798_v24 = vrot.slane %v6923_v13, 2 }
 0x52f   : > { %v6941_v56 = vrot.slane %v3486_v36, %v5769_v9  ;;  %v6944_v63 = vrot.slane %v3487_v10, %v5769_v9  ;;  %v6947_v39 = vrot.slane %v3470_v46, %v5769_v9  ;;  %v6950_v43 = vrot.slane %v3471_v59, %v5769_v9  ;;  %v2591_v33 = vpop.permute.xlu0 %2590  ;;  %v2587_v4 = vpop.permute.xlu1 %2586 }
 0x530   : > { %v2636_v42 = vsel %vm380_vm2, %v2624_v15, %v2591_v33  ;;  %v6974_v8 = vsel %vm380_vm2, %v2622_v2, %v2587_v4 }
 0x531   : > { %2684 = vrot.lane.b32.xlu0 %v6911_v44, %s5547_s7  ;;  %v3534_v48 = vcombine.low %v6947_v39, %v6941_v56  ;;  %v3535_v30 = vcombine.high %v6947_v39, %v6941_v56  ;;  %v3550_v28 = vcombine.low %v6950_v43, %v6944_v63  ;;  %v3551_v52 = vcombine.high %v6950_v43, %v6944_v63 }
 0x532   : > { %2680 = vrot.lane.b32.xlu1 %v6914_v5, %s5547_s7  ;;  %v2709_v49 = vrot.slane %v2636_v42, 1  ;;  %v2785_v35 = vrot.slane %v2636_v42, 2  ;;  %v2706_v27 = vrot.slane %v6974_v8, 1  ;;  %v2782_v11 = vrot.slane %v6974_v8, 2 }
 0x533   : > { %v2597_v60 = vpop.permute.xlu0 %2596  ;;  %v2593_v26 = vpop.permute.xlu1 %2592  ;;  %v7292_v56 = vrot.slane %v3551_v52, %v6146_v47 }
 0x534   : > { %v2639_v57 = vsel %vm380_vm2, %v2627_v58, %v2597_v60  ;;  %v6979_v38 = vsel %vm380_vm2, %v2625_v31, %v2593_v26  ;;  %v7000_v55 = vsel %vm453_vm3, %v2707_v50, %v2709_v49  ;;  %v7005_v1 = vsel %vm530_vm4, %v2783_v16, %v2785_v35 }
 0x535   : > { %2692 = vrot.lane.b32.xlu0 %v6923_v13, %s5547_s7  ;;  %v2714_v3 = vrot.slane %v2639_v57, 1  ;;  %v2790_v53 = vrot.slane %v2639_v57, 2  ;;  %v2711_v54 = vrot.slane %v6979_v38, 1  ;;  %v7024_v37 = vsel %vm453_vm3, %v2706_v27, %v2707_v50 }
 0x536   : > { %2688 = vrot.lane.b32.xlu1 %v6926_v41, %s5547_s7  ;;  %v2787_v62 = vrot.slane %v6979_v38, 2 }
 0x537   : > { %v2603_v18 = vpop.permute.xlu0 %2602  ;;  %v2599_v14 = vpop.permute.xlu1 %2598  ;;  %v7016_v20 = vsel %vm453_vm3, %v2712_v22, %v2714_v3  ;;  %v7021_v45 = vsel %vm530_vm4, %v2788_v23, %v2790_v53  ;;  %v7034_v59 = vsel %vm453_vm3, %v2711_v54, %v2712_v22 }
 0x538   : > { %v2642_v19 = vsel %vm380_vm2, %v2630_v12, %v2603_v18  ;;  %v6997_v29 = vsel %vm380_vm2, %v2628_v34, %v2599_v14 }
 0x539   : > { %v2719_v6 = vrot.slane %v2642_v19, 1  ;;  %v2795_v40 = vrot.slane %v2642_v19, 2  ;;  %v2858_v21 = vcombine.low %v6974_v8, %v6997_v29  ;;  %v2859_v25 = vcombine.high %v6974_v8, %v6997_v29  ;;  %2658 = vrot.lane.b32.xlu0 %v6979_v38, %s5543_s23 }
 0x53a   : > { %2654 = vrot.lane.b32.xlu1 %v6974_v8, %s5543_s23  ;;  %v2716_v33 = vrot.slane %v6997_v29, 1  ;;  %v2792_v26 = vrot.slane %v6997_v29, 2 }
 0x53b   : > { %v2609_v41 = vpop.permute.xlu0 %2608  ;;  %v2605_v36 = vpop.permute.xlu1 %2604  ;;  %v7028_v10 = vsel %vm453_vm3, %v2717_v7, %v2719_v6  ;;  %v7031_v46 = vsel %vm530_vm4, %v2793_v32, %v2795_v40 }
 0x53c   : > { %v2645_v4 = vsel %vm380_vm2, %v2633_v51, %v2609_v41  ;;  %v2643_v15 = vsel %vm380_vm2, %v2631_v17, %v2605_v36  ;;  %v3638_v2 = vcombine.low %v7000_v55, %v7028_v10  ;;  %v3639_v58 = vcombine.high %v7000_v55, %v7028_v10 }
 0x53d   : > { %v2724_v31 = vrot.slane %v2645_v4, 1  ;;  %v2800_v12 = vrot.slane %v2645_v4, 2  ;;  %v2874_v34 = vcombine.low %v6979_v38, %v2643_v15  ;;  %v2875_v42 = vcombine.high %v6979_v38, %v2643_v15  ;;  %2666 = vrot.lane.b32.xlu0 %v2643_v15, %s5543_s23 }
 0x53e   : > { %2662 = vrot.lane.b32.xlu1 %v6997_v29, %s5543_s23  ;;  %v7049_v51 = vrot.slane %v3638_v2, %v5769_v9  ;;  %v3878_v17 = vcombine.low %v7005_v1, %v7031_v46  ;;  %v3879_v60 = vcombine.high %v7005_v1, %v7031_v46  ;;  %v7060_v49 = vrot.slane %v3639_v58, %v5769_v9 }
 0x53f   : > { %v7057_v50 = vrot.slane %v2874_v34, %v5769_v9  ;;  %v7065_v35 = vsel %vm453_vm3, %v2722_v0, %v2724_v31  ;;  %v7070_v57 = vsel %vm530_vm4, %v2798_v24, %v2800_v12  ;;  %v7089_v54 = vsel %vm453_vm3, %v2716_v33, %v2717_v7 }
 0x540   : > { %v3654_v22 = vcombine.low %v7016_v20, %v7065_v35  ;;  %v3655_v3 = vcombine.high %v7016_v20, %v7065_v35  ;;  %v7077_v53 = vrot.slane %v3878_v17, %v5769_v9  ;;  %v7080_v27 = vrot.slane %v3879_v60, %v5769_v9 }
 0x541   : > { %2682 = vrot.lane.b32.xlu0 %v6979_v38, %s5547_s7  ;;  %v3894_v18 = vcombine.low %v7021_v45, %v7070_v57  ;;  %v3895_v14 = vcombine.high %v7021_v45, %v7070_v57  ;;  %v2721_v19 = vrot.slane %v2643_v15, 1  ;;  %v3026_v41 = vcombine.low %v7024_v37, %v7089_v54 }
 0x542   : > { %2678 = vrot.lane.b32.xlu1 %v6974_v8, %s5547_s7  ;;  %v7094_v6 = vrot.slane %v3654_v22, %v5769_v9  ;;  %v7097_v40 = vrot.slane %v3655_v3, %v5769_v9  ;;  %v3027_v36 = vcombine.high %v7024_v37, %v7089_v54  ;;  %v7113_v2 = vsel %vm530_vm4, %v2792_v26, %v2793_v32 }
 0x543   : > { %v7104_v4 = vrot.slane %v3894_v18, %v5769_v9  ;;  %v7107_v7 = vrot.slane %v3895_v14, %v5769_v9  ;;  %v2723_v33 = vsel %vm453_vm3, %v2721_v19, %v2722_v0  ;;  %v7133_v26 = vrot.slane %v2858_v21, %v5769_v9 }
 0x544   : > { %v3702_v58 = vcombine.low %v7049_v51, %v7094_v6  ;;  %v3703_v31 = vcombine.high %v7049_v51, %v7094_v6  ;;  %v3718_v12 = vcombine.low %v7060_v49, %v7097_v40  ;;  %v3719_v34 = vcombine.high %v7060_v49, %v7097_v40 }
 0x545   : > { %2690 = vrot.lane.b32.xlu0 %v2643_v15, %s5547_s7  ;;  %v3042_v22 = vcombine.low %v7034_v59, %v2723_v33  ;;  %v3043_v3 = vcombine.high %v7034_v59, %v2723_v33  ;;  %v2784_v18 = vsel %vm530_vm4, %v2782_v11, %v2783_v16  ;;  %v7145_v14 = vrot.slane %v2875_v42, %v5769_v9 }
 0x546   : > { %2686 = vrot.lane.b32.xlu1 %v6997_v29, %s5547_s7  ;;  %v3266_v19 = vcombine.low %v2784_v18, %v7113_v2  ;;  %v3267_v21 = vcombine.high %v2784_v18, %v7113_v2  ;;  %v2797_v61 = vrot.slane %v2643_v15, 2  ;;  %v7150_v60 = vrot.slane %v3026_v41, %v5769_v9 }
 0x547   : > { %v7153_v32 = vrot.slane %v3027_v36, %v5769_v9  ;;  %v7156_v5 = vrot.slane %v3042_v22, %v5769_v9  ;;  %v7159_v17 = vrot.slane %v3043_v3, %v5769_v9  ;;  %v7165_v16 = vrot.slane %v2859_v25, %v5769_v9 }
 0x548   : > { %v2789_v11 = vsel %vm530_vm4, %v2787_v62, %v2788_v23  ;;  %v2799_v15 = vsel %vm530_vm4, %v2797_v61, %v2798_v24  ;;  %v2922_v42 = vcombine.low %v7133_v26, %v7057_v50  ;;  %v2923_v24 = vcombine.high %v7133_v26, %v7057_v50 }
 0x549   : > { %2740 = vrot.lane.b32.xlu0 %v7016_v20, %s5543_s23  ;;  %v3090_v8 = vcombine.low %v7150_v60, %v7156_v5  ;;  %v3091_v44 = vcombine.high %v7150_v60, %v7156_v5  ;;  %v3106_v38 = vcombine.low %v7153_v32, %v7159_v17  ;;  %v3282_v23 = vcombine.low %v2789_v11, %v2799_v15 }
 0x54a   : > { %2736 = vrot.lane.b32.xlu1 %v7000_v55, %s5543_s23  ;;  %v3283_v61 = vcombine.high %v2789_v11, %v2799_v15  ;;  %v7196_v25 = vrot.slane %v3266_v19, %v5769_v9  ;;  %v7199_v62 = vrot.slane %v3267_v21, %v5769_v9  ;;  %v7304_v63 = vrot.slane %v3702_v58, %v6146_v47 }
 0x54b   : > { %v7202_v41 = vrot.slane %v3282_v23, %v5769_v9  ;;  %v3717_v43 = vrot.slane %v3703_v31, %v6146_v47  ;;  %v3114_v60 = vrot.slane %v3106_v38, %v6146_v47 }
 0x54c   : > { %v7205_v36 = vrot.slane %v3283_v61, %v5769_v9 }
 0x54d   : > { %2748 = vrot.lane.b32.xlu0 %v7065_v35, %s5543_s23 }
 0x54e   : > { %2744 = vrot.lane.b32.xlu1 %v7028_v10, %s5543_s23 }
 0x551   : > { %2764 = vrot.lane.b32.xlu0 %v7016_v20, %s5547_s7 }
 0x552   : > { %2760 = vrot.lane.b32.xlu1 %v7000_v55, %s5547_s7 }
 0x555   : > { %2772 = vrot.lane.b32.xlu0 %v7065_v35, %s5547_s7 }
 0x556   : > { %2768 = vrot.lane.b32.xlu1 %v7028_v10, %s5547_s7 }
 0x559   : > { %2816 = vrot.lane.b32.xlu0 %v7021_v45, %s5543_s23 }
 0x55a   : > { %2812 = vrot.lane.b32.xlu1 %v7005_v1, %s5543_s23 }
 0x55d   : > { %2824 = vrot.lane.b32.xlu0 %v7070_v57, %s5543_s23 }
 0x55e   : > { %2820 = vrot.lane.b32.xlu1 %v7031_v46, %s5543_s23 }
 0x561   : > { %2738 = vrot.lane.b32.xlu0 %v7034_v59, %s5543_s23 }
 0x562   : > { %2734 = vrot.lane.b32.xlu1 %v7024_v37, %s5543_s23 }
 0x565   : > { %2746 = vrot.lane.b32.xlu0 %v2723_v33, %s5543_s23 }
 0x566   : > { %2742 = vrot.lane.b32.xlu1 %v7089_v54, %s5543_s23 }
 0x569   : > { %2762 = vrot.lane.b32.xlu0 %v7034_v59, %s5547_s7 }
 0x56a   : > { %2758 = vrot.lane.b32.xlu1 %v7024_v37, %s5547_s7 }
 0x56d   : > { %2770 = vrot.lane.b32.xlu0 %v2723_v33, %s5547_s7 }
 0x56e   : > { %2766 = vrot.lane.b32.xlu1 %v7089_v54, %s5547_s7 }
 0x571   : > { %2814 = vrot.lane.b32.xlu0 %v2789_v11, %s5543_s23 }
 0x572   : > { %2810 = vrot.lane.b32.xlu1 %v2784_v18, %s5543_s23 }
 0x575   : > { %2822 = vrot.lane.b32.xlu0 %v2799_v15, %s5543_s23 }
 0x576   : > { %2818 = vrot.lane.b32.xlu1 %v7113_v2, %s5543_s23 }
 0x579   : > { %2836 = vrot.lane.b32.xlu0 %v7005_v1, %s5547_s7 }
 0x57a   : > { %2834 = vrot.lane.b32.xlu1 %v2784_v18, %s5547_s7 }
 0x57d   : > { %2840 = vrot.lane.b32.xlu0 %v7021_v45, %s5547_s7 }
 0x57e   : > { %2838 = vrot.lane.b32.xlu1 %v2789_v11, %s5547_s7 }
 0x581   : > { %2844 = vrot.lane.b32.xlu0 %v7031_v46, %s5547_s7 }
 0x582   : > { %2842 = vrot.lane.b32.xlu1 %v7113_v2, %s5547_s7 }
 0x585   : > { %2848 = vrot.lane.b32.xlu0 %v7070_v57, %s5547_s7 }
 0x586   : > { %2846 = vrot.lane.b32.xlu1 %v2799_v15, %s5547_s7 }
 0x59b   : > { %v2661_v55 = vpop.permute.xlu0 %2660  ;;  %v2657_v1 = vpop.permute.xlu1 %2656 }
 0x59f   : > { %v2669_v20 = vpop.permute.xlu0 %2668 }
 0x5a0   : > { %v3518_v37 = vcombine.low %v2661_v55, %v2669_v20  ;;  %v3519_v10 = vcombine.high %v2661_v55, %v2669_v20  ;;  %v2665_v59 = vpop.permute.xlu1 %2664  ;;  %v7275_v55 = vrot.slane %v3534_v48, %v6146_v47  ;;  %v3558_v48 = vrot.slane %v3550_v28, %v6146_v47 }
 0x5a1   : > { %v3502_v45 = vcombine.low %v2657_v1, %v2665_v59  ;;  %v3503_v35 = vcombine.high %v2657_v1, %v2665_v59  ;;  %v3549_v1 = vrot.slane %v3535_v30, %v6146_v47 }
 0x5a2   : > { %v3526_v54 = vrot.slane %v3518_v37, %v5769_v9  ;;  %v3533_v46 = vrot.slane %v3519_v10, %v5769_v9 }
 0x5a3   : > { %v3510_v33 = vrot.slane %v3502_v45, %v5769_v9  ;;  %v3517_v2 = vrot.slane %v3503_v35, %v5769_v9  ;;  %v2685_v18 = vpop.permute.xlu0 %2684 }
 0x5a4   : > { %v2681_v57 = vpop.permute.xlu1 %2680 }
 0x5a5   : > { %v3566_v11 = vcombine.low %v3510_v33, %v3526_v54  ;;  %v3567_v15 = vcombine.high %v3510_v33, %v3526_v54  ;;  %v3582_v61 = vcombine.low %v3517_v2, %v3533_v46  ;;  %v3583_v37 = vcombine.high %v3517_v2, %v3533_v46 }
 0x5a7   : > { %v2693_v23 = vpop.permute.xlu0 %2692  ;;  %v7282_v20 = vrot.slane %v3566_v11, %v6146_v47  ;;  %v3581_v39 = vrot.slane %v3567_v15, %v6146_v47  ;;  %v3590_v30 = vrot.slane %v3582_v61, %v6146_v47  ;;  %v3597_v28 = vrot.slane %v3583_v37, %v6146_v47 }
 0x5a8   : > { %v3622_v10 = vcombine.low %v2685_v18, %v2693_v23  ;;  %v3623_v59 = vcombine.high %v2685_v18, %v2693_v23  ;;  %v2689_v45 = vpop.permute.xlu1 %2688  ;;  %v3733_v11 = vrot.slane %v3719_v34, %v6146_v47 }
 0x5a9   : > { %v3606_v35 = vcombine.low %v2681_v57, %v2689_v45  ;;  %v3607_v54 = vcombine.high %v2681_v57, %v2689_v45  ;;  %v3726_v57 = vrot.slane %v3718_v12, %v6146_v47  ;;  %v3599_v31 = vcombine.high %v7275_v55, %v7282_v20 }
 0x5aa   : > { %v3630_v23 = vrot.slane %v3622_v10, %v5769_v9  ;;  %v3637_v46 = vrot.slane %v3623_v59, %v5769_v9  ;;  %v3600_v37 = vcombine.low %v3549_v1, %v3581_v39  ;;  %v3601_v10 = vcombine.high %v3549_v1, %v3581_v39 }
 0x5ab   : > { %v3614_v33 = vrot.slane %v3606_v35, %v5769_v9  ;;  %v3621_v2 = vrot.slane %v3607_v54, %v5769_v9  ;;  %v2659_v18 = vpop.permute.xlu0 %2658  ;;  %v3602_v59 = vcombine.low %v3558_v48, %v3590_v30  ;;  %v3603_v34 = vcombine.high %v3558_v48, %v3590_v30 }
 0x5ac   : > { %v2655_v52 = vpop.permute.xlu1 %2654 }
 0x5ad   : > { %v3670_v15 = vcombine.low %v3614_v33, %v3630_v23  ;;  %v3671_v61 = vcombine.high %v3614_v33, %v3630_v23  ;;  %v3686_v51 = vcombine.low %v3621_v2, %v3637_v46  ;;  %v3687_v6 = vcombine.high %v3621_v2, %v3637_v46 }
 0x5ae   : > { %v3604_v33 = vcombine.low %v7292_v56, %v3597_v28 }
 0x5af   : > { %v7324_v12 = vrot.slane %v3670_v15, %v6146_v47  ;;  %v3685_v45 = vrot.slane %v3671_v61, %v6146_v47  ;;  %v3694_v49 = vrot.slane %v3686_v51, %v6146_v47  ;;  %v2667_v40 = vpop.permute.xlu0 %2666  ;;  %v3701_v35 = vrot.slane %v3687_v6, %v6146_v47 }
 0x5b0   : > { %v2906_v54 = vcombine.low %v2659_v18, %v2667_v40  ;;  %v2907_v23 = vcombine.high %v2659_v18, %v2667_v40  ;;  %v2663_v46 = vpop.permute.xlu1 %2662 }
 0x5b1   : > { %v2890_v2 = vcombine.low %v2655_v52, %v2663_v46  ;;  %v2891_v58 = vcombine.high %v2655_v52, %v2663_v46  ;;  %v3735_v1 = vcombine.high %v7324_v12, %v7304_v63  ;;  %v3736_v39 = vcombine.low %v3685_v45, %v3717_v43 }
 0x5b2   : > { %v2914_v15 = vrot.slane %v2906_v54, %v5769_v9  ;;  %v2921_v61 = vrot.slane %v2907_v23, %v5769_v9  ;;  %v3737_v51 = vcombine.high %v3685_v45, %v3717_v43  ;;  %v3738_v19 = vcombine.low %v3694_v49, %v3726_v57 }
 0x5b3   : > { %v2898_v48 = vrot.slane %v2890_v2, %v5769_v9  ;;  %v2905_v30 = vrot.slane %v2891_v58, %v5769_v9  ;;  %v2683_v18 = vpop.permute.xlu0 %2682  ;;  %v5255_v6 = vpack.i.bf16 %v3735_v1, %v3599_v31  ;;  %v5265_v40 = vpack.i.bf16 %v3736_v39, %v3600_v37 }
 0x5b4   : > { %v2679_v21 = vpop.permute.xlu1 %2678  ;;  %v5275_v3 = vpack.i.bf16 %v3737_v51, %v3601_v10  ;;  %v5285_v52 = vpack.i.bf16 %v3738_v19, %v3602_v59  ;;  %v3739_v46 = vcombine.high %v3694_v49, %v3726_v57  ;;  %v3740_v0 = vcombine.low %v3701_v35, %v3733_v11 }
 0x5b5   : > { %v2954_v13 = vcombine.low %v2898_v48, %v2914_v15  ;;  %v2955_v22 = vcombine.high %v2898_v48, %v2914_v15  ;;  %v2970_v29 = vcombine.low %v2905_v30, %v2921_v61  ;;  %5256 = vrot.lane.b32.xlu1 %v5255_v6, %s5549_s8  ;;  %v3605_v43 = vcombine.high %v7292_v56, %v3597_v28 }
 0x5b6   : > { %v7338_v45 = vpack.i.bf16 %v3739_v46, %v3603_v34  ;;  %v7340_v54 = vpack.i.bf16 %v3740_v0, %v3604_v33  ;;  %v3741_v58 = vcombine.high %v3701_v35, %v3733_v11  ;;  %v2971_v37 = vcombine.high %v2905_v30, %v2921_v61 }
 0x5b7   : > { %v2691_v10 = vpop.permute.xlu0 %2690  ;;  %v7348_v19 = vrot.slane %v2922_v42, %v6146_v47  ;;  %v7354_v56 = vrot.slane %v3090_v8, %v6146_v47  ;;  %v3105_v0 = vrot.slane %v3091_v44, %v6146_v47  ;;  %v7361_v28 = vrot.slane %v2954_v13, %v6146_v47 }
 0x5b8   : > { %v3010_v57 = vcombine.low %v2683_v18, %v2691_v10  ;;  %v3011_v11 = vcombine.high %v2683_v18, %v2691_v10  ;;  %v2687_v59 = vpop.permute.xlu1 %2686  ;;  %v7363_v49 = vpack.i.bf16 %v3741_v58, %v3605_v43  ;;  %v2937_v8 = vrot.slane %v2923_v24, %v6146_v47 }
 0x5b9   : > { %v2994_v42 = vcombine.low %v2679_v21, %v2687_v59  ;;  %v2995_v34 = vcombine.high %v2679_v21, %v2687_v59  ;;  %5266 = vrot.lane.b32.xlu1 %v5265_v40, %s5550_s17  ;;  %v2969_v5 = vrot.slane %v2955_v22, %v6146_v47  ;;  %v2978_v44 = vrot.slane %v2970_v29, %v6146_v47 }
 0x5ba   : > { %v3018_v13 = vrot.slane %v3010_v57, %v5769_v9  ;;  %v3025_v21 = vrot.slane %v3011_v11, %v5769_v9  ;;  %v2985_v35 = vrot.slane %v2971_v37, %v6146_v47  ;;  %v8115_v24 = vcombine.low %v7165_v16, %v7145_v14 }
 0x5bb   : > { %v3002_v23 = vrot.slane %v2994_v42, %v5769_v9  ;;  %v3009_v50 = vrot.slane %v2995_v34, %v5769_v9  ;;  %v2741_v26 = vpop.permute.xlu0 %2740  ;;  %v2987_v29 = vcombine.high %v7348_v19, %v7361_v28  ;;  %v8116_v22 = vcombine.high %v7165_v16, %v7145_v14 }
 0x5bc   : > { %v2946_v38 = vrot.slane %v8115_v24, %v6146_v47  ;;  %v2737_v33 = vpop.permute.xlu1 %2736  ;;  %v8117_v1 = vcombine.high %v7153_v32, %v7159_v17  ;;  %v2988_v18 = vcombine.low %v2937_v8, %v2969_v5  ;;  %v2989_v6 = vcombine.high %v2937_v8, %v2969_v5 }
 0x5bd   : > { %v2953_v2 = vrot.slane %v8116_v22, %v6146_v47  ;;  %v3058_v61 = vcombine.low %v3002_v23, %v3018_v13  ;;  %v3059_v51 = vcombine.high %v3002_v23, %v3018_v13  ;;  %v3074_v48 = vcombine.low %v3009_v50, %v3025_v21  ;;  %5276 = vrot.lane.b32.xlu1 %v5275_v3, %s5551_s19 }
 0x5be   : > { %v3121_v39 = vrot.slane %v8117_v1, %v6146_v47  ;;  %v3075_v30 = vcombine.high %v3009_v50, %v3025_v21  ;;  %v2990_v40 = vcombine.low %v2946_v38, %v2978_v44  ;;  %v2991_v46 = vcombine.high %v2946_v38, %v2978_v44 }
 0x5bf   : > { %v7399_v14 = vrot.slane %v3058_v61, %v6146_v47  ;;  %v3073_v16 = vrot.slane %v3059_v51, %v6146_v47  ;;  %v3082_v32 = vrot.slane %v3074_v48, %v6146_v47  ;;  %v2749_v17 = vpop.permute.xlu0 %2748  ;;  %v2992_v43 = vcombine.low %v2953_v2, %v2985_v35 }
 0x5c0   : > { %v3089_v58 = vrot.slane %v3075_v30, %v6146_v47  ;;  %v3758_v37 = vcombine.low %v2741_v26, %v2749_v17  ;;  %v3759_v10 = vcombine.high %v2741_v26, %v2749_v17  ;;  %v2745_v57 = vpop.permute.xlu1 %2744  ;;  %v2993_v11 = vcombine.high %v2953_v2, %v2985_v35 }
 0x5c1   : > { %v3742_v3 = vcombine.low %v2737_v33, %v2745_v57  ;;  %v3743_v59 = vcombine.high %v2737_v33, %v2745_v57  ;;  %5286 = vrot.lane.b32.xlu1 %v5285_v52, %s5552_s20  ;;  %v3123_v42 = vcombine.high %v7399_v14, %v7354_v56  ;;  %v3124_v34 = vcombine.low %v3073_v16, %v3105_v0 }
 0x5c2   : > { %v7408_v8 = vrot.slane %v3758_v37, %v5769_v9  ;;  %v7411_v5 = vrot.slane %v3759_v10, %v5769_v9  ;;  %v3125_v44 = vcombine.high %v3073_v16, %v3105_v0  ;;  %v3126_v13 = vcombine.low %v3082_v32, %v3114_v60 }
 0x5c3   : > { %v7414_v21 = vrot.slane %v3742_v3, %v5769_v9  ;;  %v7417_v35 = vrot.slane %v3743_v59, %v5769_v9  ;;  %v2765_v23 = vpop.permute.xlu0 %2764  ;;  %v5260_v52 = vpack.i.bf16 %v3123_v42, %v2987_v29  ;;  %v5270_v50 = vpack.i.bf16 %v3124_v34, %v2988_v18 }
 0x5c4   : > { %v2761_v26 = vpop.permute.xlu1 %2760  ;;  %v5280_v24 = vpack.i.bf16 %v3125_v44, %v2989_v6  ;;  %v5290_v38 = vpack.i.bf16 %v3126_v13, %v2990_v40  ;;  %v3127_v33 = vcombine.high %v3082_v32, %v3114_v60  ;;  %v3128_v22 = vcombine.low %v3089_v58, %v3121_v39 }
 0x5c5   : > { %v3806_v2 = vcombine.low %v7414_v21, %v7408_v8  ;;  %v3807_v0 = vcombine.high %v7414_v21, %v7408_v8  ;;  %v3822_v1 = vcombine.low %v7417_v35, %v7411_v5  ;;  %v3823_v61 = vcombine.high %v7417_v35, %v7411_v5  ;;  %5261 = vrot.lane.b32.xlu0 %v5260_v52, %s5549_s8 }
 0x5c6   : > { %v7428_v29 = vpack.i.bf16 %v3127_v33, %v2991_v46  ;;  %v7430_v51 = vpack.i.bf16 %v3128_v22, %v2992_v43  ;;  %v3129_v60 = vcombine.high %v3089_v58, %v3121_v39 }
 0x5c7   : > { %v2773_v30 = vpop.permute.xlu0 %2772 }
 0x5c8   : > { %v3790_v18 = vcombine.low %v2765_v23, %v2773_v30  ;;  %v3791_v6 = vcombine.high %v2765_v23, %v2773_v30  ;;  %v2769_v40 = vpop.permute.xlu1 %2768  ;;  %v7434_v16 = vpack.i.bf16 %v3129_v60, %v2993_v11  ;;  %v7443_v11 = vrot.slane %v3806_v2, %v6146_v47 }
 0x5c9   : > { %v3774_v32 = vcombine.low %v2761_v26, %v2769_v40  ;;  %v3775_v17 = vcombine.high %v2761_v26, %v2769_v40  ;;  %5271 = vrot.lane.b32.xlu0 %v5270_v50, %s5550_s17 }
 0x5ca   : > { %v3798_v37 = vrot.slane %v3790_v18, %v5769_v9  ;;  %v3805_v39 = vrot.slane %v3791_v6, %v5769_v9  ;;  %8118 = vst [vmem:[#allocation20_spill] sm:$0xff] %v7443_v11 }
 0x5cb   : > { %v3782_v46 = vrot.slane %v3774_v32, %v5769_v9  ;;  %v2817_v43 = vpop.permute.xlu0 %2816  ;;  %v3789_v58 = vrot.slane %v3775_v17, %v5769_v9 }
 0x5cc   : > { %v2813_v10 = vpop.permute.xlu1 %2812 }
 0x5cd   : > { %v3838_v57 = vcombine.low %v3782_v46, %v3798_v37  ;;  %5281 = vrot.lane.b32.xlu0 %v5280_v24, %s5551_s19  ;;  %v3839_v3 = vcombine.high %v3782_v46, %v3798_v37  ;;  %v3854_v34 = vcombine.low %v3789_v58, %v3805_v39  ;;  %v3855_v8 = vcombine.high %v3789_v58, %v3805_v39 }
 0x5ce   : > { %v3821_v37 = vrot.slane %v3807_v0, %v6146_v47  ;;  %v3830_v46 = vrot.slane %v3822_v1, %v6146_v47  ;;  %v8121_v39 = vcombine.low %v7080_v27, %v7107_v7 }
 0x5cf   : > { %v7446_v59 = vrot.slane %v3838_v57, %v6146_v47  ;;  %v2825_v42 = vpop.permute.xlu0 %2824  ;;  %v3853_v22 = vrot.slane %v3839_v3, %v6146_v47  ;;  %v3862_v2 = vrot.slane %v3854_v34, %v6146_v47  ;;  %v3869_v60 = vrot.slane %v3855_v8, %v6146_v47 }
 0x5d0   : > { %v3926_v5 = vcombine.low %v2817_v43, %v2825_v42  ;;  %v3927_v44 = vcombine.high %v2817_v43, %v2825_v42  ;;  %v2821_v13 = vpop.permute.xlu1 %2820  ;;  %v3837_v43 = vrot.slane %v3823_v61, %v6146_v47  ;;  %v3966_v58 = vrot.slane %v8121_v39, %v6146_v47 }
 0x5d1   : > { %8119 = vst [vmem:[#allocation22_spill] sm:$0xff] %v7446_v59  ;;  %v3910_v35 = vcombine.low %v2813_v10, %v2821_v13  ;;  %v3911_v23 = vcombine.high %v2813_v10, %v2821_v13  ;;  %5291 = vrot.lane.b32.xlu0 %v5290_v38, %s5552_s20  ;;  %v8120_v38 = vcombine.low %v7077_v53, %v7104_v4 }
 0x5d2   : > { %v3934_v52 = vrot.slane %v3926_v5, %v5769_v9  ;;  %v3941_v50 = vrot.slane %v3927_v44, %v5769_v9  ;;  %v3875_v1 = vcombine.high %v3830_v46, %v3862_v2  ;;  %v3871_v61 = vcombine.high %v7443_v11, %v7446_v59 }
 0x5d3   : > { %v3918_v26 = vrot.slane %v3910_v35, %v5769_v9  ;;  %v3925_v24 = vrot.slane %v3911_v23, %v5769_v9  ;;  %v7455_v33 = vpop.permute.xlu0 %2738  ;;  %v7464_v30 = vrot.slane %v8120_v38, %v6146_v47  ;;  %v8123_v34 = vcombine.high %v7077_v53, %v7104_v4 }
 0x5d4   : > { %v7466_v18 = vpop.permute.xlu1 %2734  ;;  %v8124_v5 = vcombine.high %v7080_v27, %v7107_v7  ;;  %v3872_v23 = vcombine.low %v3821_v37, %v3853_v22  ;;  %v3873_v53 = vcombine.high %v3821_v37, %v3853_v22  ;;  %v3874_v4 = vcombine.low %v3830_v46, %v3862_v2 }
 0x5d5   : > { %v3974_v6 = vcombine.low %v3918_v26, %v3934_v52  ;;  %v3975_v40 = vcombine.high %v3918_v26, %v3934_v52  ;;  %v3990_v32 = vcombine.low %v3925_v24, %v3941_v50  ;;  %v3991_v17 = vcombine.high %v3925_v24, %v3941_v50  ;;  %5296 = vrot.lane.b32.xlu0 %v7338_v45, %s5553_s22 }
 0x5d6   : > { %v3957_v8 = vrot.slane %v8123_v34, %v6146_v47  ;;  %v3973_v44 = vrot.slane %v8124_v5, %v6146_v47  ;;  %v3877_v52 = vcombine.high %v3837_v43, %v3869_v60  ;;  %v3876_v2 = vcombine.low %v3837_v43, %v3869_v60 }
 0x5d7   : > { %v7478_v10 = vrot.slane %v3974_v6, %v6146_v47  ;;  %v3989_v57 = vrot.slane %v3975_v40, %v6146_v47  ;;  %v3998_v3 = vrot.slane %v3990_v32, %v6146_v47  ;;  %v4005_v45 = vrot.slane %v3991_v17, %v6146_v47  ;;  %v7483_v42 = vpop.permute.xlu0 %2746 }
 0x5d8   : > { %v7485_v0 = vpop.permute.xlu1 %2742  ;;  %v3146_v24 = vcombine.low %v7455_v33, %v7483_v42  ;;  %v3147_v13 = vcombine.high %v7455_v33, %v7483_v42 }
 0x5d9   : > { %8122 = vst [vmem:[#allocation21_spill] sm:$0xff] %v7478_v10  ;;  %5301 = vrot.lane.b32.xlu0 %v7428_v29, %s5553_s22  ;;  %v4011_v35 = vcombine.high %v3966_v58, %v3998_v3  ;;  %v4007_v50 = vcombine.high %v7464_v30, %v7478_v10  ;;  %v4008_v26 = vcombine.low %v3957_v8, %v3989_v57 }
 0x5da   : > { %v3130_v27 = vcombine.low %v7466_v18, %v7485_v0  ;;  %v4013_v29 = vcombine.high %v3973_v44, %v4005_v45  ;;  %v4009_v17 = vcombine.high %v3957_v8, %v3989_v57  ;;  %v4010_v22 = vcombine.low %v3966_v58, %v3998_v3 }
 0x5db   : > { %v7507_v7 = vpop.permute.xlu0 %2762  ;;  %v7509_v38 = vpack.i.bf16 %v4011_v35, %v3875_v1  ;;  %v7513_v40 = vpack.i.bf16 %v4007_v50, %v3871_v61  ;;  %v7515_v32 = vpack.i.bf16 %v4008_v26, %v3872_v23  ;;  %v4012_v1 = vcombine.low %v3973_v44, %v4005_v45 }
 0x5dc   : > { %v7511_v6 = vpop.permute.xlu1 %2758  ;;  %v7519_v37 = vpack.i.bf16 %v4013_v29, %v3877_v52  ;;  %v7521_v46 = vpack.i.bf16 %v4009_v17, %v3873_v53  ;;  %v7523_v39 = vpack.i.bf16 %v4010_v22, %v3874_v4  ;;  %v7526_v34 = vrot.slane %v3146_v24, %v5769_v9 }
 0x5dd   : > { %5306 = vrot.lane.b32.xlu0 %v7340_v54, %s5554_s26  ;;  %v7529_v61 = vrot.slane %v3130_v27, %v5769_v9  ;;  %v7532_v3 = vpack.i.bf16 %v4012_v1, %v3876_v2  ;;  %v8125_v22 = vcombine.low %v7196_v25, %v7202_v41 }
 0x5df   : > { %v2771_v5 = vpop.permute.xlu0 %2770  ;;  %v3194_v43 = vcombine.low %v7529_v61, %v7526_v34  ;;  %v7571_v2 = vrot.slane %v8125_v22, %v6146_v47  ;;  %v3131_v22 = vcombine.high %v7466_v18, %v7485_v0 }
 0x5e0   : > { %v3178_v58 = vcombine.low %v7507_v7, %v2771_v5  ;;  %v2767_v57 = vpop.permute.xlu1 %2766  ;;  %v3179_v31 = vcombine.high %v7507_v7, %v2771_v5 }
 0x5e1   : > { %v3162_v54 = vcombine.low %v7511_v6, %v2767_v57  ;;  %5311 = vrot.lane.b32.xlu0 %v7430_v51, %s5554_s26  ;;  %v7550_v23 = vrot.slane %v3194_v43, %v6146_v47  ;;  %v3163_v59 = vcombine.high %v7511_v6, %v2767_v57 }
 0x5e2   : > { %v7538_v60 = vrot.slane %v3178_v58, %v5769_v9 }
 0x5e3   : > { %v7543_v45 = vrot.slane %v3162_v54, %v5769_v9  ;;  %v2815_v8 = vpop.permute.xlu0 %2814 }
 0x5e4   : > { %v2811_v44 = vpop.permute.xlu1 %2810 }
 0x5e5   : > { %v3226_v35 = vcombine.low %v7543_v45, %v7538_v60  ;;  %5316 = vrot.lane.b32.xlu0 %v7363_v49, %s5555_s27 }
 0x5e7   : > { %v7553_v51 = vrot.slane %v3226_v35, %v6146_v47  ;;  %v2823_v52 = vpop.permute.xlu0 %2822 }
 0x5e8   : > { %v3314_v50 = vcombine.low %v2815_v8, %v2823_v52  ;;  %v2819_v26 = vpop.permute.xlu1 %2818 }
 0x5e9   : > { %v3298_v4 = vcombine.low %v2811_v44, %v2819_v26  ;;  %5321 = vrot.lane.b32.xlu0 %v7434_v16, %s5555_s27 }
 0x5ea   : > { %v7560_v24 = vrot.slane %v3314_v50, %v5769_v9  ;;  %v3315_v50 = vcombine.high %v2815_v8, %v2823_v52 }
 0x5eb   : > { %v7563_v49 = vrot.slane %v3298_v4, %v5769_v9  ;;  %v2837_v27 = vpop.permute.xlu0 %2836  ;;  %v3299_v4 = vcombine.high %v2811_v44, %v2819_v26 }
 0x5ec   : > { %v2835_v29 = vpop.permute.xlu1 %2834  ;;  %v7585_v8 = vrot.slane %v3315_v50, %v5769_v9 }
 0x5ed   : > { %v3362_v17 = vcombine.low %v7563_v49, %v7560_v24  ;;  %v3313_v44 = vrot.slane %v3299_v4, %v5769_v9  ;;  %v8126_v4 = vmov 0.0  }
 0x5ef   : > { %v7574_v1 = vrot.slane %v3362_v17, %v6146_v47  ;;  %v2841_v16 = vpop.permute.xlu0 %2840 }
 0x5f0   : > { %v2839_v58 = vpop.permute.xlu1 %2838 }
 0x5f3   : > { %v2845_v43 = vpop.permute.xlu0 %2844 }
 0x5f4   : > { %v2843_v35 = vpop.permute.xlu1 %2842  ;;  %v4014_v53 = vcombine.low %v2837_v27, %v2845_v43  ;;  %v4015_v21 = vcombine.high %v2837_v27, %v2845_v43 }
 0x5f5   : > { %v3402_v48 = vcombine.low %v2835_v29, %v2843_v35  ;;  %v3403_v17 = vcombine.high %v2835_v29, %v2843_v35 }
 0x5f6   : > { %v4022_v42 = vrot.slane %v4014_v53, %v5769_v9  ;;  %v7590_v18 = vrot.slane %v4015_v21, %v5769_v9  ;;  %v3177_v21 = vrot.slane %v3163_v59, %v5769_v9  ;;  %v3378_v59 = vcombine.low %v3313_v44, %v7585_v8 }
 0x5f7   : > { %v2849_v15 = vpop.permute.xlu0 %2848  ;;  %v7598_v6 = vrot.slane %v3403_v17, %v5769_v9 }
 0x5f8   : > { %v4030_v54 = vcombine.low %v2841_v16, %v2849_v15  ;;  %v4031_v11 = vcombine.high %v2841_v16, %v2849_v15  ;;  %v2847_v10 = vpop.permute.xlu1 %2846  ;;  %v3410_v15 = vrot.slane %v3402_v48, %v5769_v9  ;;  %v3161_v16 = vrot.slane %v3147_v13, %v5769_v9 }
 0x5f9   : > { %v3418_v52 = vcombine.low %v2839_v58, %v2847_v10  ;;  %v3419_v33 = vcombine.high %v2839_v58, %v2847_v10  ;;  %v3193_v10 = vrot.slane %v3179_v31, %v5769_v9  ;;  %v3145_v31 = vrot.slane %v3131_v22, %v5769_v9 }
 0x5fa   : > { %v4038_v0 = vrot.slane %v4030_v54, %v5769_v9  ;;  %v7594_v7 = vrot.slane %v4031_v11, %v5769_v9 }
 0x5fb   : > { %v3426_v5 = vrot.slane %v3418_v52, %v5769_v9  ;;  %v7602_v57 = vrot.slane %v3419_v33, %v5769_v9  ;;  %v3242_v50 = vcombine.low %v3177_v21, %v3193_v10 }
 0x5fc   : > { %v4046_v26 = vcombine.low %v4022_v42, %v4038_v0  ;;  %v4047_v53 = vcombine.high %v4022_v42, %v4038_v0  ;;  %v4062_v11 = vcombine.low %v7590_v18, %v7594_v7  ;;  %v3210_v42 = vcombine.low %v3145_v31, %v3161_v16 }
 0x5fd   : > { %v3434_v27 = vcombine.low %v3410_v15, %v3426_v5  ;;  %v3435_v29 = vcombine.high %v3410_v15, %v3426_v5  ;;  %v3450_v48 = vcombine.low %v7598_v6, %v7602_v57  ;;  %v3386_v0 = vrot.slane %v3378_v59, %v6146_v47 }
 0x5fe   : > { %v7612_v58 = vrot.slane %v4046_v26, %v6146_v47  ;;  %v4061_v54 = vrot.slane %v4047_v53, %v6146_v47  ;;  %v7624_v13 = vrot.slane %v4062_v11, %v6146_v47  ;;  %v3250_v5 = vrot.slane %v3242_v50, %v6146_v47 }
 0x5ff   : > { %v7618_v43 = vrot.slane %v3434_v27, %v6146_v47  ;;  %v3449_v35 = vrot.slane %v3435_v29, %v6146_v47  ;;  %v7627_v52 = vrot.slane %v3450_v48, %v6146_v47  ;;  %v8127_v53 = vcombine.low %v7199_v62, %v7205_v36 }
 0x600   : > { %v4078_v17 = vcombine.high %v7612_v58, %v8126_v4  ;;  %v3218_v27 = vrot.slane %v3210_v42, %v6146_v47  ;;  %v3363_v48 = vcombine.high %v7563_v49, %v7560_v24  ;;  %v3395_v50 = vcombine.high %v7571_v2, %v7574_v1 }
 0x601   : > { %v5325_v33 = vpack.i.bf16 %v4061_v54, %v3449_v35  ;;  %v3466_v22 = vcombine.high %v7618_v43, %v8126_v4  ;;  %v5330_v26 = vpack.i.bf16 %v7624_v13, %v7627_v52  ;;  %v3354_v11 = vrot.slane %v8127_v53, %v6146_v47 }
 0x602   : > { %v3263_v59 = vcombine.high %v3218_v27, %v3250_v5  ;;  %v3467_v24 = vcombine.high %v3449_v35, %v8126_v4  ;;  %v3195_v49 = vcombine.high %v7529_v61, %v7526_v34  ;;  %v4063_v53 = vcombine.high %v7590_v18, %v7594_v7 }
 0x603   : > { %5326 = vrot.lane.b32.xlu1 %v5325_v33, %s5550_s17  ;;  %v5370_v15 = vpack.i.bf16 %v4078_v17, %v3466_v22  ;;  %v3399_v29 = vcombine.high %v3354_v11, %v3386_v0  ;;  %v3227_v17 = vcombine.high %v7543_v45, %v7538_v60  ;;  %v3259_v33 = vcombine.high %v7550_v23, %v7553_v51 }
 0x604   : > { %v3379_v22 = vcombine.high %v3313_v44, %v7585_v8  ;;  %v3211_v45 = vcombine.high %v3145_v31, %v3161_v16  ;;  %v3209_v34 = vrot.slane %v3195_v49, %v6146_v47  ;;  %v5438_v49 = vld [vmem:[%s5691_s11 + $0x20] sm:$0xff] }
 0x605   : > { %5371 = vrot.lane.b32.xlu0 %v5370_v15, %s5549_s8  ;;  %v5385_v42 = vpack.i.bf16 %v3399_v29, %v3263_v59  ;;  %v3243_v15 = vcombine.high %v3177_v21, %v3193_v10  ;;  %v5340_v60 = vpack.i.bf16 %v3395_v50, %v3259_v33  ;;  %v3241_v8 = vrot.slane %v3227_v17, %v6146_v47 }
 0x606   : > { %v3393_v44 = vrot.slane %v3379_v22, %v6146_v47  ;;  %v8129_v21 = vcombine.high %v7199_v62, %v7205_v36  ;;  %v3225_v31 = vrot.slane %v3211_v45, %v6146_v47  ;;  %v4077_v62 = vrot.slane %v4063_v53, %v6146_v47 }
 0x607   : > { %5331 = vrot.lane.b32.xlu1 %v5330_v26, %s5552_s20  ;;  %v3377_v26 = vrot.slane %v3363_v48, %v6146_v47  ;;  %v3257_v61 = vrot.slane %v3243_v15, %v6146_v47  ;;  %v3262_v50 = vcombine.low %v3218_v27, %v3250_v5  ;;  %v5434_v5 = vld [vmem:[%s5691_s11 + $0x28] sm:$0xff]  ;;  %v5439_v15 = vld [vmem:[%s5691_s11] sm:$0xff] }
 0x608   : > { %v3361_v16 = vrot.slane %v8129_v21, %v6146_v47 }
 0x609   : > { %5381 = vrot.lane.b32.xlu0 %v7509_v38, %s5553_s22  ;;  %v4079_v38 = vcombine.high %v4061_v54, %v8126_v4  ;;  %v8128_v54 = vcombine.high %v7196_v25, %v7202_v41  ;;  %v3451_v25 = vcombine.high %v7598_v6, %v7602_v57  ;;  %v3260_v41 = vcombine.low %v3209_v34, %v3241_v8 }
 0x60a   : > { %v3401_v29 = vcombine.high %v3361_v16, %v3393_v44  ;;  %v3265_v59 = vcombine.high %v3225_v31, %v3257_v61  ;;  %v3261_v6 = vcombine.high %v3209_v34, %v3241_v8  ;;  %v3398_v57 = vcombine.low %v3354_v11, %v3386_v0  ;;  %v5435_v11 = vld [vmem:[%s5691_s11 + $0x8] sm:$0xff] }
 0x60b   : > { %5336 = vrot.lane.b32.xlu1 %v7513_v40, %s5549_s8  ;;  %v5395_v40 = vpack.i.bf16 %v4079_v38, %v3467_v24  ;;  %v3345_v35 = vrot.slane %v8128_v54, %v6146_v47  ;;  %v3465_v36 = vrot.slane %v3451_v25, %v6146_v47  ;;  %v3264_v33 = vcombine.low %v3225_v31, %v3257_v61  ;;  %v5437_v24 = vld [vmem:[%s5691_s11 + $0x18] sm:$0xff] }
 0x60c   : > { %v5410_v18 = vpack.i.bf16 %v3401_v29, %v3265_v59  ;;  %v5375_v17 = vpack.i.bf16 %v3398_v57, %v3262_v50  ;;  %v3468_v0 = vcombine.high %v7627_v52, %v8126_v4  ;;  %v4580_v27 = vcombine.low %v5435_v11, %v5434_v5 }
 0x60d   : > { %5386 = vrot.lane.b32.xlu0 %v5385_v42, %s5553_s22  ;;  %v3396_v10 = vcombine.low %v3345_v35, %v3377_v26  ;;  %v3397_v7 = vcombine.high %v3345_v35, %v3377_v26  ;;  %v5436_v42 = vld [vmem:[%s5691_s11 + $0x38] sm:$0xff]  ;;  %v5440_v26 = vld [vmem:[%s5691_s11 + $0x30] sm:$0xff]  ;;  %v3469_v52 = vcombine.high %v3465_v36, %v8126_v4 }
 0x60e   : > { %v4596_v38 = vcombine.low %v5437_v24, %v5436_v42  ;;  %v4597_v25 = vcombine.high %v5437_v24, %v5436_v42 }
 0x60f   : > { %5341 = vrot.lane.b32.xlu1 %v5340_v60, %s5549_s8  ;;  %v5350_v48 = vpack.i.bf16 %v3396_v10, %v3260_v41  ;;  %v5441_v60 = vld [vmem:[%s5691_s11 + $0x10] sm:$0xff]  ;;  %v4581_v10 = vcombine.high %v5435_v11, %v5434_v5  ;;  %s7959_s11 = scalar_lea.vmem [#allocation5], %s5002_s9  ;;  %s5014_s9 = sshll.u32 %s5602_s16, 10 }
 0x610   : > { %v4528_v45 = vcombine.low %v5441_v60, %v5440_v26  ;;  %s4922_s23 = sshll.u32 %s7959_s11, 4  ;;  %s7982_s7 = scalar_lea.hbm %s8039_s3, %s5014_s9  ;;  %s7984_s23 = int_to_ptr.vmem [resolvable:$true] %s4922_s23 }
 0x611   : > { %5396 = vrot.lane.b32.xlu0 %v5395_v40, %s5551_s19  ;;  %v4604_v40 = vrot.slane %v4596_v38, %v5769_v9  ;;  %v4595_v59 = vrot.slane %v4581_v10, %v5769_v9  ;;  %s4909_s16 = scalar_lea.sflag [#allocation4], %s5685_s5 }
 0x612   : > { %v4536_v35 = vrot.slane %v4528_v45, %v5769_v9 }
 0x613   : > { %5346 = vrot.lane.b32.xlu1 %v7515_v32, %s5550_s17  ;;  %v5415_v32 = vpack.i.bf16 %v4077_v62, %v3465_v36 }
 0x615   : > { %5406 = vrot.lane.b32.xlu0 %v7519_v37, %s5555_s27  ;;  %v5360_v37 = vpack.i.bf16 %v3397_v7, %v3261_v6  ;;  %v4513_v6 = vcombine.high %v5439_v15, %v5438_v49 }
 0x617   : > { %5351 = vrot.lane.b32.xlu1 %v5350_v48, %s5550_s17  ;;  %v7740_v50 = vrot.slane %v4513_v6, %v5769_v9 }
 0x619   : > { %5411 = vrot.lane.b32.xlu0 %v5410_v18, %s5555_s27 }
 0x61b   : > { %5356 = vrot.lane.b32.xlu1 %v7521_v46, %s5551_s19  ;;  %v3400_v46 = vcombine.low %v3361_v16, %v3393_v44  ;;  %v4081_v44 = vcombine.high %v4077_v62, %v8126_v4 }
 0x61d   : > { %5416 = vrot.lane.b32.xlu0 %v5415_v32, %s5554_s26  ;;  %v5400_v22 = vpack.i.bf16 %v3400_v46, %v3264_v33  ;;  %v5425_v34 = vpack.i.bf16 %v4081_v44, %v3469_v52  ;;  %v4611_v32 = vrot.slane %v4597_v25, %v5769_v9 }
 0x61f   : > { %5361 = vrot.lane.b32.xlu1 %v5360_v37, %s5551_s19  ;;  %v4529_v37 = vcombine.high %v5441_v60, %v5440_v26 }
 0x623   : > { %5366 = vrot.lane.b32.xlu1 %v7523_v39, %s5552_s20  ;;  %v4080_v39 = vcombine.high %v7624_v13, %v8126_v4  ;;  %v4588_v13 = vrot.slane %v4580_v27, %v5769_v9 }
 0x625   : > { %v5420_v8 = vpack.i.bf16 %v4080_v39, %v3468_v0  ;;  %v4612_v61 = vcombine.low %v4588_v13, %v4604_v40  ;;  %v4613_v53 = vcombine.high %v4588_v13, %v4604_v40 }
 0x627   : > { %5376 = vrot.lane.b32.xlu1 %v5375_v17, %s5552_s20  ;;  %v7722_v31 = vrot.slane %v4612_v61, %v6146_v47  ;;  %v5257_v36 = vpop.permute.xlu1 %5256  ;;  %v4627_v7 = vrot.slane %v4613_v53, %v6146_v47  ;;  %v7743_v17 = vrot.slane %v4529_v37, %v5769_v9  ;;  %v8130_v61 = vcombine.low %v7324_v12, %v7304_v63 }
 0x628   : > { %v5259_v60 = vunpack.i.h.bf16 %v5257_v36  ;;  %v5258_v45 = vunpack.i.l.bf16 %v5257_v36 }
 0x629   : > { %v4644_v48 = vcombine.high %v7722_v31, %v8126_v4  ;;  %v4645_v33 = vcombine.high %v4627_v7, %v8126_v4  ;;  %v4560_v39 = vcombine.low %v7740_v50, %v7743_v17 }
 0x62a   : > { %v4398_v10 = vsel %vm2111_vm5, %v8130_v61, %v5259_v60 }
 0x62b   : > { %5391 = vrot.lane.b32.xlu1 %v7532_v3, %s5554_s26  ;;  %v4512_v3 = vcombine.low %v5439_v15, %v5438_v49  ;;  %v5267_v5 = vpop.permute.xlu1 %5266  ;;  %v7759_v42 = vrot.slane %v4560_v39, %v6146_v47  ;;  %v4629_v15 = vcombine.high %v4595_v59, %v4611_v32 }
 0x62c   : > { %v5269_v52 = vunpack.i.h.bf16 %v5267_v5  ;;  %v5268_v44 = vunpack.i.l.bf16 %v5267_v5 }
 0x62d   : > { %v4520_v54 = vrot.slane %v4512_v3, %v5769_v9  ;;  %v7767_v26 = vrot.slane %v4629_v15, %v6146_v47 }
 0x62f   : > { %5401 = vrot.lane.b32.xlu1 %v5400_v22, %s5554_s26  ;;  %v4544_v21 = vcombine.low %v4520_v54, %v4536_v35  ;;  %v4545_v29 = vcombine.high %v4520_v54, %v4536_v35  ;;  %v4628_v22 = vcombine.low %v4595_v59, %v4611_v32  ;;  %v5277_v24 = vpop.permute.xlu1 %5276  ;;  %v4403_v59 = vsel %vm2117_vm6, %v4398_v10, %v5269_v52 }
 0x630   : > { %v5279_v13 = vunpack.i.h.bf16 %v5277_v24  ;;  %v5278_v40 = vunpack.i.l.bf16 %v5277_v24 }
 0x631   : > { %v7725_v41 = vrot.slane %v4544_v21, %v6146_v47  ;;  %v4559_v57 = vrot.slane %v4545_v29, %v6146_v47  ;;  %v4636_v27 = vrot.slane %v4628_v22, %v6146_v47  ;;  %v8131_v21 = vcombine.low %v7275_v55, %v7282_v20 }
 0x632   : > { %v4408_v12 = vsel %vm2123_vm7, %v4403_v59, %v5279_v13 }
 0x633   : > { %5421 = vrot.lane.b32.xlu1 %v5420_v8, %s5553_s22  ;;  %v4576_v62 = vcombine.high %v7725_v41, %v8126_v4  ;;  %v4577_v0 = vcombine.high %v4559_v57, %v8126_v4  ;;  %v4646_v49 = vcombine.high %v4636_v27, %v8126_v4  ;;  %v5287_v8 = vpop.permute.xlu1 %5286  ;;  %v4397_v53 = vsel %vm2111_vm5, %v8131_v21, %v5258_v45 }
 0x634   : > { %v5289_v35 = vunpack.i.h.bf16 %v5287_v8 }
 0x635   : > { %4649 = vrot.lane.b32.xlu0 %v4576_v62, %s5549_s8 }
 0x636   : > { %v4413_v6 = vsel %vm2129_vm8, %v4408_v12, %v5289_v35 }
 0x637   : > { %v7718_v16 = vpop.permute.xlu0 %5261  ;;  %5426 = vrot.lane.b32.xlu1 %v5425_v34, %s5555_s27  ;;  %v5288_v34 = vunpack.i.l.bf16 %v5287_v8 }
 0x638   : > { %v5264_v25 = vunpack.i.h.bf16 %v7718_v16  ;;  %v5263_v29 = vunpack.i.l.bf16 %v7718_v16  ;;  %v8132_v16 = vcombine.low %v7348_v19, %v7361_v28 }
 0x639   : > { %4653 = vrot.lane.b32.xlu0 %v4559_v57, %s5550_s17  ;;  %v8133_v57 = vcombine.low %v7399_v14, %v7354_v56 }
 0x63a   : > { %v4362_v37 = vsel %vm2111_vm5, %v8132_v16, %v5263_v29 }
 0x63b   : > { %v7732_v18 = vpop.permute.xlu0 %5271  ;;  %4677 = vrot.lane.b32.xlu1 %v4644_v48, %s5549_s8  ;;  %v4402_v48 = vsel %vm2117_vm6, %v4397_v53, %v5268_v44 }
 0x63c   : > { %v5274_v62 = vunpack.i.h.bf16 %v7732_v18  ;;  %v5273_v36 = vunpack.i.l.bf16 %v7732_v18  ;;  %v4407_v63 = vsel %vm2123_vm7, %v4402_v48, %v5278_v40  ;;  %v4363_v18 = vsel %vm2111_vm5, %v8133_v57, %v5264_v25 }
 0x63d   : > { %4657 = vrot.lane.b32.xlu0 %v4577_v0, %s5551_s19  ;;  %v4412_v32 = vsel %vm2129_vm8, %v4407_v63, %v5288_v34 }
 0x63e   : > { %v4367_v0 = vsel %vm2117_vm6, %v4362_v37, %v5273_v36  ;;  %v4368_v39 = vsel %vm2117_vm6, %v4363_v18, %v5274_v62 }
 0x63f   : > { %v7745_v46 = vpop.permute.xlu0 %5281  ;;  %4681 = vrot.lane.b32.xlu1 %v4627_v7, %s5550_s17 }
 0x640   : > { %v5284_v5 = vunpack.i.h.bf16 %v7745_v46 }
 0x641   : > { %4661 = vrot.lane.b32.xlu0 %v7759_v42, %s5552_s20 }
 0x642   : > { %v4373_v13 = vsel %vm2123_vm7, %v4368_v39, %v5284_v5 }
 0x643   : > { %v7753_v11 = vpop.permute.xlu0 %5291  ;;  %4685 = vrot.lane.b32.xlu1 %v4645_v33, %s5551_s19 }
 0x644   : > { %v5294_v24 = vunpack.i.h.bf16 %v7753_v11  ;;  %v5293_v19 = vunpack.i.l.bf16 %v7753_v11 }
 0x647   : > { %v5297_v38 = vpop.permute.xlu0 %5296  ;;  %4689 = vrot.lane.b32.xlu1 %v4636_v27, %s5552_s20  ;;  %v5283_v27 = vunpack.i.l.bf16 %v7745_v46 }
 0x648   : > { %v5299_v7 = vunpack.i.h.bf16 %v5297_v38  ;;  %v5298_v55 = vunpack.i.l.bf16 %v5297_v38 }
 0x649   : > { %v4372_v46 = vsel %vm2123_vm7, %v4367_v0, %v5283_v27 }
 0x64a   : > { %v4417_v38 = vsel %vm2135_vm9, %v4412_v32, %v5298_v55  ;;  %v4418_v56 = vsel %vm2135_vm9, %v4413_v6, %v5299_v7 }
 0x64b   : > { %v5302_v3 = vpop.permute.xlu0 %5301  ;;  %4693 = vrot.lane.b32.xlu1 %v4646_v49, %s5553_s22 }
 0x64c   : > { %v5304_v14 = vunpack.i.h.bf16 %v5302_v3  ;;  %v5303_v49 = vunpack.i.l.bf16 %v5302_v3  ;;  %v4378_v3 = vsel %vm2129_vm8, %v4373_v13, %v5294_v24 }
 0x64e   : > { %v4383_v10 = vsel %vm2135_vm9, %v4378_v3, %v5304_v14 }
 0x64f   : > { %v5307_v54 = vpop.permute.xlu0 %5306  ;;  %4697 = vrot.lane.b32.xlu1 %v7767_v26, %s5554_s26 }
 0x650   : > { %v5309_v33 = vunpack.i.h.bf16 %v5307_v54  ;;  %v5308_v22 = vunpack.i.l.bf16 %v5307_v54  ;;  %v4377_v54 = vsel %vm2129_vm8, %v4372_v46, %v5293_v19  ;;  %v8134_v46 = vld [vmem:[#allocation21_spill] sm:$0xff] }
 0x651   : > { %v4382_v61 = vsel %vm2135_vm9, %v4377_v54, %v5303_v49  ;;  %v8135_v13 = vcombine.low %v7464_v30, %v8134_v46  ;;  %v8137_v54 = vld [vmem:[#allocation22_spill] sm:$0xff] }
 0x652   : > { %v4422_v52 = vsel %vm2141_vm10, %v4417_v38, %v5308_v22  ;;  %v4423_v44 = vsel %vm2141_vm10, %v4418_v56, %v5309_v33 }
 0x653   : > { %v5312_v20 = vpop.permute.xlu0 %5311 }
 0x654   : > { %v5314_v45 = vunpack.i.h.bf16 %v5312_v20  ;;  %v5313_v8 = vunpack.i.l.bf16 %v5312_v20 }
 0x656   : > { %v4387_v25 = vsel %vm2141_vm10, %v4382_v61, %v5313_v8  ;;  %v4388_v29 = vsel %vm2141_vm10, %v4383_v10, %v5314_v45  ;;  %v8140_v61 = vcombine.low %v7550_v23, %v7553_v51 }
 0x657   : > { %v5317_v28 = vpop.permute.xlu0 %5316 }
 0x658   : > { %v5319_v15 = vunpack.i.h.bf16 %v5317_v28  ;;  %v5318_v60 = vunpack.i.l.bf16 %v5317_v28 }
 0x65a   : > { %v4427_v11 = vsel %vm2147_vm11, %v4422_v52, %v5318_v60  ;;  %v4428_v40 = vsel %vm2147_vm11, %v4423_v44, %v5319_v15 }
 0x65b   : > { %v5322_v35 = vpop.permute.xlu0 %5321  ;;  %v4433_v34 = vpack.c.bf16 %v4428_v40, %v4427_v11  ;;  %v8136_v40 = vld [vmem:[#allocation20_spill] sm:$0xff] }
 0x65c   : > { %v5324_v21 = vunpack.i.h.bf16 %v5322_v35  ;;  %v5323_v53 = vunpack.i.l.bf16 %v5322_v35  ;;  %v8138_v3 = vcombine.low %v8136_v40, %v8137_v54 }
 0x65d   : > { %4448 = vmatprep.subr.bf16.mxu1 %v4433_v34 }
 0x65e   : > { %v4392_v48 = vsel %vm2147_vm11, %v4387_v25, %v5323_v53  ;;  %v4393_v59 = vsel %vm2147_vm11, %v4388_v29, %v5324_v21 }
 0x65f   : > { %v4432_v62 = vpack.c.bf16 %v4393_v59, %v4392_v48 }
 0x661   : > { %4449 = vmatpush1.bf16.msra.mxu1 %v4432_v62 }
 0x675   : > { %v7819_v36 = vpop.permute.xlu1 %5326 }
 0x676   : > { %v5328_v22 = vunpack.i.l.bf16 %v7819_v36  ;;  %v5329_v38 = vunpack.i.h.bf16 %v7819_v36 }
 0x677   : > { %v5372_v55 = vpop.permute.xlu0 %5371 }
 0x678   : > { %v5373_v57 = vunpack.i.l.bf16 %v5372_v55  ;;  %v5374_v33 = vunpack.i.h.bf16 %v5372_v55 }
 0x679   : > { %v7821_v63 = vpop.permute.xlu1 %5331 }
 0x67a   : > { %v4366_v0 = vsel %vm2111_vm5, %v7618_v43, %v5373_v57  ;;  %v4401_v49 = vsel %vm2111_vm5, %v7612_v58, %v5374_v33  ;;  %v8139_v58 = vcombine.low %v7571_v2, %v7574_v1 }
 0x67b   : > { %v5382_v32 = vpop.permute.xlu0 %5381  ;;  %v4371_v15 = vsel %vm2117_vm6, %v4366_v0, %v5328_v22 }
 0x67c   : > { %v5384_v8 = vunpack.i.h.bf16 %v5382_v32  ;;  %v5383_v43 = vunpack.i.l.bf16 %v5382_v32 }
 0x67d   : > { %v5337_v12 = vpop.permute.xlu1 %5336 }
 0x67e   : > { %v5339_v5 = vunpack.i.h.bf16 %v5337_v12  ;;  %v5338_v27 = vunpack.i.l.bf16 %v5337_v12 }
 0x67f   : > { %v7823_v37 = vpop.permute.xlu0 %5386 }
 0x680   : > { %v4400_v11 = vsel %vm2111_vm5, %v8135_v13, %v5339_v5  ;;  %v4399_v35 = vsel %vm2111_vm5, %v8138_v3, %v5338_v27 }
 0x681   : > { %v5342_v7 = vpop.permute.xlu1 %5341 }
 0x682   : > { %v5344_v24 = vunpack.i.h.bf16 %v5342_v7  ;;  %v5343_v19 = vunpack.i.l.bf16 %v5342_v7 }
 0x683   : > { %v7828_v39 = vpop.permute.xlu0 %5396 }
 0x684   : > { %v4365_v34 = vsel %vm2111_vm5, %v8139_v58, %v5344_v24  ;;  %v4364_v10 = vsel %vm2111_vm5, %v8140_v61, %v5343_v19  ;;  %v5399_v7 = vunpack.i.h.bf16 %v7828_v39  ;;  %v5398_v55 = vunpack.i.l.bf16 %v7828_v39 }
 0x685   : > { %v5347_v20 = vpop.permute.xlu1 %5346 }
 0x686   : > { %v5349_v56 = vunpack.i.h.bf16 %v5347_v20  ;;  %v5348_v14 = vunpack.i.l.bf16 %v5347_v20 }
 0x687   : > { %v5407_v25 = vpop.permute.xlu0 %5406 }
 0x688   : > { %v4404_v30 = vsel %vm2117_vm6, %v4399_v35, %v5348_v14  ;;  %v4405_v53 = vsel %vm2117_vm6, %v4400_v11, %v5349_v56  ;;  %v5409_v20 = vunpack.i.h.bf16 %v5407_v25  ;;  %v5408_v32 = vunpack.i.l.bf16 %v5407_v25 }
 0x689   : > { %v5352_v6 = vpop.permute.xlu1 %5351  ;;  %v5389_v14 = vunpack.i.h.bf16 %v7823_v37  ;;  %v4376_v35 = vsel %vm2123_vm7, %v4371_v15, %v5398_v55 }
 0x68a   : > { %v5354_v29 = vunpack.i.h.bf16 %v5352_v6  ;;  %v5353_v48 = vunpack.i.l.bf16 %v5352_v6 }
 0x68b   : > { %v5412_v24 = vpop.permute.xlu0 %5411 }
 0x68c   : > { %v4369_v6 = vsel %vm2117_vm6, %v4364_v10, %v5353_v48  ;;  %v4370_v57 = vsel %vm2117_vm6, %v4365_v34, %v5354_v29  ;;  %v5414_v11 = vunpack.i.h.bf16 %v5412_v24  ;;  %v5413_v40 = vunpack.i.l.bf16 %v5412_v24 }
 0x68d   : > { %v5357_v16 = vpop.permute.xlu1 %5356 }
 0x68e   : > { %v5359_v60 = vunpack.i.h.bf16 %v5357_v16  ;;  %v5358_v45 = vunpack.i.l.bf16 %v5357_v16 }
 0x690   : > { %v4409_v59 = vsel %vm2123_vm7, %v4404_v30, %v5358_v45  ;;  %v4410_v62 = vsel %vm2123_vm7, %v4405_v53, %v5359_v60  ;;  %v5388_v60 = vunpack.i.l.bf16 %v7823_v37  ;;  %v5417_v30 = vpop.permute.xlu0 %5416 }
 0x691   : > { %v5362_v18 = vpop.permute.xlu1 %5361 }
 0x692   : > { %v5364_v2 = vunpack.i.h.bf16 %v5362_v18  ;;  %v5363_v1 = vunpack.i.l.bf16 %v5362_v18 }
 0x694   : > { %v4374_v18 = vsel %vm2123_vm7, %v4369_v6, %v5363_v1  ;;  %v4375_v0 = vsel %vm2123_vm7, %v4370_v57, %v5364_v2  ;;  %v5419_v2 = vunpack.i.h.bf16 %v5417_v30  ;;  %v4438_v6 = vld [vmem:[%s8038_s2] sm:$0x3] }
 0x695   : > { %v5367_v28 = vpop.permute.xlu1 %5366 }
 0x696   : > { %v5369_v52 = vunpack.i.h.bf16 %v5367_v28  ;;  %v5368_v44 = vunpack.i.l.bf16 %v5367_v28 }
 0x698   : > { %v4414_v36 = vsel %vm2129_vm8, %v4409_v59, %v5368_v44  ;;  %v4415_v23 = vsel %vm2129_vm8, %v4410_v62, %v5369_v52 }
 0x699   : > { %v5377_v21 = vpop.permute.xlu1 %5376  ;;  %v4419_v5 = vsel %vm2135_vm9, %v4414_v36, %v5383_v43  ;;  %v4420_v27 = vsel %vm2135_vm9, %v4415_v23, %v5384_v8  ;;  %v4406_v8 = vsel %vm2117_vm6, %v4401_v49, %v5329_v38  ;;  %v5334_v38 = vunpack.i.h.bf16 %v7821_v63 }
 0x69a   : > { %v5379_v51 = vunpack.i.h.bf16 %v5377_v21  ;;  %v5378_v12 = vunpack.i.l.bf16 %v5377_v21  ;;  %v4411_v37 = vsel %vm2123_vm7, %v4406_v8, %v5399_v7  ;;  %v5333_v49 = vunpack.i.l.bf16 %v7821_v63 }
 0x69b   : > { %v4416_v48 = vsel %vm2129_vm8, %v4411_v37, %v5334_v38  ;;  %v5418_v63 = vunpack.i.l.bf16 %v5417_v30 }
 0x69c   : > { %v4379_v39 = vsel %vm2129_vm8, %v4374_v18, %v5378_v12  ;;  %v4380_v19 = vsel %vm2129_vm8, %v4375_v0, %v5379_v51  ;;  %v4381_v29 = vsel %vm2129_vm8, %v4376_v35, %v5333_v49 }
 0x69d   : > { %v5392_v16 = vpop.permute.xlu1 %5391  ;;  %v4384_v54 = vsel %vm2135_vm9, %v4379_v39, %v5388_v60  ;;  %v4385_v3 = vsel %vm2135_vm9, %v4380_v19, %v5389_v14  ;;  %v4647_v14 = vcombine.high %v7767_v26, %v8126_v4  ;;  %v4578_v60 = vcombine.high %v7759_v42, %v8126_v4 }
 0x69e   : > { %v5394_v33 = vunpack.i.h.bf16 %v5392_v16  ;;  %v5393_v22 = vunpack.i.l.bf16 %v5392_v16 }
 0x6a0   : > { %v4424_v28 = vsel %vm2141_vm10, %v4419_v5, %v5393_v22  ;;  %v4425_v56 = vsel %vm2141_vm10, %v4420_v27, %v5394_v33 }
 0x6a1   : > { %v5402_v45 = vpop.permute.xlu1 %5401  ;;  %v4429_v52 = vsel %vm2147_vm11, %v4424_v28, %v5408_v32  ;;  %v4430_v43 = vsel %vm2147_vm11, %v4425_v56, %v5409_v20 }
 0x6a2   : > { %v5404_v44 = vunpack.i.h.bf16 %v5402_v45  ;;  %v5403_v46 = vunpack.i.l.bf16 %v5402_v45  ;;  %v4435_v13 = vpack.c.bf16 %v4430_v43, %v4429_v52  ;;  %v4561_v45 = vcombine.high %v7740_v50, %v7743_v17 }
 0x6a4   : > { %v4389_v58 = vsel %vm2141_vm10, %v4384_v54, %v5403_v46  ;;  %v4390_v34 = vsel %vm2141_vm10, %v4385_v3, %v5404_v44  ;;  %4450 = vmatprep.subr.bf16.mxu1 %v4435_v13  ;;  %v4575_v52 = vrot.slane %v4561_v45, %v6146_v47 }
 0x6a5   : > { %v5422_v61 = vpop.permute.xlu1 %5421  ;;  %v4394_v10 = vsel %vm2147_vm11, %v4389_v58, %v5413_v40  ;;  %v4395_v21 = vsel %vm2147_vm11, %v4390_v34, %v5414_v11 }
 0x6a6   : > { %v5424_v53 = vunpack.i.h.bf16 %v5422_v61  ;;  %v5423_v25 = vunpack.i.l.bf16 %v5422_v61  ;;  %v4434_v15 = vpack.c.bf16 %v4395_v21, %v4394_v10  ;;  %v4579_v43 = vcombine.high %v4575_v52, %v8126_v4 }
 0x6a7   : > { %v4650_v44 = vpop.permute.xlu0 %4649 }
 0x6a8   : > { %v4386_v59 = vsel %vm2135_vm9, %v4381_v29, %v5423_v25  ;;  %v4421_v62 = vsel %vm2135_vm9, %v4416_v48, %v5424_v53  ;;  %4451 = vmatpush1.bf16.msra.mxu1 %v4434_v15  ;;  %v4704_v61 = vsel %vm2111_vm5, %v7725_v41, %v4650_v44 }
 0x6a9   : > { %v5427_v1 = vpop.permute.xlu1 %5426  ;;  %v4426_v51 = vsel %vm2141_vm10, %v4421_v62, %v5419_v2  ;;  %v4391_v12 = vsel %vm2141_vm10, %v4386_v59, %v5418_v63 }
 0x6aa   : > { %v5429_v36 = vunpack.i.h.bf16 %v5427_v1  ;;  %v5428_v23 = vunpack.i.l.bf16 %v5427_v1 }
 0x6ab   : > { %v4654_v42 = vpop.permute.xlu0 %4653 }
 0x6ac   : > { %v4431_v7 = vsel %vm2147_vm11, %v4426_v51, %v5429_v36  ;;  %v4396_v55 = vsel %vm2147_vm11, %v4391_v12, %v5428_v23  ;;  %v4705_v10 = vsel %vm2117_vm6, %v4704_v61, %v4654_v42 }
 0x6ad   : > { %v4437_v20 = vpack.c.bf16 %v4431_v7, %v4431_v7  ;;  %v4436_v32 = vpack.c.bf16 %v4396_v55, %v4396_v55  ;;  %v4678_v8 = vpop.permute.xlu1 %4677 }
 0x6ae   : > { %v4711_v53 = vsel %vm2111_vm5, %v7722_v31, %v4678_v8 }
 0x6af   : > { %5006 = vmatprep.subr.msk.bf16.mxu1 %vm2199_vm12, %v4437_v20  ;;  %v4443_v16 = vsel %vm2199_vm12, %v4436_v32, 0  ;;  %v4658_v11 = vpop.permute.xlu0 %4657 }
 0x6b0   : > { %4453 = vmatpush1.bf16.msra.mxu1 %v4443_v16  ;;  %v4706_v30 = vsel %vm2123_vm7, %v4705_v10, %v4658_v11 }
 0x6b1   : > { %v4682_v26 = vpop.permute.xlu1 %4681 }
 0x6b2   : > { %v4712_v62 = vsel %vm2117_vm6, %v4711_v53, %v4682_v26 }
 0x6b3   : > { %5007 = vmatmul.mubr.msk.bf16.vlgmr.msra.gmra.mrb[0].mxu1 %vm2195_vm13, %v4438_v6  ;;  %v4662_v17 = vpop.permute.xlu0 %4661 }
 0x6b4   : > { %v4707_v25 = vsel %vm2129_vm8, %v4706_v30, %v4662_v17 }
 0x6b5   : > { %v4686_v46 = vpop.permute.xlu1 %4685 }
 0x6b6   : > { %v4713_v36 = vsel %vm2123_vm7, %v4712_v62, %v4686_v46 }
 0x6b9   : > { %v4690_v13 = vpop.permute.xlu1 %4689 }
 0x6ba   : > { %v4714_v31 = vsel %vm2129_vm8, %v4713_v36, %v4690_v13 }
 0x6bd   : > { %v4694_v50 = vpop.permute.xlu1 %4693 }
 0x6be   : > { %v4715_v51 = vsel %vm2135_vm9, %v4714_v31, %v4694_v50 }
 0x6c1   : > { %v4698_v40 = vpop.permute.xlu1 %4697 }
 0x6c2   : > { %v4716_v55 = vsel %vm2141_vm10, %v4715_v51, %v4698_v40 }
 0x786   : > { %v4482_v57 = vpop.f32.mrb[0].mxu1 }
 0x787   : > { %v4489_v33 = vsel %vm2247_vm14, %v4482_v57, 0.0  ;;  %v4495_v22 = vmul.f32 %v4482_v57, %v4482_v57  ;;  %v7898_v18 = vpop.f32.mrb[1].mxu1 }
 0x788   : > { %v4490_v0 = vsel %vm2247_vm14, %v7898_v18, 0.0  ;;  %v4496_v5 = vmul.f32 %v7898_v18, %v7898_v18  ;;  %v4486_v27 = vpop.f32.mrb[2].mxu1 }
 0x789   : > { %v4487_v24 = vpop.f32.mrb[3].mxu1  ;;  %v4491_v39 = vadd.f32 %v4490_v0, %v4489_v33  ;;  %v4497_v19 = vsel %vm2247_vm14, %v4495_v22, 0.0 }
 0x78a   : > { %v4498_v28 = vsel %vm2247_vm14, %v4496_v5, 0.0 }
 0x78b   : > { %4492 = vadd.xlane.f32.xlu0 %v4491_v39  ;;  %v4499_v56 = vadd.f32 %v4498_v28, %v4497_v19 }
 0x78d   : > { %4500 = vadd.xlane.f32.xlu1 %v4499_v56 }
 0x79e   : > { %4701 = vrot.lane.b32.xlu1 %v4647_v14, %s5555_s27 }
 0x7a1   : > { %4665 = vrot.lane.b32.xlu0 %v4578_v60, %s5553_s22 }
 0x7a5   : > { %4669 = vrot.lane.b32.xlu0 %v4575_v52, %s5554_s26 }
 0x7a9   : > { %4673 = vrot.lane.b32.xlu0 %v4579_v43, %s5555_s27 }
 0x818   : > { %v4493_v54 = vpop.xlane.xlu0 %4492 }
 0x819   : > { %v4494_v3 = vmul.f32 0.00390625, %v4493_v54 }
 0x81a   : > { %v4501_v35 = vpop.xlane.xlu1 %4500 }
 0x81b   : > { %v4502_v37 = vmul.f32 0.00390625, %v4501_v35  ;;  %v4503_v58 = vmul.f32 %v4494_v3, %v4494_v3  ;;  %v4506_v15 = vsub.f32 %v4482_v57, %v4494_v3  ;;  %v4507_v23 = vsub.f32 %v7898_v18, %v4494_v3 }
 0x81c   : > { %v4666_v4 = vpop.permute.xlu0 %4665 }
 0x81d   : > { %v4504_v34 = vsub.f32 %v4502_v37, %v4503_v58  ;;  %v4708_v59 = vsel %vm2135_vm9, %v4707_v25, %v4666_v4 }
 0x81e   : > { %v4702_v12 = vpop.permute.xlu1 %4701 }
 0x81f   : > { %v4505_v38 = vmax.f32 %v4504_v34, 0.0  ;;  %v4717_v20 = vsel %vm2147_vm11, %v4716_v55, %v4702_v12 }
 0x820   : > { %v4670_v21 = vpop.permute.xlu0 %4669 }
 0x821   : > { %v4508_v49 = vadd.f32 1e-05, %v4505_v38  ;;  %v4709_v41 = vsel %vm2141_vm10, %v4708_v59, %v4670_v21 }
 0x823   : > { %5432 = vrsqrt.f32 %v4508_v49 }
 0x824   : > { %v4674_v29 = vpop.permute.xlu0 %4673 }
 0x825   : > { %v4710_v63 = vsel %vm2147_vm11, %v4709_v41, %v4674_v29 }
 0x82d   : > { %v5433_v48 = vpop.eup %5432 }
 0x82e   : > { %v4510_v2 = vmul.f32 %v5433_v48, %v4506_v15  ;;  %v4511_v7 = vmul.f32 %v5433_v48, %v4507_v23 }
 0x830   : > { %v4718_v1 = vadd.f32 %v4710_v63, %v4510_v2  ;;  %v4719_v32 = vadd.f32 %v4717_v20, %v4511_v7 }
 0x832   : > { %4724 = vrot.lane.b32.xlu1 %v4718_v1, %s5554_s26  ;;  %4721 = vrot.lane.b32.xlu0 %v4718_v1, %s5555_s27 }
 0x836   : > { %4730 = vrot.lane.b32.xlu1 %v4718_v1, %s5552_s20  ;;  %4727 = vrot.lane.b32.xlu0 %v4718_v1, %s5553_s22 }
 0x83a   : > { %4736 = vrot.lane.b32.xlu1 %v4718_v1, %s5550_s17  ;;  %4733 = vrot.lane.b32.xlu0 %v4718_v1, %s5551_s19 }
 0x83e   : > { %4743 = vrot.lane.b32.xlu1 %v4719_v32, %s5555_s27  ;;  %4739 = vrot.lane.b32.xlu0 %v4718_v1, %s5549_s8 }
 0x842   : > { %4749 = vrot.lane.b32.xlu1 %v4719_v32, %s5553_s22  ;;  %4746 = vrot.lane.b32.xlu0 %v4719_v32, %s5554_s26 }
 0x846   : > { %4755 = vrot.lane.b32.xlu1 %v4719_v32, %s5551_s19  ;;  %4752 = vrot.lane.b32.xlu0 %v4719_v32, %s5552_s20 }
 0x84a   : > { %4761 = vrot.lane.b32.xlu1 %v4719_v32, %s5549_s8  ;;  %4758 = vrot.lane.b32.xlu0 %v4719_v32, %s5550_s17  ;;  %s5472_s8 = scalar_lea.vmem %s7984_s23, 1024  ;;  %s5558_s17 = smov [#allocation5]  }
 0x84b   : > { %p5473_p6 = scmp.ne.s32.totalorder %s7984_s23, %s5472_s8  ;;  %s5476_s19 = sshll.u32 %s5558_s17, 4  ;;  %s5477_s19 = int_to_ptr.vmem [resolvable:$false] %s5476_s19 }
 0x84c   : > { %s5478_s20 = scalar_lea.vmem %s5477_s19, 2048  ;;  %p5479_p8 = scmp.lt.s32.totalorder %s7984_s23, %s5477_s19 }
 0x84d   : > { %p5474_p12 = pnand %p5473_p6, %p8141_p11  ;;  %p5480_p10 = scmp.lt.s32.totalorder %s5478_s20, %s5472_s8 }
 0x84f   : > { %p5475_p13 = pneg %p5474_p12  ;;  %p5481_p0 = por %p5480_p10, %p5479_p8 }
 0x851   : > { %p5482_p2 = pnand %p5481_p0, %p5475_p13 }
 0x8a4   : > { %v4725_v16 = vpop.permute.xlu1 %4724  ;;  %v4722_v6 = vpop.permute.xlu0 %4721 }
 0x8a5   : > { %v4764_v18 = vcombine.low %v4718_v1, %v4725_v16 }
 0x8a7   : > { %v4771_v39 = vrot.slane %v4764_v18, %v5769_v9 }
 0x8a8   : > { %v4731_v57 = vpop.permute.xlu1 %4730  ;;  %v4728_v33 = vpop.permute.xlu0 %4727 }
 0x8a9   : > { %v4772_v22 = vcombine.low %v4722_v6, %v4728_v33 }
 0x8ab   : > { %v4779_v27 = vrot.slane %v4772_v22, %v5769_v9 }
 0x8ac   : > { %v4737_v0 = vpop.permute.xlu1 %4736  ;;  %v4734_v5 = vpop.permute.xlu0 %4733 }
 0x8ad   : > { %v4780_v24 = vcombine.low %v4731_v57, %v4737_v0  ;;  %v4796_v14 = vcombine.low %v4771_v39, %v4779_v27  ;;  %v4797_v60 = vcombine.high %v4771_v39, %v4779_v27 }
 0x8af   : > { %v4787_v45 = vrot.slane %v4780_v24, %v5769_v9  ;;  %v4804_v46 = vrot.slane %v4796_v14, %v6146_v47  ;;  %v4811_v42 = vrot.slane %v4797_v60, %v6146_v47 }
 0x8b0   : > { %v4744_v19 = vpop.permute.xlu1 %4743  ;;  %v4740_v28 = vpop.permute.xlu0 %4739 }
 0x8b1   : > { %v4788_v56 = vcombine.low %v4734_v5, %v4740_v28 }
 0x8b3   : > { %v4795_v52 = vrot.slane %v4788_v56, %v5769_v9 }
 0x8b4   : > { %v4750_v43 = vpop.permute.xlu1 %4749  ;;  %v4747_v8 = vpop.permute.xlu0 %4746 }
 0x8b5   : > { %v4812_v26 = vcombine.low %v4787_v45, %v4795_v52  ;;  %v4813_v44 = vcombine.high %v4787_v45, %v4795_v52  ;;  %v4840_v50 = vcombine.low %v4744_v19, %v4750_v43  ;;  %v4832_v17 = vcombine.low %v4719_v32, %v4747_v8 }
 0x8b7   : > { %v4820_v13 = vrot.slane %v4812_v26, %v6146_v47  ;;  %v4827_v11 = vrot.slane %v4813_v44, %v6146_v47  ;;  %v4847_v34 = vrot.slane %v4840_v50, %v5769_v9  ;;  %v4839_v38 = vrot.slane %v4832_v17, %v5769_v9 }
 0x8b8   : > { %v4756_v40 = vpop.permute.xlu1 %4755  ;;  %v4753_v54 = vpop.permute.xlu0 %4752 }
 0x8b9   : > { %v4828_v3 = vcombine.low %v4804_v46, %v4820_v13  ;;  %v4829_v35 = vcombine.high %v4804_v46, %v4820_v13  ;;  %v4830_v37 = vcombine.low %v4811_v42, %v4827_v11  ;;  %v4831_v58 = vcombine.high %v4811_v42, %v4827_v11 }
 0x8ba   : > { %v4864_v21 = vcombine.low %v4839_v38, %v4847_v34  ;;  %v4865_v30 = vcombine.high %v4839_v38, %v4847_v34 }
 0x8bb   : > { %4900 = vst.msk [vmem:[%s7959_s11] sm:$0xff] %vm2111_vm5, %v4828_v3  ;;  %4902 = vst.msk [vmem:[%s7959_s11 + $0x10] sm:$0xff] %vm2111_vm5, %v4829_v35 }
 0x8bc   : > { %4904 = vst.msk [vmem:[%s7959_s11 + $0x20] sm:$0xff] %vm2111_vm5, %v4830_v37  ;;  %4906 = vst.msk [vmem:[%s7959_s11 + $0x30] sm:$0xff] %vm2111_vm5, %v4831_v58  ;;  %v4762_v4 = vpop.permute.xlu1 %4761  ;;  %v4759_v49 = vpop.permute.xlu0 %4758  ;;  %v4872_v48 = vrot.slane %v4864_v21, %v6146_v47  ;;  %v4879_v59 = vrot.slane %v4865_v30, %v6146_v47 }
 0x8bd   : > { %v4856_v61 = vcombine.low %v4756_v40, %v4762_v4  ;;  %v4848_v10 = vcombine.low %v4753_v54, %v4759_v49 }
 0x8bf   : > { %v4863_v53 = vrot.slane %v4856_v61, %v5769_v9  ;;  %v4855_v25 = vrot.slane %v4848_v10, %v5769_v9 }
 0x8c1   : > { %v4880_v15 = vcombine.low %v4855_v25, %v4863_v53  ;;  %v4881_v29 = vcombine.high %v4855_v25, %v4863_v53 }
 0x8c3   : > { %v4888_v62 = vrot.slane %v4880_v15, %v6146_v47  ;;  %v4895_v41 = vrot.slane %v4881_v29, %v6146_v47 }
 0x8c5   : > { %v4896_v9 = vcombine.low %v4872_v48, %v4888_v62  ;;  %v4897_v2 = vcombine.high %v4872_v48, %v4888_v62  ;;  %v4898_v63 = vcombine.low %v4879_v59, %v4895_v41  ;;  %v4899_v1 = vcombine.high %v4879_v59, %v4895_v41 }
 0x8c7   : > { %4901 = vst.msk [vmem:[%s7959_s11 + $0x8] sm:$0xff] %vm2111_vm5, %v4896_v9  ;;  %4903 = vst.msk [vmem:[%s7959_s11 + $0x18] sm:$0xff] %vm2111_vm5, %v4897_v2 }
 0x8c8   : > { %4905 = vst.msk [vmem:[%s7959_s11 + $0x28] sm:$0xff] %vm2111_vm5, %v4898_v63  ;;  %4907 = vst.msk [vmem:[%s7959_s11 + $0x38] sm:$0xff] %vm2111_vm5, %v4899_v1 }
 0x8c9   : > { %5485 = shalt.err (!%p5482_p2)
}
 0x8ca   : > { %s5486_s22 = scalar_lea.hbm %s7982_s7, 1024  ;;  %s5490_s28 = scalar_lea.hbm %s8039_s3, 2048 }
 0x8cb   : > { %p5487_p4 = scmp.ne.s32.totalorder %s7982_s7, %s5486_s22  ;;  %p5491_p9 = scmp.lt.u32.totalorder %s7982_s7, %s8039_s3 }
 0x8cc   : > { %p5492_p1 = scmp.lt.u32.totalorder %s5490_s28, %s5486_s22  ;;  %p5494_p6 = scmp.lt.u32.totalorder %s5486_s22, %s7982_s7 }
 0x8cd   : > { %p5488_p5 = pnand %p5487_p4, %p8141_p11 }
 0x8ce   : > { %p5493_p3 = por %p5492_p1, %p5491_p9 }
 0x8cf   : > { %p5489_p7 = pneg %p5488_p5 }
 0x8d0   : > { %p5495_p12 = por %p5494_p6, %p5493_p3 }
 0x8d2   : > { %p5496_p13 = pnand %p5495_p12, %p5489_p7 }
 0x8d4   : > { %5499 = shalt.err (!%p5496_p13)
}
 0x8d5   : > { %s5559_s10 = smov 128   ;;  %s5560_s11 = smov 8  }
 0x8d6   : > { %5017 = dma.vmem_to_hbm [thread:$0]  (%p8141_p11), %s7984_s23, 1024, %s7982_s7, %s4909_s16, %s5559_s10, %s5559_s10, %s5560_s11  }
 0x8d7 PF: > { %s4937_s9 = sand.u32 1, %s5526_s12   ;;  %p8142_p8 = scmp.ne.s32.totalorder %s8066_s25, 0 }
 0x8d8   : > { %p8143_p10 = scmp.ge.s32.totalorder %s5538_s15, 2  ;;  %s4938_s4 = scalar_lea.sflag [#allocation4], %s4937_s9 }
 0x8da   : > { %p5024_p0 = pnand %p8143_p10, %p8142_p8 }
 0x8dc   : > { %5521 = dma.done.wait (!%p5024_p0), %s4938_s4, 1024  }
 0x8dd   : > { %5523 = vsyncadd (!%p5024_p0), %s4938_s4, 4294966272  ;;  %p16_p2 = scmp.ge.s32.totalorder %s5606_s18, 4   ;;  %s8144_s12 = smov %s5530_s13 }
 0x8de   : > { %s8145_s13 = smov %s5534_s14  ;;  %s8146_s14 = smov %s5618_s21 }
 0x8df   : > { %s8147_s15 = smov %s5606_s18  ;;  %18 = sbr.rel (!%p16_p2) target bundleno = 5 (0x5), region = 77 }
 0x8e6   :  { %4943 = vsyncpa [#allocation3], 1 }
 0x8e7   :  { %4945 = vsyncpa [#allocation3 + $0x1], 1 }
 0x8e8   :  { %4946 = vsyncpa [#allocation4], 1 }
 0x8e9   :  { %4948 = vsyncpa [#allocation4 + $0x1], 1 }

</bundles_post_ra>
